<compile_context>
chip_gen: v7x
topology: tpu7x:2x2x1
jax: 0.10.0
libtpu: 0.0.40
codegen_flags: <defaults>
</compile_context>

<pallas_src>
import functools

import jax
import jax.numpy as jnp
import numpy as np
from jax.experimental import pallas as pl
from jax.experimental.pallas import tpu as pltpu


_SHIFTS9 = tuple((dr, dc) for dr in (-1, 0, 1) for dc in (-1, 0, 1))
# ConvTranspose2d(k=4, s=2, p=1) 1-D decomposition: [output parity][dr] -> kh
_TCONV_ROW_TAP = ({0: 1, -1: 3}, {1: 0, 0: 2})


def _round_up(v, m):
    return (v + m - 1) // m * m


def _geom(h, w):
    """Half-res flat-guarded plane geometry."""
    hp, wp = h + 2, w + 2                 # 1-px zero border
    core = hp * wp
    g = wp + 1                            # guard lanes each side (>= max 3x3 shift)
    lh = _round_up(core + 2 * g, 128)     # lane-dense plane width
    return hp, wp, core, g, lh


def _vmem_limit_bytes():
    # Derive the scoped-VMEM cap per generation instead of a fixed 32 MiB.
    try:
        cap = pltpu.get_tpu_info().vmem_capacity_bytes
        return int(min(cap * 3 // 4, 100 * 1024 * 1024))
    except Exception:
        return 48 * 1024 * 1024


def _compiler_params():
    return pltpu.CompilerParams(
        dimension_semantics=("parallel",),    # batch-tile axis -> both v7x TCs
        vmem_limit_bytes=_vmem_limit_bytes(),
    )


def _pp(par, k):
    """Full-res 3x3 tap k at output parity `par` -> (source parity, half shift)."""
    t = par + k - 1
    return t % 2, t // 2                  # Python floor semantics for negatives


# ---------------------------------------------------------------------------
# In-kernel helpers (static Python, traced once).
# ---------------------------------------------------------------------------
def _shift(t, d, lh):
    """t[:, p] -> t[:, p + d] for every in-core lane (wrap lands in guard lanes)."""
    if d == 0:
        return t
    return pltpu.roll(t, (-d) % lh, 1)    # XLU lane rotation, no store-port copy


def _lane_planes(full, lh):
    return lambda s: full[:, s * lh:(s + 1) * lh]


def _row_planes(full, c):
    return lambda s: full[s * c:(s + 1) * c, :]


def _plane_getter(extract, lh):
    """Memoised `(plane sigma, shifted by d)` tiles (<= 16 distinct per group)."""
    planes, shifted = {}, {}

    def get(sigma, d):
        key = (sigma, d)
        if key not in shifted:
            if sigma not in planes:
                planes[sigma] = extract(sigma)
            shifted[key] = _shift(planes[sigma], d, lh)
        return shifted[key]

    return get


# ---------------------------------------------------------------------------
# Kernel A: ConvTranspose2d(4, s=2, p=1)  +  conv1(cat([up, y]))  +  bias
#           + valid mask + BN1 partial statistics.  `up` never leaves VMEM.
# ---------------------------------------------------------------------------
def _tconv_conv1_kernel(x_ref, y_ref, mask_ref, wup_ref, bup_ref,
                        w1u_ref, w1y_ref, b1_ref, z1_ref, st_ref,
                        *, b_tile, cout, wp, lh):
    l4 = 4 * lh
    mask4 = mask_ref[...]                 # (1, 4*lh): 1 at real pixels else 0
    mask1 = mask4[:, :lh]                 # every plane shares the same mask

    # -- transposed conv: all 4 output parities in one (4*Cout)-row accumulator,
    #    9 accumulating dots over the union of half-res shifts; both samples of
    #    the batch tile ride the lane axis.
    xs = [x_ref[b] for b in range(b_tile)]                      # (Cin, lh) each
    acc_up = jnp.zeros((4 * cout, b_tile * lh), jnp.float32)
    for t, (dr, dc) in enumerate(_SHIFTS9):
        d = dr * wp + dc
        rhs = jnp.concatenate([_shift(xb, d, lh) for xb in xs], axis=1)
        acc_up = acc_up + jnp.dot(wup_ref[t], rhs,
                                  preferred_element_type=jnp.float32)

    # per-sample bias + mask: `up` parity planes stay resident in VMEM
    up_get, y_get = [], []
    for b in range(b_tile):
        up_b = (acc_up[:, b * lh:(b + 1) * lh] + bup_ref[...]) * mask1
        up_get.append(_plane_getter(_row_planes(up_b, cout), lh))
        y_get.append(_plane_getter(_lane_planes(y_ref[b], lh), lh))

    # -- conv1 over cat([up, y]) in parity-plane form: fused concat = two
    #    split-K channel groups, two accumulating dots per 3x3 tap.
    acc = jnp.zeros((cout, b_tile * l4), jnp.float32)
    for t in range(9):
        i, j = t // 3, t % 3
        segs_u, segs_y = [], []
        for b in range(b_tile):
            for pq in range(4):
                pr, dr = _pp(pq // 2, i)
                pc, dc = _pp(pq % 2, j)
                sigma, d = 2 * pr + pc, dr * wp + dc
                segs_u.append(up_get[b](sigma, d))
                segs_y.append(y_get[b](sigma, d))
        acc = acc + jnp.dot(w1u_ref[t], jnp.concatenate(segs_u, axis=1),
                            preferred_element_type=jnp.float32)
        acc = acc + jnp.dot(w1y_ref[t], jnp.concatenate(segs_y, axis=1),
                            preferred_element_type=jnp.float32)

    # bias + mask + BN1 partial statistics (sum, sum of squares)
    s1 = jnp.zeros((cout, 1), jnp.float32)
    s2 = jnp.zeros((cout, 1), jnp.float32)
    for b in range(b_tile):
        ob = (acc[:, b * l4:(b + 1) * l4] + b1_ref[...]) * mask4
        z1_ref[b] = ob.astype(z1_ref.dtype)
        s1 = s1 + jnp.sum(ob, axis=1, keepdims=True)
        s2 = s2 + jnp.sum(ob * ob, axis=1, keepdims=True)
    st_ref[0] = jnp.concatenate([s1, s2], axis=1)


# ---------------------------------------------------------------------------
# Kernel B: BN1 (precomputed scale/shift) + ReLU + conv2 + bias + mask
#           + BN2 partial statistics, fused in one pass.
# ---------------------------------------------------------------------------
def _bnrelu_conv2_kernel(z_ref, sc_ref, sh_ref, mask_ref, w2_ref, b2_ref,
                         z2_ref, st_ref, *, b_tile, cout, wp, lh):
    l4 = 4 * lh
    mask4 = mask_ref[...]
    h_get = []
    for b in range(b_tile):
        h = jnp.maximum(z_ref[b] * sc_ref[...] + sh_ref[...], 0.0) * mask4
        h_get.append(_plane_getter(_lane_planes(h, lh), lh))

    acc = jnp.zeros((cout, b_tile * l4), jnp.float32)
    for t in range(9):
        i, j = t // 3, t % 3
        segs = []
        for b in range(b_tile):
            for pq in range(4):
                pr, dr = _pp(pq // 2, i)
                pc, dc = _pp(pq % 2, j)
                segs.append(h_get[b](2 * pr + pc, dr * wp + dc))
        acc = acc + jnp.dot(w2_ref[t], jnp.concatenate(segs, axis=1),
                            preferred_element_type=jnp.float32)

    s1 = jnp.zeros((cout, 1), jnp.float32)
    s2 = jnp.zeros((cout, 1), jnp.float32)
    for b in range(b_tile):
        ob = (acc[:, b * l4:(b + 1) * l4] + b2_ref[...]) * mask4
        z2_ref[b] = ob.astype(z2_ref.dtype)
        s1 = s1 + jnp.sum(ob, axis=1, keepdims=True)
        s2 = s2 + jnp.sum(ob * ob, axis=1, keepdims=True)
    st_ref[0] = jnp.concatenate([s1, s2], axis=1)


# ---------------------------------------------------------------------------
# Kernel C: final BN2 scale/shift + ReLU (elementwise, lane-dense).
# ---------------------------------------------------------------------------
def _bnrelu_kernel(z_ref, sc_ref, sh_ref, o_ref):
    o_ref[...] = jnp.maximum(z_ref[...] * sc_ref[...] + sh_ref[...],
                             0.0).astype(o_ref.dtype)


# ---------------------------------------------------------------------------
# Wrapper-side layout / weight preparation (tiny, one-time XLA glue).
# ---------------------------------------------------------------------------
def _flat_guard(x, g, lh):
    """(N, C, H, W) -> (N, C, lh): 1-px zero border, flattened, guarded lanes."""
    n, c, h, w = x.shape
    xp = jnp.pad(x, ((0, 0), (0, 0), (1, 1), (1, 1)))
    xf = xp.reshape(n, c, (h + 2) * (w + 2))
    return jnp.pad(xf, ((0, 0), (0, 0), (g, lh - g - (h + 2) * (w + 2))))


def _to_parity_planes(y):
    """(N, C, 2H, 2W) -> (N, C, 4, H, W); plane 2p+q = y[:, :, p::2, q::2]."""
    n, c, h2, w2 = y.shape
    yr = y.reshape(n, c, h2 // 2, 2, w2 // 2, 2)
    return yr.transpose(0, 1, 3, 5, 2, 4).reshape(n, c, 4, h2 // 2, w2 // 2)


def _lane_mask(h, w, g, lh):
    core = jnp.pad(jnp.ones((h, w), jnp.float32), ((1, 1), (1, 1))).reshape(-1)
    m = jnp.pad(core, (g, lh - g - core.size))
    return jnp.tile(m, 4).reshape(1, 4 * lh)


def _tconv_tap_weights(wt, bt):
    """ConvTranspose2d(k=4,s=2,p=1) weights merged over the 4 output parities.
    Returns (9, 4*Cout, Cin) per-shift weights and a (4*Cout, 1) bias."""
    cin, cout = wt.shape[0], wt.shape[1]
    ws = []
    for dr, dc in _SHIFTS9:
        blocks = []
        for p in (0, 1):
            for q in (0, 1):
                rt, ct = _TCONV_ROW_TAP[p], _TCONV_ROW_TAP[q]
                if dr in rt and dc in ct:
                    blocks.append(wt[:, :, rt[dr], ct[dc]].T)        # (Cout, Cin)
                else:
                    blocks.append(jnp.zeros((cout, cin), wt.dtype))
        ws.append(jnp.concatenate(blocks, axis=0))                   # (4*Cout, Cin)
    wup = jnp.stack(ws, axis=0).astype(jnp.float32)
    bup = jnp.tile(bt, 4).reshape(4 * cout, 1).astype(jnp.float32)
    return wup, bup


def _conv_tap_weights(w):
    """(Cout, Cin, 3, 3) -> (9, Cout, Cin); tap index t = 3*i + j."""
    co, ci = w.shape[0], w.shape[1]
    return w.transpose(2, 3, 0, 1).reshape(9, co, ci).astype(jnp.float32)


def _bn_scale_shift(stats, gamma, beta, count, eps=1e-5):
    s = stats.sum(axis=0)                                     # (C, 2)
    mean = s[:, 0] / count
    var = jnp.maximum(s[:, 1] / count - mean * mean, 0.0)     # biased (training BN)
    scale = gamma.astype(jnp.float32) * jax.lax.rsqrt(var + eps)
    shift = beta.astype(jnp.float32) - mean * scale
    c = scale.shape[0]
    return scale.reshape(c, 1), shift.reshape(c, 1)


# ---------------------------------------------------------------------------
# Full Upsample_block forward (NCHW in / NCHW out, PyTorch convention).
# ---------------------------------------------------------------------------
def upsample_block(x, y, params, *, b_tile=None):
    n, cin, h, w = x.shape
    cout = params["wt"].shape[1]
    cy = y.shape[1]
    assert y.shape == (n, cy, 2 * h, 2 * w)
    assert cin == cout + cy
    hp, wp, core, g, lh = _geom(h, w)
    l4 = 4 * lh
    if b_tile is None:
        b_tile = 2 if n % 2 == 0 else 1
    assert n % b_tile == 0
    n_tiles = n // b_tile
    count = n * (2 * h) * (2 * w)
    f32 = jnp.float32

    # layout prep: flat-guarded half-res planes (guard baked into the layout)
    x_f = _flat_guard(x.astype(f32), g, lh)                          # (N, Cin, lh)
    y_pl = _to_parity_planes(y.astype(f32))                          # (N, Cy, 4, h, w)
    y_f = _flat_guard(y_pl.reshape(n, cy * 4, h, w), g, lh).reshape(n, cy, l4)
    mask4 = _lane_mask(h, w, g, lh)                                  # (1, 4*lh)

    wup, bup = _tconv_tap_weights(params["wt"], params["bt"])
    w1 = _conv_tap_weights(params["w1"])
    w1u, w1y = w1[:, :, :cout], w1[:, :, cout:]
    w2 = _conv_tap_weights(params["w2"])
    b1 = params["b1"].reshape(cout, 1).astype(f32)
    b2 = params["b2"].reshape(cout, 1).astype(f32)

    cp = _compiler_params()

    # kernel A: tconv + conv1(cat) + bias + mask + BN1 partial stats
    kern_a = functools.partial(_tconv_conv1_kernel, b_tile=b_tile, cout=cout,
                               wp=wp, lh=lh)
    z1, st1 = pl.pallas_call(
        kern_a,
        out_shape=(jax.ShapeDtypeStruct((n, cout, l4), f32),
                   jax.ShapeDtypeStruct((n_tiles, cout, 2), f32)),
        grid=(n_tiles,),
        in_specs=[
            pl.BlockSpec((b_tile, cin, lh), lambda i: (i, 0, 0)),
            pl.BlockSpec((b_tile, cy, l4), lambda i: (i, 0, 0)),
            pl.BlockSpec((1, l4), lambda i: (0, 0)),
            pl.BlockSpec((9, 4 * cout, cin), lambda i: (0, 0, 0)),
            pl.BlockSpec((4 * cout, 1), lambda i: (0, 0)),
            pl.BlockSpec((9, cout, cout), lambda i: (0, 0, 0)),
            pl.BlockSpec((9, cout, cy), lambda i: (0, 0, 0)),
            pl.BlockSpec((cout, 1), lambda i: (0, 0)),
        ],
        out_specs=(pl.BlockSpec((b_tile, cout, l4), lambda i: (i, 0, 0)),
                   pl.BlockSpec((1, cout, 2), lambda i: (i, 0, 0))),
        compiler_params=cp,
    )(x_f, y_f, mask4, wup, bup, w1u, w1y, b1)
    sc1, sh1 = _bn_scale_shift(st1, params["g1"], params["be1"], count)

    # kernel B: BN1+ReLU + conv2 + bias + mask + BN2 partial stats
    kern_b = functools.partial(_bnrelu_conv2_kernel, b_tile=b_tile, cout=cout,
                               wp=wp, lh=lh)
    z2, st2 = pl.pallas_call(
        kern_b,
        out_shape=(jax.ShapeDtypeStruct((n, cout, l4), f32),
                   jax.ShapeDtypeStruct((n_tiles, cout, 2), f32)),
        grid=(n_tiles,),
        in_specs=[
            pl.BlockSpec((b_tile, cout, l4), lambda i: (i, 0, 0)),
            pl.BlockSpec((cout, 1), lambda i: (0, 0)),
            pl.BlockSpec((cout, 1), lambda i: (0, 0)),
            pl.BlockSpec((1, l4), lambda i: (0, 0)),
            pl.BlockSpec((9, cout, cout), lambda i: (0, 0, 0)),
            pl.BlockSpec((cout, 1), lambda i: (0, 0)),
        ],
        out_specs=(pl.BlockSpec((b_tile, cout, l4), lambda i: (i, 0, 0)),
                   pl.BlockSpec((1, cout, 2), lambda i: (i, 0, 0))),
        compiler_params=cp,
    )(z1, sc1, sh1, mask4, w2, b2)
    sc2, sh2 = _bn_scale_shift(st2, params["g2"], params["be2"], count)

    # kernel C: BN2 + ReLU
    out_pl = pl.pallas_call(
        _bnrelu_kernel,
        out_shape=jax.ShapeDtypeStruct((n, cout, l4), f32),
        grid=(n_tiles,),
        in_specs=[
            pl.BlockSpec((b_tile, cout, l4), lambda i: (i, 0, 0)),
            pl.BlockSpec((cout, 1), lambda i: (0, 0)),
            pl.BlockSpec((cout, 1), lambda i: (0, 0)),
        ],
        out_specs=pl.BlockSpec((b_tile, cout, l4), lambda i: (i, 0, 0)),
        compiler_params=cp,
    )(z2, sc2, sh2)

    # parity planes -> NCHW (single cheap pixel-shuffle at the very end)
    z = out_pl.reshape(n, cout, 4, lh)[:, :, :, g:g + core]
    z = z.reshape(n, cout, 2, 2, hp, wp)[:, :, :, :, 1:1 + h, 1:1 + w]
    out = z.transpose(0, 1, 4, 2, 5, 3).reshape(n, cout, 2 * h, 2 * w)
    # TODO(synk): nn.BatchNorm2d running_mean/running_var buffer updates
    # (training-time side effect) are not modeled; forward output is identical.
    return out


# ---------------------------------------------------------------------------
# Pure-JAX reference (lax convs) for the correctness check.
# ---------------------------------------------------------------------------
def ref_forward(x_nchw, y_nchw, params):
    dn = ("NCHW", "OIHW", "NCHW")
    w_eq = jnp.flip(params["wt"], axis=(2, 3)).transpose(1, 0, 2, 3)
    up = jax.lax.conv_general_dilated(x_nchw, w_eq, (1, 1),
                                      ((2, 2), (2, 2)), lhs_dilation=(2, 2),
                                      dimension_numbers=dn)
    up = up + params["bt"].reshape(1, -1, 1, 1)
    xcat = jnp.concatenate([up, y_nchw], axis=1)

    def cbr(x, w, b, g, be):
        o = jax.lax.conv_general_dilated(x, w, (1, 1), ((1, 1), (1, 1)),
                                         dimension_numbers=dn)
        o = o + b.reshape(1, -1, 1, 1)
        mean = o.mean(axis=(0, 2, 3), keepdims=True)
        var = ((o - mean) ** 2).mean(axis=(0, 2, 3), keepdims=True)
        o = (o - mean) * jax.lax.rsqrt(var + 1e-5)
        o = o * g.reshape(1, -1, 1, 1) + be.reshape(1, -1, 1, 1)
        return jnp.maximum(o, 0.0)

    h = cbr(xcat, params["w1"], params["b1"], params["g1"], params["be1"])
    h = cbr(h, params["w2"], params["b2"], params["g2"], params["be2"])
    return h


if __name__ == "__main__":
    # in_channels = 8, out_channels = 4 (skip connection y has Cin - Cout = 4)
    N, CIN, COUT, H, W = 2, 8, 4, 8, 8
    key = jax.random.PRNGKey(0)
    ks = jax.random.split(key, 12)
    x = jax.random.normal(ks[0], (N, CIN, H, W), jnp.float32)
    y = jax.random.normal(ks[1], (N, CIN - COUT, 2 * H, 2 * W), jnp.float32)

    params = dict(
        wt=0.1 * jax.random.normal(ks[2], (CIN, COUT, 4, 4), jnp.float32),
        bt=0.1 * jax.random.normal(ks[3], (COUT,), jnp.float32),
        w1=0.1 * jax.random.normal(ks[4], (COUT, CIN, 3, 3), jnp.float32),
        b1=0.1 * jax.random.normal(ks[5], (COUT,), jnp.float32),
        g1=1.0 + 0.1 * jax.random.normal(ks[6], (COUT,), jnp.float32),
        be1=0.1 * jax.random.normal(ks[7], (COUT,), jnp.float32),
        w2=0.1 * jax.random.normal(ks[8], (COUT, COUT, 3, 3), jnp.float32),
        b2=0.1 * jax.random.normal(ks[9], (COUT,), jnp.float32),
        g2=1.0 + 0.1 * jax.random.normal(ks[10], (COUT,), jnp.float32),
        be2=0.1 * jax.random.normal(ks[11], (COUT,), jnp.float32),
    )

    fwd = jax.jit(upsample_block)
    out = jax.block_until_ready(fwd(x, y, params))
    ref = jax.block_until_ready(ref_forward(x, y, params))

    assert out.shape == (N, COUT, 2 * H, 2 * W), out.shape
    np.testing.assert_allclose(np.asarray(out), np.asarray(ref),
                               rtol=1e-2, atol=1e-2)
    print("KERNEL_OK")
</pallas_src>

<mosaic_0001>
module attributes {stable_mosaic.version = 11 : i64} {
  func.func @_bnrelu_kernel(%arg0: i32, %arg1: memref<2x4x512xf32, #tpu.memory_space<vmem>>, %arg2: memref<4x1xf32, #tpu.memory_space<vmem>>, %arg3: memref<4x1xf32, #tpu.memory_space<vmem>>, %arg4: memref<2x4x512xf32, #tpu.memory_space<vmem>>) attributes {dimension_semantics = [#tpu.dimension_semantics<parallel>], iteration_bounds = array<i64: 1>, scalar_prefetch = 0 : i64, scratch_operands = 0 : i64, tpu.core_type = #tpu.core_type<tc>, window_params = [{transform_indices = @transform_0, window_bounds = array<i64: 2, 4, 512>}, {pipeline_mode = #tpu.pipeline_mode<synchronous>, transform_indices = @transform_1, window_bounds = array<i64: 4, 1>}, {pipeline_mode = #tpu.pipeline_mode<synchronous>, transform_indices = @transform_2, window_bounds = array<i64: 4, 1>}, {transform_indices = @transform_3, window_bounds = array<i64: 2, 4, 512>}]} {
    %c0 = arith.constant 0 : index
    %c0_0 = arith.constant 0 : index
    %c0_1 = arith.constant 0 : index
    %0 = vector.load %arg1[%c0, %c0_0, %c0_1] : memref<2x4x512xf32, #tpu.memory_space<vmem>>, vector<2x4x512xf32>
    %c0_2 = arith.constant 0 : index
    %c0_3 = arith.constant 0 : index
    %1 = vector.load %arg2[%c0_2, %c0_3] : memref<4x1xf32, #tpu.memory_space<vmem>>, vector<4x1xf32>
    %2 = vector.shape_cast %1 : vector<4x1xf32> to vector<1x4x1xf32>
    %3 = vector.broadcast %2 : vector<1x4x1xf32> to vector<2x4x512xf32>
    %4 = arith.mulf %0, %3 : vector<2x4x512xf32>
    %c0_4 = arith.constant 0 : index
    %c0_5 = arith.constant 0 : index
    %5 = vector.load %arg3[%c0_4, %c0_5] : memref<4x1xf32, #tpu.memory_space<vmem>>, vector<4x1xf32>
    %6 = vector.shape_cast %5 : vector<4x1xf32> to vector<1x4x1xf32>
    %7 = vector.broadcast %6 : vector<1x4x1xf32> to vector<2x4x512xf32>
    %8 = arith.addf %4, %7 : vector<2x4x512xf32>
    %cst = arith.constant 0.000000e+00 : f32
    %9 = vector.broadcast %cst : f32 to vector<2x4x512xf32>
    %10 = arith.maximumf %8, %9 : vector<2x4x512xf32>
    %c0_6 = arith.constant 0 : index
    %c0_7 = arith.constant 0 : index
    %c0_8 = arith.constant 0 : index
    %11 = vector.load %arg4[%c0_6, %c0_7, %c0_8] : memref<2x4x512xf32, #tpu.memory_space<vmem>>, vector<2x4x512xf32>
    tpu.vector_store %arg4[%c0_6, %c0_7, %c0_8], %10 {strides = array<i32>} : memref<2x4x512xf32, #tpu.memory_space<vmem>>, vector<2x4x512xf32>,
    return
  }
  func.func @transform_0(%arg0: i32) -> (i32, i32, i32) {
    %c0_i32 = arith.constant 0 : i32
    %c0_i32_0 = arith.constant 0 : i32
    %c0_i32_1 = arith.constant 0 : i32
    return %arg0, %c0_i32, %c0_i32_0 : i32, i32, i32
  }
  func.func @transform_1(%arg0: i32) -> (i32, i32) {
    %c0_i32 = arith.constant 0 : i32
    %c0_i32_0 = arith.constant 0 : i32
    %c0_i32_1 = arith.constant 0 : i32
    return %c0_i32, %c0_i32_0 : i32, i32
  }
  func.func @transform_2(%arg0: i32) -> (i32, i32) {
    %c0_i32 = arith.constant 0 : i32
    %c0_i32_0 = arith.constant 0 : i32
    %c0_i32_1 = arith.constant 0 : i32
    return %c0_i32, %c0_i32_0 : i32, i32
  }
  func.func @transform_3(%arg0: i32) -> (i32, i32, i32) {
    %c0_i32 = arith.constant 0 : i32
    %c0_i32_0 = arith.constant 0 : i32
    %c0_i32_1 = arith.constant 0 : i32
    return %arg0, %c0_i32, %c0_i32_0 : i32, i32, i32
  }
}

module attributes {stable_mosaic.version = 11 : i64} {
  func.func @_tconv_conv1_kernel(%arg0: i32, %arg1: memref<2x8x128xf32, #tpu.memory_space<vmem>>, %arg2: memref<2x4x512xf32, #tpu.memory_space<vmem>>, %arg3: memref<1x512xf32, #tpu.memory_space<vmem>>, %arg4: memref<9x16x8xf32, #tpu.memory_space<vmem>>, %arg5: memref<16x1xf32, #tpu.memory_space<vmem>>, %arg6: memref<9x4x4xf32, #tpu.memory_space<vmem>>, %arg7: memref<9x4x4xf32, #tpu.memory_space<vmem>>, %arg8: memref<4x1xf32, #tpu.memory_space<vmem>>, %arg9: memref<2x4x512xf32, #tpu.memory_space<vmem>>, %arg10: memref<1x4x2xf32, #tpu.memory_space<vmem>>) attributes {dimension_semantics = [#tpu.dimension_semantics<parallel>], iteration_bounds = array<i64: 1>, scalar_prefetch = 0 : i64, scratch_operands = 0 : i64, tpu.core_type = #tpu.core_type<tc>, window_params = [{transform_indices = @transform_0, window_bounds = array<i64: 2, 8, 128>}, {transform_indices = @transform_1, window_bounds = array<i64: 2, 4, 512>}, {pipeline_mode = #tpu.pipeline_mode<synchronous>, transform_indices = @transform_2, window_bounds = array<i64: 1, 512>}, {pipeline_mode = #tpu.pipeline_mode<synchronous>, transform_indices = @transform_3, window_bounds = array<i64: 9, 16, 8>}, {pipeline_mode = #tpu.pipeline_mode<synchronous>, transform_indices = @transform_4, window_bounds = array<i64: 16, 1>}, {pipeline_mode = #tpu.pipeline_mode<synchronous>, transform_indices = @transform_5, window_bounds = array<i64: 9, 4, 4>}, {pipeline_mode = #tpu.pipeline_mode<synchronous>, transform_indices = @transform_6, window_bounds = array<i64: 9, 4, 4>}, {pipeline_mode = #tpu.pipeline_mode<synchronous>, transform_indices = @transform_7, window_bounds = array<i64: 4, 1>}, {transform_indices = @transform_8, window_bounds = array<i64: 2, 4, 512>}, {transform_indices = @transform_9, window_bounds = array<i64: 1, 4, 2>}]} {
    %c0 = arith.constant 0 : index
    %c0_0 = arith.constant 0 : index
    %0 = vector.load %arg3[%c0, %c0_0] : memref<1x512xf32, #tpu.memory_space<vmem>>, vector<1x512xf32>
    %1 = vector.extract_strided_slice %0 {offsets = [0, 0], sizes = [1, 128], strides = [1, 1]} : vector<1x512xf32> to vector<1x128xf32>
    %c0_1 = arith.constant 0 : index
    %c0_2 = arith.constant 0 : index
    %c0_3 = arith.constant 0 : index
    %2 = vector.load %arg1[%c0_1, %c0_2, %c0_3] : memref<2x8x128xf32, #tpu.memory_space<vmem>>, vector<1x8x128xf32>
    %3 = vector.shape_cast %2 : vector<1x8x128xf32> to vector<8x128xf32>
    %c1 = arith.constant 1 : index
    %c0_4 = arith.constant 0 : index
    %c0_5 = arith.constant 0 : index
    %4 = vector.load %arg1[%c1, %c0_4, %c0_5] : memref<2x8x128xf32, #tpu.memory_space<vmem>>, vector<1x8x128xf32>
    %5 = vector.shape_cast %4 : vector<1x8x128xf32> to vector<8x128xf32>
    %cst = arith.constant 0.000000e+00 : f32
    %6 = vector.broadcast %cst : f32 to vector<16x256xf32>
    %c11_i32 = arith.constant 11 : i32
    %7 = tpu.dynamic_rotate %3 by %c11_i32 dim 1 : vector<8x128xf32>, i32 -> vector<8x128xf32>
    %c11_i32_6 = arith.constant 11 : i32
    %8 = tpu.dynamic_rotate %5 by %c11_i32_6 dim 1 : vector<8x128xf32>, i32 -> vector<8x128xf32>
    %9 = tpu.concatenate %7, %8 in 1 : vector<8x128xf32>, vector<8x128xf32> -> vector<8x256xf32>
    %c0_7 = arith.constant 0 : index
    %c0_8 = arith.constant 0 : index
    %c0_9 = arith.constant 0 : index
    %10 = vector.load %arg4[%c0_7, %c0_8, %c0_9] : memref<9x16x8xf32, #tpu.memory_space<vmem>>, vector<1x16x8xf32>
    %11 = vector.shape_cast %10 : vector<1x16x8xf32> to vector<16x8xf32>
    %cst_10 = arith.constant dense<0.000000e+00> : vector<16x256xf32>
    %12 = tpu.matmul %11, %9, %cst_10 {dimension_numbers = #tpu.dot_dimension_numbers<[1], [0], [0], [1], [0, 0, 1, 1], [], []>} : vector<16x8xf32>, vector<8x256xf32>, vector<16x256xf32> -> vector<16x256xf32>
    %13 = arith.addf %6, %12 : vector<16x256xf32>
    %c10_i32 = arith.constant 10 : i32
    %14 = tpu.dynamic_rotate %3 by %c10_i32 dim 1 : vector<8x128xf32>, i32 -> vector<8x128xf32>
    %c10_i32_11 = arith.constant 10 : i32
    %15 = tpu.dynamic_rotate %5 by %c10_i32_11 dim 1 : vector<8x128xf32>, i32 -> vector<8x128xf32>
    %16 = tpu.concatenate %14, %15 in 1 : vector<8x128xf32>, vector<8x128xf32> -> vector<8x256xf32>
    %c1_12 = arith.constant 1 : index
    %c0_13 = arith.constant 0 : index
    %c0_14 = arith.constant 0 : index
    %17 = vector.load %arg4[%c1_12, %c0_13, %c0_14] : memref<9x16x8xf32, #tpu.memory_space<vmem>>, vector<1x16x8xf32>
    %18 = vector.shape_cast %17 : vector<1x16x8xf32> to vector<16x8xf32>
    %cst_15 = arith.constant dense<0.000000e+00> : vector<16x256xf32>
    %19 = tpu.matmul %18, %16, %cst_15 {dimension_numbers = #tpu.dot_dimension_numbers<[1], [0], [0], [1], [0, 0, 1, 1], [], []>} : vector<16x8xf32>, vector<8x256xf32>, vector<16x256xf32> -> vector<16x256xf32>
    %20 = arith.addf %13, %19 : vector<16x256xf32>
    %c9_i32 = arith.constant 9 : i32
    %21 = tpu.dynamic_rotate %3 by %c9_i32 dim 1 : vector<8x128xf32>, i32 -> vector<8x128xf32>
    %c9_i32_16 = arith.constant 9 : i32
    %22 = tpu.dynamic_rotate %5 by %c9_i32_16 dim 1 : vector<8x128xf32>, i32 -> vector<8x128xf32>
    %23 = tpu.concatenate %21, %22 in 1 : vector<8x128xf32>, vector<8x128xf32> -> vector<8x256xf32>
    %c2 = arith.constant 2 : index
    %c0_17 = arith.constant 0 : index
    %c0_18 = arith.constant 0 : index
    %24 = vector.load %arg4[%c2, %c0_17, %c0_18] : memref<9x16x8xf32, #tpu.memory_space<vmem>>, vector<1x16x8xf32>
    %25 = vector.shape_cast %24 : vector<1x16x8xf32> to vector<16x8xf32>
    %cst_19 = arith.constant dense<0.000000e+00> : vector<16x256xf32>
    %26 = tpu.matmul %25, %23, %cst_19 {dimension_numbers = #tpu.dot_dimension_numbers<[1], [0], [0], [1], [0, 0, 1, 1], [], []>} : vector<16x8xf32>, vector<8x256xf32>, vector<16x256xf32> -> vector<16x256xf32>
    %27 = arith.addf %20, %26 : vector<16x256xf32>
    %c1_i32 = arith.constant 1 : i32
    %28 = tpu.dynamic_rotate %3 by %c1_i32 dim 1 : vector<8x128xf32>, i32 -> vector<8x128xf32>
    %c1_i32_20 = arith.constant 1 : i32
    %29 = tpu.dynamic_rotate %5 by %c1_i32_20 dim 1 : vector<8x128xf32>, i32 -> vector<8x128xf32>
    %30 = tpu.concatenate %28, %29 in 1 : vector<8x128xf32>, vector<8x128xf32> -> vector<8x256xf32>
    %c3 = arith.constant 3 : index
    %c0_21 = arith.constant 0 : index
    %c0_22 = arith.constant 0 : index
    %31 = vector.load %arg4[%c3, %c0_21, %c0_22] : memref<9x16x8xf32, #tpu.memory_space<vmem>>, vector<1x16x8xf32>
    %32 = vector.shape_cast %31 : vector<1x16x8xf32> to vector<16x8xf32>
    %cst_23 = arith.constant dense<0.000000e+00> : vector<16x256xf32>
    %33 = tpu.matmul %32, %30, %cst_23 {dimension_numbers = #tpu.dot_dimension_numbers<[1], [0], [0], [1], [0, 0, 1, 1], [], []>} : vector<16x8xf32>, vector<8x256xf32>, vector<16x256xf32> -> vector<16x256xf32>
    %34 = arith.addf %27, %33 : vector<16x256xf32>
    %35 = tpu.concatenate %3, %5 in 1 : vector<8x128xf32>, vector<8x128xf32> -> vector<8x256xf32>
    %c4 = arith.constant 4 : index
    %c0_24 = arith.constant 0 : index
    %c0_25 = arith.constant 0 : index
    %36 = vector.load %arg4[%c4, %c0_24, %c0_25] : memref<9x16x8xf32, #tpu.memory_space<vmem>>, vector<1x16x8xf32>
    %37 = vector.shape_cast %36 : vector<1x16x8xf32> to vector<16x8xf32>
    %cst_26 = arith.constant dense<0.000000e+00> : vector<16x256xf32>
    %38 = tpu.matmul %37, %35, %cst_26 {dimension_numbers = #tpu.dot_dimension_numbers<[1], [0], [0], [1], [0, 0, 1, 1], [], []>} : vector<16x8xf32>, vector<8x256xf32>, vector<16x256xf32> -> vector<16x256xf32>
    %39 = arith.addf %34, %38 : vector<16x256xf32>
    %c127_i32 = arith.constant 127 : i32
    %40 = tpu.dynamic_rotate %3 by %c127_i32 dim 1 : vector<8x128xf32>, i32 -> vector<8x128xf32>
    %c127_i32_27 = arith.constant 127 : i32
    %41 = tpu.dynamic_rotate %5 by %c127_i32_27 dim 1 : vector<8x128xf32>, i32 -> vector<8x128xf32>
    %42 = tpu.concatenate %40, %41 in 1 : vector<8x128xf32>, vector<8x128xf32> -> vector<8x256xf32>
    %c5 = arith.constant 5 : index
    %c0_28 = arith.constant 0 : index
    %c0_29 = arith.constant 0 : index
    %43 = vector.load %arg4[%c5, %c0_28, %c0_29] : memref<9x16x8xf32, #tpu.memory_space<vmem>>, vector<1x16x8xf32>
    %44 = vector.shape_cast %43 : vector<1x16x8xf32> to vector<16x8xf32>
    %cst_30 = arith.constant dense<0.000000e+00> : vector<16x256xf32>
    %45 = tpu.matmul %44, %42, %cst_30 {dimension_numbers = #tpu.dot_dimension_numbers<[1], [0], [0], [1], [0, 0, 1, 1], [], []>} : vector<16x8xf32>, vector<8x256xf32>, vector<16x256xf32> -> vector<16x256xf32>
    %46 = arith.addf %39, %45 : vector<16x256xf32>
    %c119_i32 = arith.constant 119 : i32
    %47 = tpu.dynamic_rotate %3 by %c119_i32 dim 1 : vector<8x128xf32>, i32 -> vector<8x128xf32>
    %c119_i32_31 = arith.constant 119 : i32
    %48 = tpu.dynamic_rotate %5 by %c119_i32_31 dim 1 : vector<8x128xf32>, i32 -> vector<8x128xf32>
    %49 = tpu.concatenate %47, %48 in 1 : vector<8x128xf32>, vector<8x128xf32> -> vector<8x256xf32>
    %c6 = arith.constant 6 : index
    %c0_32 = arith.constant 0 : index
    %c0_33 = arith.constant 0 : index
    %50 = vector.load %arg4[%c6, %c0_32, %c0_33] : memref<9x16x8xf32, #tpu.memory_space<vmem>>, vector<1x16x8xf32>
    %51 = vector.shape_cast %50 : vector<1x16x8xf32> to vector<16x8xf32>
    %cst_34 = arith.constant dense<0.000000e+00> : vector<16x256xf32>
    %52 = tpu.matmul %51, %49, %cst_34 {dimension_numbers = #tpu.dot_dimension_numbers<[1], [0], [0], [1], [0, 0, 1, 1], [], []>} : vector<16x8xf32>, vector<8x256xf32>, vector<16x256xf32> -> vector<16x256xf32>
    %53 = arith.addf %46, %52 : vector<16x256xf32>
    %c118_i32 = arith.constant 118 : i32
    %54 = tpu.dynamic_rotate %3 by %c118_i32 dim 1 : vector<8x128xf32>, i32 -> vector<8x128xf32>
    %c118_i32_35 = arith.constant 118 : i32
    %55 = tpu.dynamic_rotate %5 by %c118_i32_35 dim 1 : vector<8x128xf32>, i32 -> vector<8x128xf32>
    %56 = tpu.concatenate %54, %55 in 1 : vector<8x128xf32>, vector<8x128xf32> -> vector<8x256xf32>
    %c7 = arith.constant 7 : index
    %c0_36 = arith.constant 0 : index
    %c0_37 = arith.constant 0 : index
    %57 = vector.load %arg4[%c7, %c0_36, %c0_37] : memref<9x16x8xf32, #tpu.memory_space<vmem>>, vector<1x16x8xf32>
    %58 = vector.shape_cast %57 : vector<1x16x8xf32> to vector<16x8xf32>
    %cst_38 = arith.constant dense<0.000000e+00> : vector<16x256xf32>
    %59 = tpu.matmul %58, %56, %cst_38 {dimension_numbers = #tpu.dot_dimension_numbers<[1], [0], [0], [1], [0, 0, 1, 1], [], []>} : vector<16x8xf32>, vector<8x256xf32>, vector<16x256xf32> -> vector<16x256xf32>
    %60 = arith.addf %53, %59 : vector<16x256xf32>
    %c117_i32 = arith.constant 117 : i32
    %61 = tpu.dynamic_rotate %3 by %c117_i32 dim 1 : vector<8x128xf32>, i32 -> vector<8x128xf32>
    %c117_i32_39 = arith.constant 117 : i32
    %62 = tpu.dynamic_rotate %5 by %c117_i32_39 dim 1 : vector<8x128xf32>, i32 -> vector<8x128xf32>
    %63 = tpu.concatenate %61, %62 in 1 : vector<8x128xf32>, vector<8x128xf32> -> vector<8x256xf32>
    %c8 = arith.constant 8 : index
    %c0_40 = arith.constant 0 : index
    %c0_41 = arith.constant 0 : index
    %64 = vector.load %arg4[%c8, %c0_40, %c0_41] : memref<9x16x8xf32, #tpu.memory_space<vmem>>, vector<1x16x8xf32>
    %65 = vector.shape_cast %64 : vector<1x16x8xf32> to vector<16x8xf32>
    %cst_42 = arith.constant dense<0.000000e+00> : vector<16x256xf32>
    %66 = tpu.matmul %65, %63, %cst_42 {dimension_numbers = #tpu.dot_dimension_numbers<[1], [0], [0], [1], [0, 0, 1, 1], [], []>} : vector<16x8xf32>, vector<8x256xf32>, vector<16x256xf32> -> vector<16x256xf32>
    %67 = arith.addf %60, %66 : vector<16x256xf32>
    %68 = vector.extract_strided_slice %67 {offsets = [0, 0], sizes = [16, 128], strides = [1, 1]} : vector<16x256xf32> to vector<16x128xf32>
    %c0_43 = arith.constant 0 : index
    %c0_44 = arith.constant 0 : index
    %69 = vector.load %arg5[%c0_43, %c0_44] : memref<16x1xf32, #tpu.memory_space<vmem>>, vector<16x1xf32>
    %70 = vector.broadcast %69 : vector<16x1xf32> to vector<16x128xf32>
    %71 = arith.addf %68, %70 : vector<16x128xf32>
    %72 = vector.broadcast %1 : vector<1x128xf32> to vector<16x128xf32>
    %73 = arith.mulf %71, %72 : vector<16x128xf32>
    %c0_45 = arith.constant 0 : index
    %c0_46 = arith.constant 0 : index
    %c0_47 = arith.constant 0 : index
    %74 = vector.load %arg2[%c0_45, %c0_46, %c0_47] : memref<2x4x512xf32, #tpu.memory_space<vmem>>, vector<1x4x512xf32>
    %75 = vector.shape_cast %74 : vector<1x4x512xf32> to vector<4x512xf32>
    %76 = vector.extract_strided_slice %67 {offsets = [0, 128], sizes = [16, 128], strides = [1, 1]} : vector<16x256xf32> to vector<16x128xf32>
    %c0_48 = arith.constant 0 : index
    %c0_49 = arith.constant 0 : index
    %77 = vector.load %arg5[%c0_48, %c0_49] : memref<16x1xf32, #tpu.memory_space<vmem>>, vector<16x1xf32>
    %78 = vector.broadcast %77 : vector<16x1xf32> to vector<16x128xf32>
    %79 = arith.addf %76, %78 : vector<16x128xf32>
    %80 = vector.broadcast %1 : vector<1x128xf32> to vector<16x128xf32>
    %81 = arith.mulf %79, %80 : vector<16x128xf32>
    %c1_50 = arith.constant 1 : index
    %c0_51 = arith.constant 0 : index
    %c0_52 = arith.constant 0 : index
    %82 = vector.load %arg2[%c1_50, %c0_51, %c0_52] : memref<2x4x512xf32, #tpu.memory_space<vmem>>, vector<1x4x512xf32>
    %83 = vector.shape_cast %82 : vector<1x4x512xf32> to vector<4x512xf32>
    %cst_53 = arith.constant 0.000000e+00 : f32
    %84 = vector.broadcast %cst_53 : f32 to vector<4x1024xf32>
    %85 = vector.extract_strided_slice %73 {offsets = [12, 0], sizes = [4, 128], strides = [1, 1]} : vector<16x128xf32> to vector<4x128xf32>
    %c11_i32_54 = arith.constant 11 : i32
    %86 = tpu.dynamic_rotate %85 by %c11_i32_54 dim 1 : vector<4x128xf32>, i32 -> vector<4x128xf32>
    %87 = vector.extract_strided_slice %75 {offsets = [0, 384], sizes = [4, 128], strides = [1, 1]} : vector<4x512xf32> to vector<4x128xf32>
    %c11_i32_55 = arith.constant 11 : i32
    %88 = tpu.dynamic_rotate %87 by %c11_i32_55 dim 1 : vector<4x128xf32>, i32 -> vector<4x128xf32>
    %89 = vector.extract_strided_slice %73 {offsets = [8, 0], sizes = [4, 128], strides = [1, 1]} : vector<16x128xf32> to vector<4x128xf32>
    %c10_i32_56 = arith.constant 10 : i32
    %90 = tpu.dynamic_rotate %89 by %c10_i32_56 dim 1 : vector<4x128xf32>, i32 -> vector<4x128xf32>
    %91 = vector.extract_strided_slice %75 {offsets = [0, 256], sizes = [4, 128], strides = [1, 1]} : vector<4x512xf32> to vector<4x128xf32>
    %c10_i32_57 = arith.constant 10 : i32
    %92 = tpu.dynamic_rotate %91 by %c10_i32_57 dim 1 : vector<4x128xf32>, i32 -> vector<4x128xf32>
    %93 = vector.extract_strided_slice %73 {offsets = [4, 0], sizes = [4, 128], strides = [1, 1]} : vector<16x128xf32> to vector<4x128xf32>
    %c1_i32_58 = arith.constant 1 : i32
    %94 = tpu.dynamic_rotate %93 by %c1_i32_58 dim 1 : vector<4x128xf32>, i32 -> vector<4x128xf32>
    %95 = vector.extract_strided_slice %75 {offsets = [0, 128], sizes = [4, 128], strides = [1, 1]} : vector<4x512xf32> to vector<4x128xf32>
    %c1_i32_59 = arith.constant 1 : i32
    %96 = tpu.dynamic_rotate %95 by %c1_i32_59 dim 1 : vector<4x128xf32>, i32 -> vector<4x128xf32>
    %97 = vector.extract_strided_slice %73 {offsets = [0, 0], sizes = [4, 128], strides = [1, 1]} : vector<16x128xf32> to vector<4x128xf32>
    %98 = vector.extract_strided_slice %75 {offsets = [0, 0], sizes = [4, 128], strides = [1, 1]} : vector<4x512xf32> to vector<4x128xf32>
    %99 = vector.extract_strided_slice %81 {offsets = [12, 0], sizes = [4, 128], strides = [1, 1]} : vector<16x128xf32> to vector<4x128xf32>
    %c11_i32_60 = arith.constant 11 : i32
    %100 = tpu.dynamic_rotate %99 by %c11_i32_60 dim 1 : vector<4x128xf32>, i32 -> vector<4x128xf32>
    %101 = vector.extract_strided_slice %83 {offsets = [0, 384], sizes = [4, 128], strides = [1, 1]} : vector<4x512xf32> to vector<4x128xf32>
    %c11_i32_61 = arith.constant 11 : i32
    %102 = tpu.dynamic_rotate %101 by %c11_i32_61 dim 1 : vector<4x128xf32>, i32 -> vector<4x128xf32>
    %103 = vector.extract_strided_slice %81 {offsets = [8, 0], sizes = [4, 128], strides = [1, 1]} : vector<16x128xf32> to vector<4x128xf32>
    %c10_i32_62 = arith.constant 10 : i32
    %104 = tpu.dynamic_rotate %103 by %c10_i32_62 dim 1 : vector<4x128xf32>, i32 -> vector<4x128xf32>
    %105 = vector.extract_strided_slice %83 {offsets = [0, 256], sizes = [4, 128], strides = [1, 1]} : vector<4x512xf32> to vector<4x128xf32>
    %c10_i32_63 = arith.constant 10 : i32
    %106 = tpu.dynamic_rotate %105 by %c10_i32_63 dim 1 : vector<4x128xf32>, i32 -> vector<4x128xf32>
    %107 = vector.extract_strided_slice %81 {offsets = [4, 0], sizes = [4, 128], strides = [1, 1]} : vector<16x128xf32> to vector<4x128xf32>
    %c1_i32_64 = arith.constant 1 : i32
    %108 = tpu.dynamic_rotate %107 by %c1_i32_64 dim 1 : vector<4x128xf32>, i32 -> vector<4x128xf32>
    %109 = vector.extract_strided_slice %83 {offsets = [0, 128], sizes = [4, 128], strides = [1, 1]} : vector<4x512xf32> to vector<4x128xf32>
    %c1_i32_65 = arith.constant 1 : i32
    %110 = tpu.dynamic_rotate %109 by %c1_i32_65 dim 1 : vector<4x128xf32>, i32 -> vector<4x128xf32>
    %111 = vector.extract_strided_slice %81 {offsets = [0, 0], sizes = [4, 128], strides = [1, 1]} : vector<16x128xf32> to vector<4x128xf32>
    %112 = vector.extract_strided_slice %83 {offsets = [0, 0], sizes = [4, 128], strides = [1, 1]} : vector<4x512xf32> to vector<4x128xf32>
    %c0_66 = arith.constant 0 : index
    %c0_67 = arith.constant 0 : index
    %c0_68 = arith.constant 0 : index
    %113 = vector.load %arg6[%c0_66, %c0_67, %c0_68] : memref<9x4x4xf32, #tpu.memory_space<vmem>>, vector<1x4x4xf32>
    %114 = vector.shape_cast %113 : vector<1x4x4xf32> to vector<4x4xf32>
    %115 = tpu.concatenate %86, %90, %94, %97, %100, %104, %108, %111 in 1 : vector<4x128xf32>, vector<4x128xf32>, vector<4x128xf32>, vector<4x128xf32>, vector<4x128xf32>, vector<4x128xf32>, vector<4x128xf32>, vector<4x128xf32> -> vector<4x1024xf32>
    %cst_69 = arith.constant dense<0.000000e+00> : vector<4x1024xf32>
    %116 = tpu.matmul %114, %115, %cst_69 {dimension_numbers = #tpu.dot_dimension_numbers<[1], [0], [0], [1], [0, 0, 1, 1], [], []>} : vector<4x4xf32>, vector<4x1024xf32>, vector<4x1024xf32> -> vector<4x1024xf32>
    %117 = arith.addf %84, %116 : vector<4x1024xf32>
    %c0_70 = arith.constant 0 : index
    %c0_71 = arith.constant 0 : index
    %c0_72 = arith.constant 0 : index
    %118 = vector.load %arg7[%c0_70, %c0_71, %c0_72] : memref<9x4x4xf32, #tpu.memory_space<vmem>>, vector<1x4x4xf32>
    %119 = vector.shape_cast %118 : vector<1x4x4xf32> to vector<4x4xf32>
    %120 = tpu.concatenate %88, %92, %96, %98, %102, %106, %110, %112 in 1 : vector<4x128xf32>, vector<4x128xf32>, vector<4x128xf32>, vector<4x128xf32>, vector<4x128xf32>, vector<4x128xf32>, vector<4x128xf32>, vector<4x128xf32> -> vector<4x1024xf32>
    %cst_73 = arith.constant dense<0.000000e+00> : vector<4x1024xf32>
    %121 = tpu.matmul %119, %120, %cst_73 {dimension_numbers = #tpu.dot_dimension_numbers<[1], [0], [0], [1], [0, 0, 1, 1], [], []>} : vector<4x4xf32>, vector<4x1024xf32>, vector<4x1024xf32> -> vector<4x1024xf32>
    %122 = arith.addf %117, %121 : vector<4x1024xf32>
    %c10_i32_74 = arith.constant 10 : i32
    %123 = tpu.dynamic_rotate %85 by %c10_i32_74 dim 1 : vector<4x128xf32>, i32 -> vector<4x128xf32>
    %c10_i32_75 = arith.constant 10 : i32
    %124 = tpu.dynamic_rotate %87 by %c10_i32_75 dim 1 : vector<4x128xf32>, i32 -> vector<4x128xf32>
    %c10_i32_76 = arith.constant 10 : i32
    %125 = tpu.dynamic_rotate %99 by %c10_i32_76 dim 1 : vector<4x128xf32>, i32 -> vector<4x128xf32>
    %c10_i32_77 = arith.constant 10 : i32
    %126 = tpu.dynamic_rotate %101 by %c10_i32_77 dim 1 : vector<4x128xf32>, i32 -> vector<4x128xf32>
    %c1_78 = arith.constant 1 : index
    %c0_79 = arith.constant 0 : index
    %c0_80 = arith.constant 0 : index
    %127 = vector.load %arg6[%c1_78, %c0_79, %c0_80] : memref<9x4x4xf32, #tpu.memory_space<vmem>>, vector<1x4x4xf32>
    %128 = vector.shape_cast %127 : vector<1x4x4xf32> to vector<4x4xf32>
    %129 = tpu.concatenate %90, %123, %97, %93, %104, %125, %111, %107 in 1 : vector<4x128xf32>, vector<4x128xf32>, vector<4x128xf32>, vector<4x128xf32>, vector<4x128xf32>, vector<4x128xf32>, vector<4x128xf32>, vector<4x128xf32> -> vector<4x1024xf32>
    %cst_81 = arith.constant dense<0.000000e+00> : vector<4x1024xf32>
    %130 = tpu.matmul %128, %129, %cst_81 {dimension_numbers = #tpu.dot_dimension_numbers<[1], [0], [0], [1], [0, 0, 1, 1], [], []>} : vector<4x4xf32>, vector<4x1024xf32>, vector<4x1024xf32> -> vector<4x1024xf32>
    %131 = arith.addf %122, %130 : vector<4x1024xf32>
    %c1_82 = arith.constant 1 : index
    %c0_83 = arith.constant 0 : index
    %c0_84 = arith.constant 0 : index
    %132 = vector.load %arg7[%c1_82, %c0_83, %c0_84] : memref<9x4x4xf32, #tpu.memory_space<vmem>>, vector<1x4x4xf32>
    %133 = vector.shape_cast %132 : vector<1x4x4xf32> to vector<4x4xf32>
    %134 = tpu.concatenate %92, %124, %98, %95, %106, %126, %112, %109 in 1 : vector<4x128xf32>, vector<4x128xf32>, vector<4x128xf32>, vector<4x128xf32>, vector<4x128xf32>, vector<4x128xf32>, vector<4x128xf32>, vector<4x128xf32> -> vector<4x1024xf32>
    %cst_85 = arith.constant dense<0.000000e+00> : vector<4x1024xf32>
    %135 = tpu.matmul %133, %134, %cst_85 {dimension_numbers = #tpu.dot_dimension_numbers<[1], [0], [0], [1], [0, 0, 1, 1], [], []>} : vector<4x4xf32>, vector<4x1024xf32>, vector<4x1024xf32> -> vector<4x1024xf32>
    %136 = arith.addf %131, %135 : vector<4x1024xf32>
    %c9_i32_86 = arith.constant 9 : i32
    %137 = tpu.dynamic_rotate %89 by %c9_i32_86 dim 1 : vector<4x128xf32>, i32 -> vector<4x128xf32>
    %c9_i32_87 = arith.constant 9 : i32
    %138 = tpu.dynamic_rotate %91 by %c9_i32_87 dim 1 : vector<4x128xf32>, i32 -> vector<4x128xf32>
    %c127_i32_88 = arith.constant 127 : i32
    %139 = tpu.dynamic_rotate %97 by %c127_i32_88 dim 1 : vector<4x128xf32>, i32 -> vector<4x128xf32>
    %c127_i32_89 = arith.constant 127 : i32
    %140 = tpu.dynamic_rotate %98 by %c127_i32_89 dim 1 : vector<4x128xf32>, i32 -> vector<4x128xf32>
    %c9_i32_90 = arith.constant 9 : i32
    %141 = tpu.dynamic_rotate %103 by %c9_i32_90 dim 1 : vector<4x128xf32>, i32 -> vector<4x128xf32>
    %c9_i32_91 = arith.constant 9 : i32
    %142 = tpu.dynamic_rotate %105 by %c9_i32_91 dim 1 : vector<4x128xf32>, i32 -> vector<4x128xf32>
    %c127_i32_92 = arith.constant 127 : i32
    %143 = tpu.dynamic_rotate %111 by %c127_i32_92 dim 1 : vector<4x128xf32>, i32 -> vector<4x128xf32>
    %c127_i32_93 = arith.constant 127 : i32
    %144 = tpu.dynamic_rotate %112 by %c127_i32_93 dim 1 : vector<4x128xf32>, i32 -> vector<4x128xf32>
    %c2_94 = arith.constant 2 : index
    %c0_95 = arith.constant 0 : index
    %c0_96 = arith.constant 0 : index
    %145 = vector.load %arg6[%c2_94, %c0_95, %c0_96] : memref<9x4x4xf32, #tpu.memory_space<vmem>>, vector<1x4x4xf32>
    %146 = vector.shape_cast %145 : vector<1x4x4xf32> to vector<4x4xf32>
    %147 = tpu.concatenate %123, %137, %93, %139, %125, %141, %107, %143 in 1 : vector<4x128xf32>, vector<4x128xf32>, vector<4x128xf32>, vector<4x128xf32>, vector<4x128xf32>, vector<4x128xf32>, vector<4x128xf32>, vector<4x128xf32> -> vector<4x1024xf32>
    %cst_97 = arith.constant dense<0.000000e+00> : vector<4x1024xf32>
    %148 = tpu.matmul %146, %147, %cst_97 {dimension_numbers = #tpu.dot_dimension_numbers<[1], [0], [0], [1], [0, 0, 1, 1], [], []>} : vector<4x4xf32>, vector<4x1024xf32>, vector<4x1024xf32> -> vector<4x1024xf32>
    %149 = arith.addf %136, %148 : vector<4x1024xf32>
    %c2_98 = arith.constant 2 : index
    %c0_99 = arith.constant 0 : index
    %c0_100 = arith.constant 0 : index
    %150 = vector.load %arg7[%c2_98, %c0_99, %c0_100] : memref<9x4x4xf32, #tpu.memory_space<vmem>>, vector<1x4x4xf32>
    %151 = vector.shape_cast %150 : vector<1x4x4xf32> to vector<4x4xf32>
    %152 = tpu.concatenate %124, %138, %95, %140, %126, %142, %109, %144 in 1 : vector<4x128xf32>, vector<4x128xf32>, vector<4x128xf32>, vector<4x128xf32>, vector<4x128xf32>, vector<4x128xf32>, vector<4x128xf32>, vector<4x128xf32> -> vector<4x1024xf32>
    %cst_101 = arith.constant dense<0.000000e+00> : vector<4x1024xf32>
    %153 = tpu.matmul %151, %152, %cst_101 {dimension_numbers = #tpu.dot_dimension_numbers<[1], [0], [0], [1], [0, 0, 1, 1], [], []>} : vector<4x4xf32>, vector<4x1024xf32>, vector<4x1024xf32> -> vector<4x1024xf32>
    %154 = arith.addf %149, %153 : vector<4x1024xf32>
    %c1_i32_102 = arith.constant 1 : i32
    %155 = tpu.dynamic_rotate %85 by %c1_i32_102 dim 1 : vector<4x128xf32>, i32 -> vector<4x128xf32>
    %c1_i32_103 = arith.constant 1 : i32
    %156 = tpu.dynamic_rotate %87 by %c1_i32_103 dim 1 : vector<4x128xf32>, i32 -> vector<4x128xf32>
    %c1_i32_104 = arith.constant 1 : i32
    %157 = tpu.dynamic_rotate %99 by %c1_i32_104 dim 1 : vector<4x128xf32>, i32 -> vector<4x128xf32>
    %c1_i32_105 = arith.constant 1 : i32
    %158 = tpu.dynamic_rotate %101 by %c1_i32_105 dim 1 : vector<4x128xf32>, i32 -> vector<4x128xf32>
    %c3_106 = arith.constant 3 : index
    %c0_107 = arith.constant 0 : index
    %c0_108 = arith.constant 0 : index
    %159 = vector.load %arg6[%c3_106, %c0_107, %c0_108] : memref<9x4x4xf32, #tpu.memory_space<vmem>>, vector<1x4x4xf32>
    %160 = vector.shape_cast %159 : vector<1x4x4xf32> to vector<4x4xf32>
    %161 = tpu.concatenate %94, %97, %155, %89, %108, %111, %157, %103 in 1 : vector<4x128xf32>, vector<4x128xf32>, vector<4x128xf32>, vector<4x128xf32>, vector<4x128xf32>, vector<4x128xf32>, vector<4x128xf32>, vector<4x128xf32> -> vector<4x1024xf32>
    %cst_109 = arith.constant dense<0.000000e+00> : vector<4x1024xf32>
    %162 = tpu.matmul %160, %161, %cst_109 {dimension_numbers = #tpu.dot_dimension_numbers<[1], [0], [0], [1], [0, 0, 1, 1], [], []>} : vector<4x4xf32>, vector<4x1024xf32>, vector<4x1024xf32> -> vector<4x1024xf32>
    %163 = arith.addf %154, %162 : vector<4x1024xf32>
    %c3_110 = arith.constant 3 : index
    %c0_111 = arith.constant 0 : index
    %c0_112 = arith.constant 0 : index
    %164 = vector.load %arg7[%c3_110, %c0_111, %c0_112] : memref<9x4x4xf32, #tpu.memory_space<vmem>>, vector<1x4x4xf32>
    %165 = vector.shape_cast %164 : vector<1x4x4xf32> to vector<4x4xf32>
    %166 = tpu.concatenate %96, %98, %156, %91, %110, %112, %158, %105 in 1 : vector<4x128xf32>, vector<4x128xf32>, vector<4x128xf32>, vector<4x128xf32>, vector<4x128xf32>, vector<4x128xf32>, vector<4x128xf32>, vector<4x128xf32> -> vector<4x1024xf32>
    %cst_113 = arith.constant dense<0.000000e+00> : vector<4x1024xf32>
    %167 = tpu.matmul %165, %166, %cst_113 {dimension_numbers = #tpu.dot_dimension_numbers<[1], [0], [0], [1], [0, 0, 1, 1], [], []>} : vector<4x4xf32>, vector<4x1024xf32>, vector<4x1024xf32> -> vector<4x1024xf32>
    %168 = arith.addf %163, %167 : vector<4x1024xf32>
    %c4_114 = arith.constant 4 : index
    %c0_115 = arith.constant 0 : index
    %c0_116 = arith.constant 0 : index
    %169 = vector.load %arg6[%c4_114, %c0_115, %c0_116] : memref<9x4x4xf32, #tpu.memory_space<vmem>>, vector<1x4x4xf32>
    %170 = vector.shape_cast %169 : vector<1x4x4xf32> to vector<4x4xf32>
    %171 = tpu.concatenate %97, %93, %89, %85, %111, %107, %103, %99 in 1 : vector<4x128xf32>, vector<4x128xf32>, vector<4x128xf32>, vector<4x128xf32>, vector<4x128xf32>, vector<4x128xf32>, vector<4x128xf32>, vector<4x128xf32> -> vector<4x1024xf32>
    %cst_117 = arith.constant dense<0.000000e+00> : vector<4x1024xf32>
    %172 = tpu.matmul %170, %171, %cst_117 {dimension_numbers = #tpu.dot_dimension_numbers<[1], [0], [0], [1], [0, 0, 1, 1], [], []>} : vector<4x4xf32>, vector<4x1024xf32>, vector<4x1024xf32> -> vector<4x1024xf32>
    %173 = arith.addf %168, %172 : vector<4x1024xf32>
    %c4_118 = arith.constant 4 : index
    %c0_119 = arith.constant 0 : index
    %c0_120 = arith.constant 0 : index
    %174 = vector.load %arg7[%c4_118, %c0_119, %c0_120] : memref<9x4x4xf32, #tpu.memory_space<vmem>>, vector<1x4x4xf32>
    %175 = vector.shape_cast %174 : vector<1x4x4xf32> to vector<4x4xf32>
    %176 = tpu.concatenate %98, %95, %91, %87, %112, %109, %105, %101 in 1 : vector<4x128xf32>, vector<4x128xf32>, vector<4x128xf32>, vector<4x128xf32>, vector<4x128xf32>, vector<4x128xf32>, vector<4x128xf32>, vector<4x128xf32> -> vector<4x1024xf32>
    %cst_121 = arith.constant dense<0.000000e+00> : vector<4x1024xf32>
    %177 = tpu.matmul %175, %176, %cst_121 {dimension_numbers = #tpu.dot_dimension_numbers<[1], [0], [0], [1], [0, 0, 1, 1], [], []>} : vector<4x4xf32>, vector<4x1024xf32>, vector<4x1024xf32> -> vector<4x1024xf32>
    %178 = arith.addf %173, %177 : vector<4x1024xf32>
    %c127_i32_122 = arith.constant 127 : i32
    %179 = tpu.dynamic_rotate %89 by %c127_i32_122 dim 1 : vector<4x128xf32>, i32 -> vector<4x128xf32>
    %c127_i32_123 = arith.constant 127 : i32
    %180 = tpu.dynamic_rotate %91 by %c127_i32_123 dim 1 : vector<4x128xf32>, i32 -> vector<4x128xf32>
    %c127_i32_124 = arith.constant 127 : i32
    %181 = tpu.dynamic_rotate %103 by %c127_i32_124 dim 1 : vector<4x128xf32>, i32 -> vector<4x128xf32>
    %c127_i32_125 = arith.constant 127 : i32
    %182 = tpu.dynamic_rotate %105 by %c127_i32_125 dim 1 : vector<4x128xf32>, i32 -> vector<4x128xf32>
    %c5_126 = arith.constant 5 : index
    %c0_127 = arith.constant 0 : index
    %c0_128 = arith.constant 0 : index
    %183 = vector.load %arg6[%c5_126, %c0_127, %c0_128] : memref<9x4x4xf32, #tpu.memory_space<vmem>>, vector<1x4x4xf32>
    %184 = vector.shape_cast %183 : vector<1x4x4xf32> to vector<4x4xf32>
    %185 = tpu.concatenate %93, %139, %85, %179, %107, %143, %99, %181 in 1 : vector<4x128xf32>, vector<4x128xf32>, vector<4x128xf32>, vector<4x128xf32>, vector<4x128xf32>, vector<4x128xf32>, vector<4x128xf32>, vector<4x128xf32> -> vector<4x1024xf32>
    %cst_129 = arith.constant dense<0.000000e+00> : vector<4x1024xf32>
    %186 = tpu.matmul %184, %185, %cst_129 {dimension_numbers = #tpu.dot_dimension_numbers<[1], [0], [0], [1], [0, 0, 1, 1], [], []>} : vector<4x4xf32>, vector<4x1024xf32>, vector<4x1024xf32> -> vector<4x1024xf32>
    %187 = arith.addf %178, %186 : vector<4x1024xf32>
    %c5_130 = arith.constant 5 : index
    %c0_131 = arith.constant 0 : index
    %c0_132 = arith.constant 0 : index
    %188 = vector.load %arg7[%c5_130, %c0_131, %c0_132] : memref<9x4x4xf32, #tpu.memory_space<vmem>>, vector<1x4x4xf32>
    %189 = vector.shape_cast %188 : vector<1x4x4xf32> to vector<4x4xf32>
    %190 = tpu.concatenate %95, %140, %87, %180, %109, %144, %101, %182 in 1 : vector<4x128xf32>, vector<4x128xf32>, vector<4x128xf32>, vector<4x128xf32>, vector<4x128xf32>, vector<4x128xf32>, vector<4x128xf32>, vector<4x128xf32> -> vector<4x1024xf32>
    %cst_133 = arith.constant dense<0.000000e+00> : vector<4x1024xf32>
    %191 = tpu.matmul %189, %190, %cst_133 {dimension_numbers = #tpu.dot_dimension_numbers<[1], [0], [0], [1], [0, 0, 1, 1], [], []>} : vector<4x4xf32>, vector<4x1024xf32>, vector<4x1024xf32> -> vector<4x1024xf32>
    %192 = arith.addf %187, %191 : vector<4x1024xf32>
    %c119_i32_134 = arith.constant 119 : i32
    %193 = tpu.dynamic_rotate %93 by %c119_i32_134 dim 1 : vector<4x128xf32>, i32 -> vector<4x128xf32>
    %c119_i32_135 = arith.constant 119 : i32
    %194 = tpu.dynamic_rotate %95 by %c119_i32_135 dim 1 : vector<4x128xf32>, i32 -> vector<4x128xf32>
    %c118_i32_136 = arith.constant 118 : i32
    %195 = tpu.dynamic_rotate %97 by %c118_i32_136 dim 1 : vector<4x128xf32>, i32 -> vector<4x128xf32>
    %c118_i32_137 = arith.constant 118 : i32
    %196 = tpu.dynamic_rotate %98 by %c118_i32_137 dim 1 : vector<4x128xf32>, i32 -> vector<4x128xf32>
    %c119_i32_138 = arith.constant 119 : i32
    %197 = tpu.dynamic_rotate %107 by %c119_i32_138 dim 1 : vector<4x128xf32>, i32 -> vector<4x128xf32>
    %c119_i32_139 = arith.constant 119 : i32
    %198 = tpu.dynamic_rotate %109 by %c119_i32_139 dim 1 : vector<4x128xf32>, i32 -> vector<4x128xf32>
    %c118_i32_140 = arith.constant 118 : i32
    %199 = tpu.dynamic_rotate %111 by %c118_i32_140 dim 1 : vector<4x128xf32>, i32 -> vector<4x128xf32>
    %c118_i32_141 = arith.constant 118 : i32
    %200 = tpu.dynamic_rotate %112 by %c118_i32_141 dim 1 : vector<4x128xf32>, i32 -> vector<4x128xf32>
    %c6_142 = arith.constant 6 : index
    %c0_143 = arith.constant 0 : index
    %c0_144 = arith.constant 0 : index
    %201 = vector.load %arg6[%c6_142, %c0_143, %c0_144] : memref<9x4x4xf32, #tpu.memory_space<vmem>>, vector<1x4x4xf32>
    %202 = vector.shape_cast %201 : vector<1x4x4xf32> to vector<4x4xf32>
    %203 = tpu.concatenate %155, %89, %193, %195, %157, %103, %197, %199 in 1 : vector<4x128xf32>, vector<4x128xf32>, vector<4x128xf32>, vector<4x128xf32>, vector<4x128xf32>, vector<4x128xf32>, vector<4x128xf32>, vector<4x128xf32> -> vector<4x1024xf32>
    %cst_145 = arith.constant dense<0.000000e+00> : vector<4x1024xf32>
    %204 = tpu.matmul %202, %203, %cst_145 {dimension_numbers = #tpu.dot_dimension_numbers<[1], [0], [0], [1], [0, 0, 1, 1], [], []>} : vector<4x4xf32>, vector<4x1024xf32>, vector<4x1024xf32> -> vector<4x1024xf32>
    %205 = arith.addf %192, %204 : vector<4x1024xf32>
    %c6_146 = arith.constant 6 : index
    %c0_147 = arith.constant 0 : index
    %c0_148 = arith.constant 0 : index
    %206 = vector.load %arg7[%c6_146, %c0_147, %c0_148] : memref<9x4x4xf32, #tpu.memory_space<vmem>>, vector<1x4x4xf32>
    %207 = vector.shape_cast %206 : vector<1x4x4xf32> to vector<4x4xf32>
    %208 = tpu.concatenate %156, %91, %194, %196, %158, %105, %198, %200 in 1 : vector<4x128xf32>, vector<4x128xf32>, vector<4x128xf32>, vector<4x128xf32>, vector<4x128xf32>, vector<4x128xf32>, vector<4x128xf32>, vector<4x128xf32> -> vector<4x1024xf32>
    %cst_149 = arith.constant dense<0.000000e+00> : vector<4x1024xf32>
    %209 = tpu.matmul %207, %208, %cst_149 {dimension_numbers = #tpu.dot_dimension_numbers<[1], [0], [0], [1], [0, 0, 1, 1], [], []>} : vector<4x4xf32>, vector<4x1024xf32>, vector<4x1024xf32> -> vector<4x1024xf32>
    %210 = arith.addf %205, %209 : vector<4x1024xf32>
    %c118_i32_150 = arith.constant 118 : i32
    %211 = tpu.dynamic_rotate %93 by %c118_i32_150 dim 1 : vector<4x128xf32>, i32 -> vector<4x128xf32>
    %c118_i32_151 = arith.constant 118 : i32
    %212 = tpu.dynamic_rotate %95 by %c118_i32_151 dim 1 : vector<4x128xf32>, i32 -> vector<4x128xf32>
    %c118_i32_152 = arith.constant 118 : i32
    %213 = tpu.dynamic_rotate %107 by %c118_i32_152 dim 1 : vector<4x128xf32>, i32 -> vector<4x128xf32>
    %c118_i32_153 = arith.constant 118 : i32
    %214 = tpu.dynamic_rotate %109 by %c118_i32_153 dim 1 : vector<4x128xf32>, i32 -> vector<4x128xf32>
    %c7_154 = arith.constant 7 : index
    %c0_155 = arith.constant 0 : index
    %c0_156 = arith.constant 0 : index
    %215 = vector.load %arg6[%c7_154, %c0_155, %c0_156] : memref<9x4x4xf32, #tpu.memory_space<vmem>>, vector<1x4x4xf32>
    %216 = vector.shape_cast %215 : vector<1x4x4xf32> to vector<4x4xf32>
    %217 = tpu.concatenate %89, %85, %195, %211, %103, %99, %199, %213 in 1 : vector<4x128xf32>, vector<4x128xf32>, vector<4x128xf32>, vector<4x128xf32>, vector<4x128xf32>, vector<4x128xf32>, vector<4x128xf32>, vector<4x128xf32> -> vector<4x1024xf32>
    %cst_157 = arith.constant dense<0.000000e+00> : vector<4x1024xf32>
    %218 = tpu.matmul %216, %217, %cst_157 {dimension_numbers = #tpu.dot_dimension_numbers<[1], [0], [0], [1], [0, 0, 1, 1], [], []>} : vector<4x4xf32>, vector<4x1024xf32>, vector<4x1024xf32> -> vector<4x1024xf32>
    %219 = arith.addf %210, %218 : vector<4x1024xf32>
    %c7_158 = arith.constant 7 : index
    %c0_159 = arith.constant 0 : index
    %c0_160 = arith.constant 0 : index
    %220 = vector.load %arg7[%c7_158, %c0_159, %c0_160] : memref<9x4x4xf32, #tpu.memory_space<vmem>>, vector<1x4x4xf32>
    %221 = vector.shape_cast %220 : vector<1x4x4xf32> to vector<4x4xf32>
    %222 = tpu.concatenate %91, %87, %196, %212, %105, %101, %200, %214 in 1 : vector<4x128xf32>, vector<4x128xf32>, vector<4x128xf32>, vector<4x128xf32>, vector<4x128xf32>, vector<4x128xf32>, vector<4x128xf32>, vector<4x128xf32> -> vector<4x1024xf32>
    %cst_161 = arith.constant dense<0.000000e+00> : vector<4x1024xf32>
    %223 = tpu.matmul %221, %222, %cst_161 {dimension_numbers = #tpu.dot_dimension_numbers<[1], [0], [0], [1], [0, 0, 1, 1], [], []>} : vector<4x4xf32>, vector<4x1024xf32>, vector<4x1024xf32> -> vector<4x1024xf32>
    %224 = arith.addf %219, %223 : vector<4x1024xf32>
    %c117_i32_162 = arith.constant 117 : i32
    %225 = tpu.dynamic_rotate %97 by %c117_i32_162 dim 1 : vector<4x128xf32>, i32 -> vector<4x128xf32>
    %c117_i32_163 = arith.constant 117 : i32
    %226 = tpu.dynamic_rotate %98 by %c117_i32_163 dim 1 : vector<4x128xf32>, i32 -> vector<4x128xf32>
    %c117_i32_164 = arith.constant 117 : i32
    %227 = tpu.dynamic_rotate %111 by %c117_i32_164 dim 1 : vector<4x128xf32>, i32 -> vector<4x128xf32>
    %c117_i32_165 = arith.constant 117 : i32
    %228 = tpu.dynamic_rotate %112 by %c117_i32_165 dim 1 : vector<4x128xf32>, i32 -> vector<4x128xf32>
    %c8_166 = arith.constant 8 : index
    %c0_167 = arith.constant 0 : index
    %c0_168 = arith.constant 0 : index
    %229 = vector.load %arg6[%c8_166, %c0_167, %c0_168] : memref<9x4x4xf32, #tpu.memory_space<vmem>>, vector<1x4x4xf32>
    %230 = vector.shape_cast %229 : vector<1x4x4xf32> to vector<4x4xf32>
    %231 = tpu.concatenate %85, %179, %211, %225, %99, %181, %213, %227 in 1 : vector<4x128xf32>, vector<4x128xf32>, vector<4x128xf32>, vector<4x128xf32>, vector<4x128xf32>, vector<4x128xf32>, vector<4x128xf32>, vector<4x128xf32> -> vector<4x1024xf32>
    %cst_169 = arith.constant dense<0.000000e+00> : vector<4x1024xf32>
    %232 = tpu.matmul %230, %231, %cst_169 {dimension_numbers = #tpu.dot_dimension_numbers<[1], [0], [0], [1], [0, 0, 1, 1], [], []>} : vector<4x4xf32>, vector<4x1024xf32>, vector<4x1024xf32> -> vector<4x1024xf32>
    %233 = arith.addf %224, %232 : vector<4x1024xf32>
    %c8_170 = arith.constant 8 : index
    %c0_171 = arith.constant 0 : index
    %c0_172 = arith.constant 0 : index
    %234 = vector.load %arg7[%c8_170, %c0_171, %c0_172] : memref<9x4x4xf32, #tpu.memory_space<vmem>>, vector<1x4x4xf32>
    %235 = vector.shape_cast %234 : vector<1x4x4xf32> to vector<4x4xf32>
    %236 = tpu.concatenate %87, %180, %212, %226, %101, %182, %214, %228 in 1 : vector<4x128xf32>, vector<4x128xf32>, vector<4x128xf32>, vector<4x128xf32>, vector<4x128xf32>, vector<4x128xf32>, vector<4x128xf32>, vector<4x128xf32> -> vector<4x1024xf32>
    %cst_173 = arith.constant dense<0.000000e+00> : vector<4x1024xf32>
    %237 = tpu.matmul %235, %236, %cst_173 {dimension_numbers = #tpu.dot_dimension_numbers<[1], [0], [0], [1], [0, 0, 1, 1], [], []>} : vector<4x4xf32>, vector<4x1024xf32>, vector<4x1024xf32> -> vector<4x1024xf32>
    %238 = arith.addf %233, %237 : vector<4x1024xf32>
    %cst_174 = arith.constant 0.000000e+00 : f32
    %239 = vector.broadcast %cst_174 : f32 to vector<4x1xf32>
    %cst_175 = arith.constant 0.000000e+00 : f32
    %240 = vector.broadcast %cst_175 : f32 to vector<4x1xf32>
    %241 = vector.extract_strided_slice %238 {offsets = [0, 0], sizes = [4, 512], strides = [1, 1]} : vector<4x1024xf32> to vector<4x512xf32>
    %c0_176 = arith.constant 0 : index
    %c0_177 = arith.constant 0 : index
    %242 = vector.load %arg8[%c0_176, %c0_177] : memref<4x1xf32, #tpu.memory_space<vmem>>, vector<4x1xf32>
    %243 = vector.broadcast %242 : vector<4x1xf32> to vector<4x512xf32>
    %244 = arith.addf %241, %243 : vector<4x512xf32>
    %245 = vector.broadcast %0 : vector<1x512xf32> to vector<4x512xf32>
    %246 = arith.mulf %244, %245 : vector<4x512xf32>
    %c0_178 = arith.constant 0 : index
    %c0_179 = arith.constant 0 : index
    %c0_180 = arith.constant 0 : index
    %247 = vector.load %arg9[%c0_178, %c0_179, %c0_180] : memref<2x4x512xf32, #tpu.memory_space<vmem>>, vector<1x4x512xf32>
    %248 = vector.shape_cast %247 : vector<1x4x512xf32> to vector<4x512xf32>
    %249 = vector.shape_cast %246 : vector<4x512xf32> to vector<1x4x512xf32>
    tpu.vector_store %arg9[%c0_178, %c0_179, %c0_180], %249 {strides = array<i32>} : memref<2x4x512xf32, #tpu.memory_space<vmem>>, vector<1x4x512xf32>,
    %cst_181 = arith.constant dense<0.000000e+00> : vector<4xf32>
    %250 = vector.multi_reduction <add>, %246, %cst_181 [1] : vector<4x512xf32> to vector<4xf32>
    %251 = vector.shape_cast %250 : vector<4xf32> to vector<4x1xf32>
    %252 = arith.addf %239, %251 : vector<4x1xf32>
    %253 = arith.mulf %246, %246 : vector<4x512xf32>
    %cst_182 = arith.constant dense<0.000000e+00> : vector<4xf32>
    %254 = vector.multi_reduction <add>, %253, %cst_182 [1] : vector<4x512xf32> to vector<4xf32>
    %255 = vector.shape_cast %254 : vector<4xf32> to vector<4x1xf32>
    %256 = arith.addf %240, %255 : vector<4x1xf32>
    %257 = vector.extract_strided_slice %238 {offsets = [0, 512], sizes = [4, 512], strides = [1, 1]} : vector<4x1024xf32> to vector<4x512xf32>
    %c0_183 = arith.constant 0 : index
    %c0_184 = arith.constant 0 : index
    %258 = vector.load %arg8[%c0_183, %c0_184] : memref<4x1xf32, #tpu.memory_space<vmem>>, vector<4x1xf32>
    %259 = vector.broadcast %258 : vector<4x1xf32> to vector<4x512xf32>
    %260 = arith.addf %257, %259 : vector<4x512xf32>
    %261 = vector.broadcast %0 : vector<1x512xf32> to vector<4x512xf32>
    %262 = arith.mulf %260, %261 : vector<4x512xf32>
    %c1_185 = arith.constant 1 : index
    %c0_186 = arith.constant 0 : index
    %c0_187 = arith.constant 0 : index
    %263 = vector.load %arg9[%c1_185, %c0_186, %c0_187] : memref<2x4x512xf32, #tpu.memory_space<vmem>>, vector<1x4x512xf32>
    %264 = vector.shape_cast %263 : vector<1x4x512xf32> to vector<4x512xf32>
    %265 = vector.shape_cast %262 : vector<4x512xf32> to vector<1x4x512xf32>
    tpu.vector_store %arg9[%c1_185, %c0_186, %c0_187], %265 {strides = array<i32>} : memref<2x4x512xf32, #tpu.memory_space<vmem>>, vector<1x4x512xf32>,
    %cst_188 = arith.constant dense<0.000000e+00> : vector<4xf32>
    %266 = vector.multi_reduction <add>, %262, %cst_188 [1] : vector<4x512xf32> to vector<4xf32>
    %267 = vector.shape_cast %266 : vector<4xf32> to vector<4x1xf32>
    %268 = arith.addf %252, %267 : vector<4x1xf32>
    %269 = arith.mulf %262, %262 : vector<4x512xf32>
    %cst_189 = arith.constant dense<0.000000e+00> : vector<4xf32>
    %270 = vector.multi_reduction <add>, %269, %cst_189 [1] : vector<4x512xf32> to vector<4xf32>
    %271 = vector.shape_cast %270 : vector<4xf32> to vector<4x1xf32>
    %272 = arith.addf %256, %271 : vector<4x1xf32>
    %273 = tpu.concatenate %268, %272 in 1 : vector<4x1xf32>, vector<4x1xf32> -> vector<4x2xf32>
    %c0_190 = arith.constant 0 : index
    %c0_191 = arith.constant 0 : index
    %c0_192 = arith.constant 0 : index
    %274 = vector.load %arg10[%c0_190, %c0_191, %c0_192] : memref<1x4x2xf32, #tpu.memory_space<vmem>>, vector<1x4x2xf32>
    %275 = vector.shape_cast %274 : vector<1x4x2xf32> to vector<4x2xf32>
    %276 = vector.shape_cast %273 : vector<4x2xf32> to vector<1x4x2xf32>
    tpu.vector_store %arg10[%c0_190, %c0_191, %c0_192], %276 {strides = array<i32>} : memref<1x4x2xf32, #tpu.memory_space<vmem>>, vector<1x4x2xf32>,
    return
  }
  func.func @transform_0(%arg0: i32) -> (i32, i32, i32) {
    %c0_i32 = arith.constant 0 : i32
    %c0_i32_0 = arith.constant 0 : i32
    %c0_i32_1 = arith.constant 0 : i32
    return %arg0, %c0_i32, %c0_i32_0 : i32, i32, i32
  }
  func.func @transform_1(%arg0: i32) -> (i32, i32, i32) {
    %c0_i32 = arith.constant 0 : i32
    %c0_i32_0 = arith.constant 0 : i32
    %c0_i32_1 = arith.constant 0 : i32
    return %arg0, %c0_i32, %c0_i32_0 : i32, i32, i32
  }
  func.func @transform_2(%arg0: i32) -> (i32, i32) {
    %c0_i32 = arith.constant 0 : i32
    %c0_i32_0 = arith.constant 0 : i32
    %c0_i32_1 = arith.constant 0 : i32
    return %c0_i32, %c0_i32_0 : i32, i32
  }
  func.func @transform_3(%arg0: i32) -> (i32, i32, i32) {
    %c0_i32 = arith.constant 0 : i32
    %c0_i32_0 = arith.constant 0 : i32
    %c0_i32_1 = arith.constant 0 : i32
    %c0_i32_2 = arith.constant 0 : i32
    return %c0_i32, %c0_i32_0, %c0_i32_1 : i32, i32, i32
  }
  func.func @transform_4(%arg0: i32) -> (i32, i32) {
    %c0_i32 = arith.constant 0 : i32
    %c0_i32_0 = arith.constant 0 : i32
    %c0_i32_1 = arith.constant 0 : i32
    return %c0_i32, %c0_i32_0 : i32, i32
  }
  func.func @transform_5(%arg0: i32) -> (i32, i32, i32) {
    %c0_i32 = arith.constant 0 : i32
    %c0_i32_0 = arith.constant 0 : i32
    %c0_i32_1 = arith.constant 0 : i32
    %c0_i32_2 = arith.constant 0 : i32
    return %c0_i32, %c0_i32_0, %c0_i32_1 : i32, i32, i32
  }
  func.func @transform_6(%arg0: i32) -> (i32, i32, i32) {
    %c0_i32 = arith.constant 0 : i32
    %c0_i32_0 = arith.constant 0 : i32
    %c0_i32_1 = arith.constant 0 : i32
    %c0_i32_2 = arith.constant 0 : i32
    return %c0_i32, %c0_i32_0, %c0_i32_1 : i32, i32, i32
  }
  func.func @transform_7(%arg0: i32) -> (i32, i32) {
    %c0_i32 = arith.constant 0 : i32
    %c0_i32_0 = arith.constant 0 : i32
    %c0_i32_1 = arith.constant 0 : i32
    return %c0_i32, %c0_i32_0 : i32, i32
  }
  func.func @transform_8(%arg0: i32) -> (i32, i32, i32) {
    %c0_i32 = arith.constant 0 : i32
    %c0_i32_0 = arith.constant 0 : i32
    %c0_i32_1 = arith.constant 0 : i32
    return %arg0, %c0_i32, %c0_i32_0 : i32, i32, i32
  }
  func.func @transform_9(%arg0: i32) -> (i32, i32, i32) {
    %c0_i32 = arith.constant 0 : i32
    %c0_i32_0 = arith.constant 0 : i32
    %c0_i32_1 = arith.constant 0 : i32
    return %arg0, %c0_i32, %c0_i32_0 : i32, i32, i32
  }
}

module attributes {stable_mosaic.version = 11 : i64} {
  func.func @_bnrelu_conv2_kernel(%arg0: i32, %arg1: memref<2x4x512xf32, #tpu.memory_space<vmem>>, %arg2: memref<4x1xf32, #tpu.memory_space<vmem>>, %arg3: memref<4x1xf32, #tpu.memory_space<vmem>>, %arg4: memref<1x512xf32, #tpu.memory_space<vmem>>, %arg5: memref<9x4x4xf32, #tpu.memory_space<vmem>>, %arg6: memref<4x1xf32, #tpu.memory_space<vmem>>, %arg7: memref<2x4x512xf32, #tpu.memory_space<vmem>>, %arg8: memref<1x4x2xf32, #tpu.memory_space<vmem>>) attributes {dimension_semantics = [#tpu.dimension_semantics<parallel>], iteration_bounds = array<i64: 1>, scalar_prefetch = 0 : i64, scratch_operands = 0 : i64, tpu.core_type = #tpu.core_type<tc>, window_params = [{transform_indices = @transform_0, window_bounds = array<i64: 2, 4, 512>}, {pipeline_mode = #tpu.pipeline_mode<synchronous>, transform_indices = @transform_1, window_bounds = array<i64: 4, 1>}, {pipeline_mode = #tpu.pipeline_mode<synchronous>, transform_indices = @transform_2, window_bounds = array<i64: 4, 1>}, {pipeline_mode = #tpu.pipeline_mode<synchronous>, transform_indices = @transform_3, window_bounds = array<i64: 1, 512>}, {pipeline_mode = #tpu.pipeline_mode<synchronous>, transform_indices = @transform_4, window_bounds = array<i64: 9, 4, 4>}, {pipeline_mode = #tpu.pipeline_mode<synchronous>, transform_indices = @transform_5, window_bounds = array<i64: 4, 1>}, {transform_indices = @transform_6, window_bounds = array<i64: 2, 4, 512>}, {transform_indices = @transform_7, window_bounds = array<i64: 1, 4, 2>}]} {
    %c0 = arith.constant 0 : index
    %c0_0 = arith.constant 0 : index
    %0 = vector.load %arg4[%c0, %c0_0] : memref<1x512xf32, #tpu.memory_space<vmem>>, vector<1x512xf32>
    %c0_1 = arith.constant 0 : index
    %c0_2 = arith.constant 0 : index
    %c0_3 = arith.constant 0 : index
    %1 = vector.load %arg1[%c0_1, %c0_2, %c0_3] : memref<2x4x512xf32, #tpu.memory_space<vmem>>, vector<1x4x512xf32>
    %2 = vector.shape_cast %1 : vector<1x4x512xf32> to vector<4x512xf32>
    %c0_4 = arith.constant 0 : index
    %c0_5 = arith.constant 0 : index
    %3 = vector.load %arg2[%c0_4, %c0_5] : memref<4x1xf32, #tpu.memory_space<vmem>>, vector<4x1xf32>
    %4 = vector.broadcast %3 : vector<4x1xf32> to vector<4x512xf32>
    %5 = arith.mulf %2, %4 : vector<4x512xf32>
    %c0_6 = arith.constant 0 : index
    %c0_7 = arith.constant 0 : index
    %6 = vector.load %arg3[%c0_6, %c0_7] : memref<4x1xf32, #tpu.memory_space<vmem>>, vector<4x1xf32>
    %7 = vector.broadcast %6 : vector<4x1xf32> to vector<4x512xf32>
    %8 = arith.addf %5, %7 : vector<4x512xf32>
    %cst = arith.constant 0.000000e+00 : f32
    %9 = vector.broadcast %cst : f32 to vector<4x512xf32>
    %10 = arith.maximumf %8, %9 : vector<4x512xf32>
    %11 = vector.broadcast %0 : vector<1x512xf32> to vector<4x512xf32>
    %12 = arith.mulf %10, %11 : vector<4x512xf32>
    %c1 = arith.constant 1 : index
    %c0_8 = arith.constant 0 : index
    %c0_9 = arith.constant 0 : index
    %13 = vector.load %arg1[%c1, %c0_8, %c0_9] : memref<2x4x512xf32, #tpu.memory_space<vmem>>, vector<1x4x512xf32>
    %14 = vector.shape_cast %13 : vector<1x4x512xf32> to vector<4x512xf32>
    %c0_10 = arith.constant 0 : index
    %c0_11 = arith.constant 0 : index
    %15 = vector.load %arg2[%c0_10, %c0_11] : memref<4x1xf32, #tpu.memory_space<vmem>>, vector<4x1xf32>
    %16 = vector.broadcast %15 : vector<4x1xf32> to vector<4x512xf32>
    %17 = arith.mulf %14, %16 : vector<4x512xf32>
    %c0_12 = arith.constant 0 : index
    %c0_13 = arith.constant 0 : index
    %18 = vector.load %arg3[%c0_12, %c0_13] : memref<4x1xf32, #tpu.memory_space<vmem>>, vector<4x1xf32>
    %19 = vector.broadcast %18 : vector<4x1xf32> to vector<4x512xf32>
    %20 = arith.addf %17, %19 : vector<4x512xf32>
    %cst_14 = arith.constant 0.000000e+00 : f32
    %21 = vector.broadcast %cst_14 : f32 to vector<4x512xf32>
    %22 = arith.maximumf %20, %21 : vector<4x512xf32>
    %23 = vector.broadcast %0 : vector<1x512xf32> to vector<4x512xf32>
    %24 = arith.mulf %22, %23 : vector<4x512xf32>
    %cst_15 = arith.constant 0.000000e+00 : f32
    %25 = vector.broadcast %cst_15 : f32 to vector<4x1024xf32>
    %26 = vector.extract_strided_slice %12 {offsets = [0, 384], sizes = [4, 128], strides = [1, 1]} : vector<4x512xf32> to vector<4x128xf32>
    %c11_i32 = arith.constant 11 : i32
    %27 = tpu.dynamic_rotate %26 by %c11_i32 dim 1 : vector<4x128xf32>, i32 -> vector<4x128xf32>
    %28 = vector.extract_strided_slice %12 {offsets = [0, 256], sizes = [4, 128], strides = [1, 1]} : vector<4x512xf32> to vector<4x128xf32>
    %c10_i32 = arith.constant 10 : i32
    %29 = tpu.dynamic_rotate %28 by %c10_i32 dim 1 : vector<4x128xf32>, i32 -> vector<4x128xf32>
    %30 = vector.extract_strided_slice %12 {offsets = [0, 128], sizes = [4, 128], strides = [1, 1]} : vector<4x512xf32> to vector<4x128xf32>
    %c1_i32 = arith.constant 1 : i32
    %31 = tpu.dynamic_rotate %30 by %c1_i32 dim 1 : vector<4x128xf32>, i32 -> vector<4x128xf32>
    %32 = vector.extract_strided_slice %12 {offsets = [0, 0], sizes = [4, 128], strides = [1, 1]} : vector<4x512xf32> to vector<4x128xf32>
    %33 = vector.extract_strided_slice %24 {offsets = [0, 384], sizes = [4, 128], strides = [1, 1]} : vector<4x512xf32> to vector<4x128xf32>
    %c11_i32_16 = arith.constant 11 : i32
    %34 = tpu.dynamic_rotate %33 by %c11_i32_16 dim 1 : vector<4x128xf32>, i32 -> vector<4x128xf32>
    %35 = vector.extract_strided_slice %24 {offsets = [0, 256], sizes = [4, 128], strides = [1, 1]} : vector<4x512xf32> to vector<4x128xf32>
    %c10_i32_17 = arith.constant 10 : i32
    %36 = tpu.dynamic_rotate %35 by %c10_i32_17 dim 1 : vector<4x128xf32>, i32 -> vector<4x128xf32>
    %37 = vector.extract_strided_slice %24 {offsets = [0, 128], sizes = [4, 128], strides = [1, 1]} : vector<4x512xf32> to vector<4x128xf32>
    %c1_i32_18 = arith.constant 1 : i32
    %38 = tpu.dynamic_rotate %37 by %c1_i32_18 dim 1 : vector<4x128xf32>, i32 -> vector<4x128xf32>
    %39 = vector.extract_strided_slice %24 {offsets = [0, 0], sizes = [4, 128], strides = [1, 1]} : vector<4x512xf32> to vector<4x128xf32>
    %c0_19 = arith.constant 0 : index
    %c0_20 = arith.constant 0 : index
    %c0_21 = arith.constant 0 : index
    %40 = vector.load %arg5[%c0_19, %c0_20, %c0_21] : memref<9x4x4xf32, #tpu.memory_space<vmem>>, vector<1x4x4xf32>
    %41 = vector.shape_cast %40 : vector<1x4x4xf32> to vector<4x4xf32>
    %42 = tpu.concatenate %27, %29, %31, %32, %34, %36, %38, %39 in 1 : vector<4x128xf32>, vector<4x128xf32>, vector<4x128xf32>, vector<4x128xf32>, vector<4x128xf32>, vector<4x128xf32>, vector<4x128xf32>, vector<4x128xf32> -> vector<4x1024xf32>
    %cst_22 = arith.constant dense<0.000000e+00> : vector<4x1024xf32>
    %43 = tpu.matmul %41, %42, %cst_22 {dimension_numbers = #tpu.dot_dimension_numbers<[1], [0], [0], [1], [0, 0, 1, 1], [], []>} : vector<4x4xf32>, vector<4x1024xf32>, vector<4x1024xf32> -> vector<4x1024xf32>
    %44 = arith.addf %25, %43 : vector<4x1024xf32>
    %c10_i32_23 = arith.constant 10 : i32
    %45 = tpu.dynamic_rotate %26 by %c10_i32_23 dim 1 : vector<4x128xf32>, i32 -> vector<4x128xf32>
    %c10_i32_24 = arith.constant 10 : i32
    %46 = tpu.dynamic_rotate %33 by %c10_i32_24 dim 1 : vector<4x128xf32>, i32 -> vector<4x128xf32>
    %c1_25 = arith.constant 1 : index
    %c0_26 = arith.constant 0 : index
    %c0_27 = arith.constant 0 : index
    %47 = vector.load %arg5[%c1_25, %c0_26, %c0_27] : memref<9x4x4xf32, #tpu.memory_space<vmem>>, vector<1x4x4xf32>
    %48 = vector.shape_cast %47 : vector<1x4x4xf32> to vector<4x4xf32>
    %49 = tpu.concatenate %29, %45, %32, %30, %36, %46, %39, %37 in 1 : vector<4x128xf32>, vector<4x128xf32>, vector<4x128xf32>, vector<4x128xf32>, vector<4x128xf32>, vector<4x128xf32>, vector<4x128xf32>, vector<4x128xf32> -> vector<4x1024xf32>
    %cst_28 = arith.constant dense<0.000000e+00> : vector<4x1024xf32>
    %50 = tpu.matmul %48, %49, %cst_28 {dimension_numbers = #tpu.dot_dimension_numbers<[1], [0], [0], [1], [0, 0, 1, 1], [], []>} : vector<4x4xf32>, vector<4x1024xf32>, vector<4x1024xf32> -> vector<4x1024xf32>
    %51 = arith.addf %44, %50 : vector<4x1024xf32>
    %c9_i32 = arith.constant 9 : i32
    %52 = tpu.dynamic_rotate %28 by %c9_i32 dim 1 : vector<4x128xf32>, i32 -> vector<4x128xf32>
    %c127_i32 = arith.constant 127 : i32
    %53 = tpu.dynamic_rotate %32 by %c127_i32 dim 1 : vector<4x128xf32>, i32 -> vector<4x128xf32>
    %c9_i32_29 = arith.constant 9 : i32
    %54 = tpu.dynamic_rotate %35 by %c9_i32_29 dim 1 : vector<4x128xf32>, i32 -> vector<4x128xf32>
    %c127_i32_30 = arith.constant 127 : i32
    %55 = tpu.dynamic_rotate %39 by %c127_i32_30 dim 1 : vector<4x128xf32>, i32 -> vector<4x128xf32>
    %c2 = arith.constant 2 : index
    %c0_31 = arith.constant 0 : index
    %c0_32 = arith.constant 0 : index
    %56 = vector.load %arg5[%c2, %c0_31, %c0_32] : memref<9x4x4xf32, #tpu.memory_space<vmem>>, vector<1x4x4xf32>
    %57 = vector.shape_cast %56 : vector<1x4x4xf32> to vector<4x4xf32>
    %58 = tpu.concatenate %45, %52, %30, %53, %46, %54, %37, %55 in 1 : vector<4x128xf32>, vector<4x128xf32>, vector<4x128xf32>, vector<4x128xf32>, vector<4x128xf32>, vector<4x128xf32>, vector<4x128xf32>, vector<4x128xf32> -> vector<4x1024xf32>
    %cst_33 = arith.constant dense<0.000000e+00> : vector<4x1024xf32>
    %59 = tpu.matmul %57, %58, %cst_33 {dimension_numbers = #tpu.dot_dimension_numbers<[1], [0], [0], [1], [0, 0, 1, 1], [], []>} : vector<4x4xf32>, vector<4x1024xf32>, vector<4x1024xf32> -> vector<4x1024xf32>
    %60 = arith.addf %51, %59 : vector<4x1024xf32>
    %c1_i32_34 = arith.constant 1 : i32
    %61 = tpu.dynamic_rotate %26 by %c1_i32_34 dim 1 : vector<4x128xf32>, i32 -> vector<4x128xf32>
    %c1_i32_35 = arith.constant 1 : i32
    %62 = tpu.dynamic_rotate %33 by %c1_i32_35 dim 1 : vector<4x128xf32>, i32 -> vector<4x128xf32>
    %c3 = arith.constant 3 : index
    %c0_36 = arith.constant 0 : index
    %c0_37 = arith.constant 0 : index
    %63 = vector.load %arg5[%c3, %c0_36, %c0_37] : memref<9x4x4xf32, #tpu.memory_space<vmem>>, vector<1x4x4xf32>
    %64 = vector.shape_cast %63 : vector<1x4x4xf32> to vector<4x4xf32>
    %65 = tpu.concatenate %31, %32, %61, %28, %38, %39, %62, %35 in 1 : vector<4x128xf32>, vector<4x128xf32>, vector<4x128xf32>, vector<4x128xf32>, vector<4x128xf32>, vector<4x128xf32>, vector<4x128xf32>, vector<4x128xf32> -> vector<4x1024xf32>
    %cst_38 = arith.constant dense<0.000000e+00> : vector<4x1024xf32>
    %66 = tpu.matmul %64, %65, %cst_38 {dimension_numbers = #tpu.dot_dimension_numbers<[1], [0], [0], [1], [0, 0, 1, 1], [], []>} : vector<4x4xf32>, vector<4x1024xf32>, vector<4x1024xf32> -> vector<4x1024xf32>
    %67 = arith.addf %60, %66 : vector<4x1024xf32>
    %c4 = arith.constant 4 : index
    %c0_39 = arith.constant 0 : index
    %c0_40 = arith.constant 0 : index
    %68 = vector.load %arg5[%c4, %c0_39, %c0_40] : memref<9x4x4xf32, #tpu.memory_space<vmem>>, vector<1x4x4xf32>
    %69 = vector.shape_cast %68 : vector<1x4x4xf32> to vector<4x4xf32>
    %70 = tpu.concatenate %32, %30, %28, %26, %39, %37, %35, %33 in 1 : vector<4x128xf32>, vector<4x128xf32>, vector<4x128xf32>, vector<4x128xf32>, vector<4x128xf32>, vector<4x128xf32>, vector<4x128xf32>, vector<4x128xf32> -> vector<4x1024xf32>
    %cst_41 = arith.constant dense<0.000000e+00> : vector<4x1024xf32>
    %71 = tpu.matmul %69, %70, %cst_41 {dimension_numbers = #tpu.dot_dimension_numbers<[1], [0], [0], [1], [0, 0, 1, 1], [], []>} : vector<4x4xf32>, vector<4x1024xf32>, vector<4x1024xf32> -> vector<4x1024xf32>
    %72 = arith.addf %67, %71 : vector<4x1024xf32>
    %c127_i32_42 = arith.constant 127 : i32
    %73 = tpu.dynamic_rotate %28 by %c127_i32_42 dim 1 : vector<4x128xf32>, i32 -> vector<4x128xf32>
    %c127_i32_43 = arith.constant 127 : i32
    %74 = tpu.dynamic_rotate %35 by %c127_i32_43 dim 1 : vector<4x128xf32>, i32 -> vector<4x128xf32>
    %c5 = arith.constant 5 : index
    %c0_44 = arith.constant 0 : index
    %c0_45 = arith.constant 0 : index
    %75 = vector.load %arg5[%c5, %c0_44, %c0_45] : memref<9x4x4xf32, #tpu.memory_space<vmem>>, vector<1x4x4xf32>
    %76 = vector.shape_cast %75 : vector<1x4x4xf32> to vector<4x4xf32>
    %77 = tpu.concatenate %30, %53, %26, %73, %37, %55, %33, %74 in 1 : vector<4x128xf32>, vector<4x128xf32>, vector<4x128xf32>, vector<4x128xf32>, vector<4x128xf32>, vector<4x128xf32>, vector<4x128xf32>, vector<4x128xf32> -> vector<4x1024xf32>
    %cst_46 = arith.constant dense<0.000000e+00> : vector<4x1024xf32>
    %78 = tpu.matmul %76, %77, %cst_46 {dimension_numbers = #tpu.dot_dimension_numbers<[1], [0], [0], [1], [0, 0, 1, 1], [], []>} : vector<4x4xf32>, vector<4x1024xf32>, vector<4x1024xf32> -> vector<4x1024xf32>
    %79 = arith.addf %72, %78 : vector<4x1024xf32>
    %c119_i32 = arith.constant 119 : i32
    %80 = tpu.dynamic_rotate %30 by %c119_i32 dim 1 : vector<4x128xf32>, i32 -> vector<4x128xf32>
    %c118_i32 = arith.constant 118 : i32
    %81 = tpu.dynamic_rotate %32 by %c118_i32 dim 1 : vector<4x128xf32>, i32 -> vector<4x128xf32>
    %c119_i32_47 = arith.constant 119 : i32
    %82 = tpu.dynamic_rotate %37 by %c119_i32_47 dim 1 : vector<4x128xf32>, i32 -> vector<4x128xf32>
    %c118_i32_48 = arith.constant 118 : i32
    %83 = tpu.dynamic_rotate %39 by %c118_i32_48 dim 1 : vector<4x128xf32>, i32 -> vector<4x128xf32>
    %c6 = arith.constant 6 : index
    %c0_49 = arith.constant 0 : index
    %c0_50 = arith.constant 0 : index
    %84 = vector.load %arg5[%c6, %c0_49, %c0_50] : memref<9x4x4xf32, #tpu.memory_space<vmem>>, vector<1x4x4xf32>
    %85 = vector.shape_cast %84 : vector<1x4x4xf32> to vector<4x4xf32>
    %86 = tpu.concatenate %61, %28, %80, %81, %62, %35, %82, %83 in 1 : vector<4x128xf32>, vector<4x128xf32>, vector<4x128xf32>, vector<4x128xf32>, vector<4x128xf32>, vector<4x128xf32>, vector<4x128xf32>, vector<4x128xf32> -> vector<4x1024xf32>
    %cst_51 = arith.constant dense<0.000000e+00> : vector<4x1024xf32>
    %87 = tpu.matmul %85, %86, %cst_51 {dimension_numbers = #tpu.dot_dimension_numbers<[1], [0], [0], [1], [0, 0, 1, 1], [], []>} : vector<4x4xf32>, vector<4x1024xf32>, vector<4x1024xf32> -> vector<4x1024xf32>
    %88 = arith.addf %79, %87 : vector<4x1024xf32>
    %c118_i32_52 = arith.constant 118 : i32
    %89 = tpu.dynamic_rotate %30 by %c118_i32_52 dim 1 : vector<4x128xf32>, i32 -> vector<4x128xf32>
    %c118_i32_53 = arith.constant 118 : i32
    %90 = tpu.dynamic_rotate %37 by %c118_i32_53 dim 1 : vector<4x128xf32>, i32 -> vector<4x128xf32>
    %c7 = arith.constant 7 : index
    %c0_54 = arith.constant 0 : index
    %c0_55 = arith.constant 0 : index
    %91 = vector.load %arg5[%c7, %c0_54, %c0_55] : memref<9x4x4xf32, #tpu.memory_space<vmem>>, vector<1x4x4xf32>
    %92 = vector.shape_cast %91 : vector<1x4x4xf32> to vector<4x4xf32>
    %93 = tpu.concatenate %28, %26, %81, %89, %35, %33, %83, %90 in 1 : vector<4x128xf32>, vector<4x128xf32>, vector<4x128xf32>, vector<4x128xf32>, vector<4x128xf32>, vector<4x128xf32>, vector<4x128xf32>, vector<4x128xf32> -> vector<4x1024xf32>
    %cst_56 = arith.constant dense<0.000000e+00> : vector<4x1024xf32>
    %94 = tpu.matmul %92, %93, %cst_56 {dimension_numbers = #tpu.dot_dimension_numbers<[1], [0], [0], [1], [0, 0, 1, 1], [], []>} : vector<4x4xf32>, vector<4x1024xf32>, vector<4x1024xf32> -> vector<4x1024xf32>
    %95 = arith.addf %88, %94 : vector<4x1024xf32>
    %c117_i32 = arith.constant 117 : i32
    %96 = tpu.dynamic_rotate %32 by %c117_i32 dim 1 : vector<4x128xf32>, i32 -> vector<4x128xf32>
    %c117_i32_57 = arith.constant 117 : i32
    %97 = tpu.dynamic_rotate %39 by %c117_i32_57 dim 1 : vector<4x128xf32>, i32 -> vector<4x128xf32>
    %c8 = arith.constant 8 : index
    %c0_58 = arith.constant 0 : index
    %c0_59 = arith.constant 0 : index
    %98 = vector.load %arg5[%c8, %c0_58, %c0_59] : memref<9x4x4xf32, #tpu.memory_space<vmem>>, vector<1x4x4xf32>
    %99 = vector.shape_cast %98 : vector<1x4x4xf32> to vector<4x4xf32>
    %100 = tpu.concatenate %26, %73, %89, %96, %33, %74, %90, %97 in 1 : vector<4x128xf32>, vector<4x128xf32>, vector<4x128xf32>, vector<4x128xf32>, vector<4x128xf32>, vector<4x128xf32>, vector<4x128xf32>, vector<4x128xf32> -> vector<4x1024xf32>
    %cst_60 = arith.constant dense<0.000000e+00> : vector<4x1024xf32>
    %101 = tpu.matmul %99, %100, %cst_60 {dimension_numbers = #tpu.dot_dimension_numbers<[1], [0], [0], [1], [0, 0, 1, 1], [], []>} : vector<4x4xf32>, vector<4x1024xf32>, vector<4x1024xf32> -> vector<4x1024xf32>
    %102 = arith.addf %95, %101 : vector<4x1024xf32>
    %cst_61 = arith.constant 0.000000e+00 : f32
    %103 = vector.broadcast %cst_61 : f32 to vector<4x1xf32>
    %cst_62 = arith.constant 0.000000e+00 : f32
    %104 = vector.broadcast %cst_62 : f32 to vector<4x1xf32>
    %105 = vector.extract_strided_slice %102 {offsets = [0, 0], sizes = [4, 512], strides = [1, 1]} : vector<4x1024xf32> to vector<4x512xf32>
    %c0_63 = arith.constant 0 : index
    %c0_64 = arith.constant 0 : index
    %106 = vector.load %arg6[%c0_63, %c0_64] : memref<4x1xf32, #tpu.memory_space<vmem>>, vector<4x1xf32>
    %107 = vector.broadcast %106 : vector<4x1xf32> to vector<4x512xf32>
    %108 = arith.addf %105, %107 : vector<4x512xf32>
    %109 = vector.broadcast %0 : vector<1x512xf32> to vector<4x512xf32>
    %110 = arith.mulf %108, %109 : vector<4x512xf32>
    %c0_65 = arith.constant 0 : index
    %c0_66 = arith.constant 0 : index
    %c0_67 = arith.constant 0 : index
    %111 = vector.load %arg7[%c0_65, %c0_66, %c0_67] : memref<2x4x512xf32, #tpu.memory_space<vmem>>, vector<1x4x512xf32>
    %112 = vector.shape_cast %111 : vector<1x4x512xf32> to vector<4x512xf32>
    %113 = vector.shape_cast %110 : vector<4x512xf32> to vector<1x4x512xf32>
    tpu.vector_store %arg7[%c0_65, %c0_66, %c0_67], %113 {strides = array<i32>} : memref<2x4x512xf32, #tpu.memory_space<vmem>>, vector<1x4x512xf32>,
    %cst_68 = arith.constant dense<0.000000e+00> : vector<4xf32>
    %114 = vector.multi_reduction <add>, %110, %cst_68 [1] : vector<4x512xf32> to vector<4xf32>
    %115 = vector.shape_cast %114 : vector<4xf32> to vector<4x1xf32>
    %116 = arith.addf %103, %115 : vector<4x1xf32>
    %117 = arith.mulf %110, %110 : vector<4x512xf32>
    %cst_69 = arith.constant dense<0.000000e+00> : vector<4xf32>
    %118 = vector.multi_reduction <add>, %117, %cst_69 [1] : vector<4x512xf32> to vector<4xf32>
    %119 = vector.shape_cast %118 : vector<4xf32> to vector<4x1xf32>
    %120 = arith.addf %104, %119 : vector<4x1xf32>
    %121 = vector.extract_strided_slice %102 {offsets = [0, 512], sizes = [4, 512], strides = [1, 1]} : vector<4x1024xf32> to vector<4x512xf32>
    %c0_70 = arith.constant 0 : index
    %c0_71 = arith.constant 0 : index
    %122 = vector.load %arg6[%c0_70, %c0_71] : memref<4x1xf32, #tpu.memory_space<vmem>>, vector<4x1xf32>
    %123 = vector.broadcast %122 : vector<4x1xf32> to vector<4x512xf32>
    %124 = arith.addf %121, %123 : vector<4x512xf32>
    %125 = vector.broadcast %0 : vector<1x512xf32> to vector<4x512xf32>
    %126 = arith.mulf %124, %125 : vector<4x512xf32>
    %c1_72 = arith.constant 1 : index
    %c0_73 = arith.constant 0 : index
    %c0_74 = arith.constant 0 : index
    %127 = vector.load %arg7[%c1_72, %c0_73, %c0_74] : memref<2x4x512xf32, #tpu.memory_space<vmem>>, vector<1x4x512xf32>
    %128 = vector.shape_cast %127 : vector<1x4x512xf32> to vector<4x512xf32>
    %129 = vector.shape_cast %126 : vector<4x512xf32> to vector<1x4x512xf32>
    tpu.vector_store %arg7[%c1_72, %c0_73, %c0_74], %129 {strides = array<i32>} : memref<2x4x512xf32, #tpu.memory_space<vmem>>, vector<1x4x512xf32>,
    %cst_75 = arith.constant dense<0.000000e+00> : vector<4xf32>
    %130 = vector.multi_reduction <add>, %126, %cst_75 [1] : vector<4x512xf32> to vector<4xf32>
    %131 = vector.shape_cast %130 : vector<4xf32> to vector<4x1xf32>
    %132 = arith.addf %116, %131 : vector<4x1xf32>
    %133 = arith.mulf %126, %126 : vector<4x512xf32>
    %cst_76 = arith.constant dense<0.000000e+00> : vector<4xf32>
    %134 = vector.multi_reduction <add>, %133, %cst_76 [1] : vector<4x512xf32> to vector<4xf32>
    %135 = vector.shape_cast %134 : vector<4xf32> to vector<4x1xf32>
    %136 = arith.addf %120, %135 : vector<4x1xf32>
    %137 = tpu.concatenate %132, %136 in 1 : vector<4x1xf32>, vector<4x1xf32> -> vector<4x2xf32>
    %c0_77 = arith.constant 0 : index
    %c0_78 = arith.constant 0 : index
    %c0_79 = arith.constant 0 : index
    %138 = vector.load %arg8[%c0_77, %c0_78, %c0_79] : memref<1x4x2xf32, #tpu.memory_space<vmem>>, vector<1x4x2xf32>
    %139 = vector.shape_cast %138 : vector<1x4x2xf32> to vector<4x2xf32>
    %140 = vector.shape_cast %137 : vector<4x2xf32> to vector<1x4x2xf32>
    tpu.vector_store %arg8[%c0_77, %c0_78, %c0_79], %140 {strides = array<i32>} : memref<1x4x2xf32, #tpu.memory_space<vmem>>, vector<1x4x2xf32>,
    return
  }
  func.func @transform_0(%arg0: i32) -> (i32, i32, i32) {
    %c0_i32 = arith.constant 0 : i32
    %c0_i32_0 = arith.constant 0 : i32
    %c0_i32_1 = arith.constant 0 : i32
    return %arg0, %c0_i32, %c0_i32_0 : i32, i32, i32
  }
  func.func @transform_1(%arg0: i32) -> (i32, i32) {
    %c0_i32 = arith.constant 0 : i32
    %c0_i32_0 = arith.constant 0 : i32
    %c0_i32_1 = arith.constant 0 : i32
    return %c0_i32, %c0_i32_0 : i32, i32
  }
  func.func @transform_2(%arg0: i32) -> (i32, i32) {
    %c0_i32 = arith.constant 0 : i32
    %c0_i32_0 = arith.constant 0 : i32
    %c0_i32_1 = arith.constant 0 : i32
    return %c0_i32, %c0_i32_0 : i32, i32
  }
  func.func @transform_3(%arg0: i32) -> (i32, i32) {
    %c0_i32 = arith.constant 0 : i32
    %c0_i32_0 = arith.constant 0 : i32
    %c0_i32_1 = arith.constant 0 : i32
    return %c0_i32, %c0_i32_0 : i32, i32
  }
  func.func @transform_4(%arg0: i32) -> (i32, i32, i32) {
    %c0_i32 = arith.constant 0 : i32
    %c0_i32_0 = arith.constant 0 : i32
    %c0_i32_1 = arith.constant 0 : i32
    %c0_i32_2 = arith.constant 0 : i32
    return %c0_i32, %c0_i32_0, %c0_i32_1 : i32, i32, i32
  }
  func.func @transform_5(%arg0: i32) -> (i32, i32) {
    %c0_i32 = arith.constant 0 : i32
    %c0_i32_0 = arith.constant 0 : i32
    %c0_i32_1 = arith.constant 0 : i32
    return %c0_i32, %c0_i32_0 : i32, i32
  }
  func.func @transform_6(%arg0: i32) -> (i32, i32, i32) {
    %c0_i32 = arith.constant 0 : i32
    %c0_i32_0 = arith.constant 0 : i32
    %c0_i32_1 = arith.constant 0 : i32
    return %arg0, %c0_i32, %c0_i32_0 : i32, i32, i32
  }
  func.func @transform_7(%arg0: i32) -> (i32, i32, i32) {
    %c0_i32 = arith.constant 0 : i32
    %c0_i32_0 = arith.constant 0 : i32
    %c0_i32_1 = arith.constant 0 : i32
    return %arg0, %c0_i32, %c0_i32_0 : i32, i32, i32
  }
}

</mosaic_0001>

<bundles_post_ra>
// kernel: tile.13
= control target key start
LH: loop header
LB: loop body
LE: loop exit
PB: predicated region body
PF: predicated region fallthrough
CT: control target
= control target key end

     0   :  { %s22_s0 = inlined_call_operand.vmem [shape: f32[128], index: 0, kind: input, shape index: {}]   ;;  %s23_s1 = inlined_call_operand.vmem [shape: f32[4,128], index: 1, kind: output, shape index: {}]  }
   0x1   :  { %v4_v0 = vld [vmem:[%s22_s0] ss:$0 sm:$0xff] }
   0x2   :  { %5 = vst [vmem:[%s23_s1] sm:$0xf] %v4_v0 }

// kernel: tile.18
= control target key start
LH: loop header
LB: loop body
LE: loop exit
PB: predicated region body
PF: predicated region fallthrough
CT: control target
= control target key end

     0   :  { %s22_s0 = inlined_call_operand.vmem [shape: f32[4], index: 0, kind: input, shape index: {}]   ;;  %s23_s1 = inlined_call_operand.vmem [shape: f32[4,4], index: 1, kind: output, shape index: {}]  }
   0x1   :  { %v4_v0 = vld [vmem:[%s22_s0] ss:$0 sm:$0xff] }
   0x2   :  { %5 = vst [vmem:[%s23_s1] sm:$0xf] %v4_v0 }

// kernel: tile.0
= control target key start
LH: loop header
LB: loop body
LE: loop exit
PB: predicated region body
PF: predicated region fallthrough
CT: control target
= control target key end

     0   :  { %s34_s8 = smov 125   ;;  %vm7_vm0 = vcmask 7168   ;;  %s35_s11 = smov 126   ;;  %s61_s0 = inlined_call_operand.vmem [shape: f32[4,4], index: 0, kind: input, shape index: {}]   ;;  %s62_s1 = inlined_call_operand.vmem [shape: f32[16,1], index: 1, kind: output, shape index: {}]  }
   0x1   :  { %v4_v0 = vld [vmem:[%s61_s0] sm:$0xf]  ;;  %s33_s0 = smov 127  }
   0x2   :  { %5 = vst [vmem:[#allocation0] sm:$0xf] %v4_v0 }
   0x9   :  { %v9_v1 = vld [vmem:[#allocation0] sm:$0xf]  }
   0xa   :  { %v21_v2 = vld [vmem:[#allocation0] sm:$0xf]   ;;  %10 = vrot.lane.b32.xlu0 %v9_v1, %s33_s0 }
   0xb   :  { %22 = vrot.lane.b32.xlu1 %v21_v2, %s34_s8  ;;  %v6_v3 = vld [vmem:[#allocation0] sm:$0xf]  }
   0xc   :  { %v15_v4 = vld [vmem:[#allocation0] sm:$0xf]   ;;  %8 = vst.msk [vmem:[%s62_s1] ss:$4 sm:$0xf] %vm7_vm0, %v6_v3  }
   0xe   :  { %16 = vrot.lane.b32.xlu0 %v15_v4, %s35_s11 }
  0x7c   :  { %v11_v5 = vpop.permute.xlu0 %10  }
  0x7d   :  { %v23_v6 = vpop.permute.xlu1 %22   ;;  %27 = vst.msk [vmem:[%s62_s1 + $0x1] ss:$4 sm:$0xf] %vm7_vm0, %v11_v5  }
  0x7e   :  { %29 = vst.msk [vmem:[%s62_s1 + $0x3] ss:$4 sm:$0xf] %vm7_vm0, %v23_v6  }
  0x80   :  { %v17_v7 = vpop.permute.xlu0 %16  }
  0x81   :  { %28 = vst.msk [vmem:[%s62_s1 + $0x2] ss:$4 sm:$0xf] %vm7_vm0, %v17_v7  }

// kernel: upsample_block.5
= control target key start
LH: loop header
LB: loop body
LE: loop exit
PB: predicated region body
PF: predicated region fallthrough
CT: control target
= control target key end

     0   :  { %v67_v0 = vmov 0   ;;  %v68_v3 = vmov 839922192   ;;  %v26_v5 = vlaneseq  ;;  %s119_s1 = inlined_call_operand.vmem [shape: f32[4,1], index: 1, kind: input, shape index: {}]   ;;  %s120_s2 = inlined_call_operand.vmem [shape: f32[4,1], index: 2, kind: input, shape index: {}]   ;;  %s121_s0 = inlined_call_operand.vmem [shape: f32[2,4,512], index: 0, kind: input, shape index: {}]   ;;  %s122_s3 = inlined_call_operand.vmem [shape: f32[2,4,512], index: 3, kind: output, shape index: {}]  }
   0x1   :  { %66 = vset.pattern.permute.xlu0 %v67_v0  ;;  %v18_v1 = vld [vmem:[%s119_s1] sm:$0xf]  ;;  %v24_v4 = vunpack.c.l.s4 %v68_v3  ;;  %v15_v12 = vld [vmem:[%s121_s0 + $0x8] sm:$0xff]  ;;  %v16_v13 = vld [vmem:[%s121_s0 + $0x10] sm:$0xff] }
   0x2   :  { %21 = vperm.xlu0 %66, %v18_v1   ;;  %v35_v2 = vld [vmem:[%s120_s2] sm:$0xf]  ;;  %v27_v7 = vshrl.u32 %v26_v5, 7  ;;  %v17_v14 = vld [vmem:[%s121_s0 + $0x18] sm:$0xff] }
   0x3   :  { %v25_v6 = vunpack.c.0.s8 %v24_v4  ;;  %v14_v10 = vld [vmem:[%s121_s0] sm:$0xff] }
   0x5   :  { %v28_v8 = vsub.s32 %v25_v6, %v27_v7 }
   0x6   :  { %38 = vperm.xlu0 %66, %v35_v2  }
  0x81   :  { %v22_v9 = vpop.permute.xlu0 %21 }
  0x82   :  { %v29_v11 = vrot.slane %v22_v9, %v28_v8 }
  0x84   :  { %v31_v15 = vmul.f32 %v29_v11, %v14_v10  ;;  %v32_v17 = vmul.f32 %v29_v11, %v15_v12  ;;  %v33_v18 = vmul.f32 %v29_v11, %v16_v13  ;;  %v34_v19 = vmul.f32 %v29_v11, %v17_v14 }
  0x85   :  { %v39_v16 = vpop.permute.xlu0 %38 }
  0x86   :  { %v46_v20 = vrot.slane %v39_v16, %v28_v8 }
  0x88   :  { %v48_v21 = vadd.f32 %v46_v20, %v31_v15  ;;  %v49_v22 = vadd.f32 %v46_v20, %v32_v17  ;;  %v50_v23 = vadd.f32 %v46_v20, %v33_v18  ;;  %v51_v24 = vadd.f32 %v46_v20, %v34_v19 }
  0x8a   :  { %v52_v25 = vmax.f32 %v48_v21, 0.0  ;;  %v53_v26 = vmax.f32 %v49_v22, 0.0  ;;  %v54_v27 = vmax.f32 %v50_v23, 0.0  ;;  %v55_v28 = vmax.f32 %v51_v24, 0.0 }
  0x8c   :  { %56 = vst [vmem:[%s122_s3] sm:$0xff] %v52_v25  ;;  %57 = vst [vmem:[%s122_s3 + $0x8] sm:$0xff] %v53_v26 }
  0x8d   :  { %58 = vst [vmem:[%s122_s3 + $0x10] sm:$0xff] %v54_v27  ;;  %59 = vst [vmem:[%s122_s3 + $0x18] sm:$0xff] %v55_v28 }

// kernel: upsample_block.4
= control target key start
LH: loop header
LB: loop body
LE: loop exit
PB: predicated region body
PF: predicated region fallthrough
CT: control target
= control target key end

     0   :  { %v3210_v0 = vmov 0   ;;  %v3211_v3 = vmov 0.0   ;;  %v3212_v4 = vmov 839922192   ;;  %v36_v6 = vlaneseq  ;;  %s3214_s14 = smov 11   ;;  %s3215_s15 = smov 9   ;;  %s3594_s1 = inlined_call_operand.vmem [shape: f32[4,1], index: 1, kind: input, shape index: {}]   ;;  %s3595_s2 = inlined_call_operand.vmem [shape: f32[4,1], index: 2, kind: input, shape index: {}]   ;;  %s3596_s3 = inlined_call_operand.vmem [shape: f32[1,512], index: 3, kind: input, shape index: {}]   ;;  %s3597_s0 = inlined_call_operand.vmem [shape: f32[2,4,512], index: 0, kind: input, shape index: {}]   ;;  %s3598_s4 = inlined_call_operand.vmem [shape: f32[9,4,4], index: 4, kind: input, shape index: {}]   ;;  %s3599_s5 = inlined_call_operand.vmem [shape: f32[4,1], index: 5, kind: input, shape index: {}]   ;;  %s3600_s6 = inlined_call_operand.vmem [shape: f32[2,4,512], index: 6, kind: output, shape index: {0}]   ;;  %s3601_s7 = inlined_call_operand.vmem [shape: f32[1,4,2], index: 7, kind: output, shape index: {1}]  }
   0x1   :  { %3208 = vset.pattern.permute.xlu0 %v3210_v0  ;;  %v28_v1 = vld [vmem:[%s3594_s1] sm:$0xf]  ;;  %3209 = vset.pattern.permute.xlu1 %v3210_v0  ;;  %v34_v5 = vunpack.c.l.s4 %v3212_v4  ;;  %v27_v18 = vld [vmem:[%s3597_s0 + $0x8] sm:$0xff]  ;;  %v3013_v19 = vld [vmem:[%s3597_s0 + $0x10] sm:$0xff]  ;;  %vm133_vm0 = vcmask 1043456   ;;  %vm129_vm1 = vcmask 31744  }
   0x2   :  { %31 = vperm.xlu0 %3208, %v28_v1   ;;  %v43_v2 = vld [vmem:[%s3595_s2] sm:$0xf]  ;;  %289 = vmatprep.mubr.f32.mxu1 %v3211_v3  ;;  %v37_v8 = vshrl.u32 %v36_v6, 7  ;;  %v3014_v20 = vld [vmem:[%s3597_s0 + $0x18] sm:$0xff]  ;;  %v3015_v48 = vld [vmem:[%s3598_s4 + $0x4] sm:$0xf] }
   0x3   :  { %218 = vmatprep.mubr.f32.mxu0 %v3211_v3  ;;  %v35_v7 = vunpack.c.0.s8 %v34_v5  ;;  %v25_v14 = vld [vmem:[%s3596_s3] sm:$0xf]  ;;  %s3216_s16 = smov 1   ;;  %s3217_s17 = smov 127   ;;  %v3040_v63 = vld [vmem:[%s3598_s4 + $0x8] sm:$0xf] }
   0x4   :  { %v63_v10 = vsub.s32 0, %v37_v8  ;;  %v67_v11 = vsub.s32 1, %v37_v8  ;;  %v71_v12 = vsub.s32 2, %v37_v8  ;;  %v75_v13 = vsub.s32 3, %v37_v8  ;;  %v26_v16 = vld [vmem:[%s3597_s0] sm:$0xff]  ;;  %s3213_s0 = smov 10  }
   0x5   :  { %v38_v9 = vsub.s32 %v35_v7, %v37_v8  ;;  %s3218_s18 = smov 118   ;;  %s3219_s19 = smov 119   ;;  %v2904_v50 = vld [vmem:[%s3599_s5] sm:$0xf]  ;;  %v3066_v6 = vld [vmem:[%s3598_s4 + $0x10] sm:$0xf] }
   0x6   :  { %46 = vperm.xlu0 %3208, %v43_v2   ;;  %v3284_v21 = vrot.slane %v25_v14, %v63_v10  ;;  %v3286_v22 = vrot.slane %v25_v14, %v67_v11  ;;  %v3288_v23 = vrot.slane %v25_v14, %v71_v12  ;;  %v3290_v24 = vrot.slane %v25_v14, %v75_v13  ;;  %s3220_s20 = smov 117   ;;  %v2952_v51 = vld [vmem:[%s3599_s5] sm:$0xf]  ;;  %v3053_v2 = vld [vmem:[%s3598_s4 + $0xc] sm:$0xf] }
   0x7   :  { %v122_v58 = vld [vmem:[%s3598_s4] sm:$0xf]  ;;  %v3092_v13 = vld [vmem:[%s3598_s4 + $0x18] sm:$0xf]  ;;  %vm3001_vm2 = vcmask 7168   ;;  %vm3003_vm3 = vcmask 11264  }
   0x8   :  { %v81_v31 = vcombine.low %v3284_v21, %v3286_v22  ;;  %v82_v32 = vcombine.low %v3288_v23, %v3290_v24 }
  0x81   :  { %v32_v15 = vpop.permute.xlu0 %31 }
  0x82   :  { %v39_v17 = vrot.slane %v32_v15, %v38_v9 }
  0x84   :  { %v41_v25 = vmul.f32 %v39_v17, %v26_v16  ;;  %v42_v27 = vmul.f32 %v39_v17, %v27_v18  ;;  %v90_v28 = vmul.f32 %v3013_v19, %v39_v17  ;;  %v91_v29 = vmul.f32 %v3014_v20, %v39_v17  ;;  %v3105_v16 = vld [vmem:[%s3598_s4 + $0x1c] sm:$0xf]  ;;  %v3118_v19 = vld [vmem:[%s3598_s4 + $0x20] sm:$0xf] }
  0x85   :  { %v47_v26 = vpop.permute.xlu0 %46 }
  0x86   :  { %v54_v30 = vrot.slane %v47_v26, %v38_v9  ;;  %v3079_v9 = vld [vmem:[%s3598_s4 + $0x14] sm:$0xf] }
  0x88   :  { %v56_v33 = vadd.f32 %v54_v30, %v41_v25  ;;  %v57_v34 = vadd.f32 %v54_v30, %v42_v27  ;;  %v92_v35 = vadd.f32 %v90_v28, %v54_v30  ;;  %v93_v36 = vadd.f32 %v91_v29, %v54_v30 }
  0x8a   :  { %v58_v37 = vmax.f32 %v56_v33, 0.0  ;;  %v59_v38 = vmax.f32 %v57_v34, 0.0  ;;  %v94_v39 = vmax.f32 %v92_v35, 0.0  ;;  %v95_v40 = vmax.f32 %v93_v36, 0.0 }
  0x8c   :  { %v3296_v41 = vmul.f32 %v81_v31, %v58_v37  ;;  %v3298_v42 = vmul.f32 %v82_v32, %v59_v38  ;;  %v3300_v43 = vmul.f32 %v95_v40, %v82_v32  ;;  %v3302_v44 = vmul.f32 %v94_v39, %v81_v31 }
  0x8e   :  { %v3306_v45 = vcombine.high %v3300_v43, %v3300_v43  ;;  %v3310_v46 = vcombine.high %v3298_v42, %v3298_v42  ;;  %v3314_v47 = vcombine.high %v3296_v41, %v3296_v41  ;;  %v3325_v49 = vcombine.high %v3302_v44, %v3302_v44 }
  0x90   :  { %125 = vrot.lane.b32.xlu0 %v3306_v45, %s3213_s0  ;;  %123 = vrot.lane.b32.xlu1 %v3310_v46, %s3213_s0 }
  0x91   :  { %3019 = vmatprep.subr.msk.mxu1 %vm133_vm0, %v3314_v47 }
  0x92   :  { %3020 = vmatpush1.msk.msra.mxu1 %vm133_vm0, %v3296_v41 }
  0x93   :  { %3025 = vmatprep.subr.msk.mxu1 %vm133_vm0, %v3325_v49  ;;  %3021 = vmatmul.mubr.msk.f32.vlgmr.msra.gmra.mrb[0].mxu1 %vm129_vm1, %v3015_v48 }
  0x94   :  { %3026 = vmatpush1.msk.msra.mxu1 %vm133_vm0, %v3302_v44  ;;  %101 = vrot.lane.b32.xlu0 %v3310_v46, %s3214_s14 }
  0x95   :  { %103 = vrot.lane.b32.xlu1 %v3298_v42, %s3213_s0  ;;  %3031 = vmatprep.subr.msk.mxu1 %vm133_vm0, %v3296_v41 }
  0x96   :  { %431 = vmatprep.mubr.f32.mxu1 %v3211_v3 }
  0x97   :  { %3027 = vmatmul.mubr.msk.f32.vlgmr.msra.gmra.mrb[2].mxu1 %vm129_vm1, %v3015_v48 }
  0x98   :  { %113 = vrot.lane.b32.xlu0 %v3306_v45, %s3214_s14  ;;  %588 = vmatprep.mubr.f32.mxu1 %v3211_v3 }
  0x99   :  { %115 = vrot.lane.b32.xlu1 %v3300_v43, %s3213_s0 }
  0x9c   :  { %737 = vrot.lane.b32.xlu0 %v3298_v42, %s3215_s15 }
  0x9d   :  { %108 = vrot.lane.b32.xlu1 %v3314_v47, %s3216_s16 }
  0xa0   :  { %741 = vrot.lane.b32.xlu0 %v3300_v43, %s3215_s15 }
  0xa1   :  { %120 = vrot.lane.b32.xlu1 %v3325_v49, %s3216_s16 }
  0xa4   :  { %1054 = vrot.lane.b32.xlu0 %v3310_v46, %s3216_s16 }
  0xa5   :  { %739 = vrot.lane.b32.xlu1 %v3296_v41, %s3217_s17 }
  0xa8   :  { %1666 = vrot.lane.b32.xlu0 %v3298_v42, %s3217_s17 }
  0xa9   :  { %743 = vrot.lane.b32.xlu1 %v3302_v44, %s3217_s17 }
  0xac   :  { %1975 = vrot.lane.b32.xlu0 %v3296_v41, %s3218_s18 }
  0xad   :  { %1056 = vrot.lane.b32.xlu1 %v3306_v45, %s3216_s16 }
  0xb0   :  { %1979 = vrot.lane.b32.xlu0 %v3302_v44, %s3218_s18 }
  0xb1   :  { %1668 = vrot.lane.b32.xlu1 %v3300_v43, %s3217_s17 }
  0xb4   :  { %2290 = vrot.lane.b32.xlu0 %v3314_v47, %s3218_s18 }
  0xb5   :  { %1973 = vrot.lane.b32.xlu1 %v3314_v47, %s3219_s19 }
  0xb8   :  { %2597 = vrot.lane.b32.xlu0 %v3296_v41, %s3220_s20 }
  0xb9   :  { %1977 = vrot.lane.b32.xlu1 %v3325_v49, %s3219_s19 }
  0xbc   :  { %2907 = vperm.xlu0 %3208, %v2904_v50  }
  0xbd   :  { %2292 = vrot.lane.b32.xlu1 %v3325_v49, %s3218_s18 }
  0xc1   :  { %2599 = vrot.lane.b32.xlu1 %v3302_v44, %s3220_s20 }
  0xc5   :  { %2955 = vperm.xlu1 %3209, %v2952_v51  }
 0x102   :  { %v126_v52 = vpop.permute.xlu0 %125  ;;  %v124_v53 = vpop.permute.xlu1 %123 }
 0x103   :  { %3016 = vmatprep.subr.msk.mxu0 %vm133_vm0, %v124_v53 }
 0x106   :  { %v102_v54 = vpop.permute.xlu0 %101 }
 0x107   :  { %v104_v55 = vpop.permute.xlu1 %103 }
 0x108   :  { %3017 = vmatpush1.msk.msra.mxu0 %vm133_vm0, %v104_v55 }
 0x109   :  { %3018 = vmatmul.mubr.msk.f32.vlgmr.msra.gmra.mrb[0].mxu0 %vm129_vm1, %v3015_v48  ;;  %3022 = vmatprep.subr.msk.mxu0 %vm133_vm0, %v126_v52 }
 0x10a   :  { %v114_v56 = vpop.permute.xlu0 %113  ;;  %360 = vmatprep.mubr.f32.mxu0 %v3211_v3 }
 0x10b   :  { %v116_v57 = vpop.permute.xlu1 %115 }
 0x10c   :  { %3023 = vmatpush1.msk.msra.mxu0 %vm133_vm0, %v116_v57 }
 0x10d   :  { %3024 = vmatmul.mubr.msk.f32.vlgmr.msra.gmra.mrb[2].mxu0 %vm129_vm1, %v3015_v48  ;;  %3028 = vmatprep.subr.msk.mxu0 %vm133_vm0, %v104_v55 }
 0x10e   :  { %3029 = vmatpush1.msk.msra.mxu0 %vm133_vm0, %v102_v54  ;;  %517 = vmatprep.mubr.f32.mxu0 %v3211_v3  ;;  %v738_v60 = vpop.permute.xlu0 %737 }
 0x10f   :  { %3034 = vmatprep.subr.msk.mxu0 %vm133_vm0, %v116_v57  ;;  %v109_v59 = vpop.permute.xlu1 %108 }
 0x110   :  { %3032 = vmatpush1.msk.msra.mxu1 %vm133_vm0, %v109_v59 }
 0x111   :  { %3030 = vmatmul.mubr.msk.f32.vlgmr.msra.gmra.mrb[0].mxu0 %vm129_vm1, %v122_v58  ;;  %3037 = vmatprep.subr.msk.mxu1 %vm133_vm0, %v3302_v44 }
 0x112   :  { %3035 = vmatpush1.msk.msra.mxu0 %vm133_vm0, %v114_v56  ;;  %3033 = vmatmul.mubr.msk.f32.vlgmr.msra.gmra.mrb[0].mxu1 %vm129_vm1, %v122_v58  ;;  %v742_v62 = vpop.permute.xlu0 %741 }
 0x113   :  { %3041 = vmatprep.subr.msk.mxu0 %vm133_vm0, %v738_v60  ;;  %v121_v61 = vpop.permute.xlu1 %120  ;;  %659 = vmatprep.mubr.f32.mxu0 %v3211_v3 }
 0x114   :  { %3038 = vmatpush1.msk.msra.mxu1 %vm133_vm0, %v121_v61  ;;  %730 = vmatprep.mubr.f32.mxu1 %v3211_v3 }
 0x115   :  { %3036 = vmatmul.mubr.msk.f32.vlgmr.msra.gmra.mrb[2].mxu0 %vm129_vm1, %v122_v58 }
 0x116   :  { %3042 = vmatpush1.msk.msra.mxu0 %vm133_vm0, %v124_v53  ;;  %3039 = vmatmul.mubr.msk.f32.vlgmr.msra.gmra.mrb[2].mxu1 %vm129_vm1, %v122_v58  ;;  %v1055_v4 = vpop.permute.xlu0 %1054 }
 0x117   :  { %3047 = vmatprep.subr.msk.mxu0 %vm133_vm0, %v742_v62  ;;  %v740_v0 = vpop.permute.xlu1 %739  ;;  %826 = vmatprep.mubr.f32.mxu0 %v3211_v3 }
 0x118   :  { %3044 = vmatprep.subr.msk.mxu1 %vm133_vm0, %v740_v0  ;;  %897 = vmatprep.mubr.f32.mxu1 %v3211_v3 }
 0x119   :  { %3043 = vmatmul.mubr.msk.f32.vlgmr.msra.gmra.mrb[0].mxu0 %vm129_vm1, %v3040_v63  ;;  %3045 = vmatpush1.msk.msra.mxu1 %vm133_vm0, %v3314_v47 }
 0x11a   :  { %3048 = vmatpush1.msk.msra.mxu0 %vm133_vm0, %v126_v52  ;;  %3046 = vmatmul.mubr.msk.f32.vlgmr.msra.gmra.mrb[0].mxu1 %vm129_vm1, %v3040_v63  ;;  %v1667_v7 = vpop.permute.xlu0 %1666 }
 0x11b   :  { %3054 = vmatprep.subr.msk.mxu0 %vm133_vm0, %v3296_v41  ;;  %v744_v1 = vpop.permute.xlu1 %743  ;;  %968 = vmatprep.mubr.f32.mxu0 %v3211_v3 }
 0x11c   :  { %3050 = vmatprep.subr.msk.mxu1 %vm133_vm0, %v744_v1  ;;  %1039 = vmatprep.mubr.f32.mxu1 %v3211_v3 }
 0x11d   :  { %3049 = vmatmul.mubr.msk.f32.vlgmr.msra.gmra.mrb[2].mxu0 %vm129_vm1, %v3040_v63  ;;  %3051 = vmatpush1.msk.msra.mxu1 %vm133_vm0, %v3325_v49 }
 0x11e   :  { %3055 = vmatpush1.msk.msra.mxu0 %vm133_vm0, %v109_v59  ;;  %3052 = vmatmul.mubr.msk.f32.vlgmr.msra.gmra.mrb[2].mxu1 %vm129_vm1, %v3040_v63  ;;  %v1976_v10 = vpop.permute.xlu0 %1975 }
 0x11f   :  { %3057 = vmatprep.subr.msk.mxu1 %vm133_vm0, %v3298_v42  ;;  %3060 = vmatprep.subr.msk.mxu0 %vm133_vm0, %v3302_v44  ;;  %v1057_v5 = vpop.permute.xlu1 %1056 }
 0x120   :  { %3058 = vmatpush1.msk.msra.mxu1 %vm133_vm0, %v1055_v4  ;;  %1137 = vmatprep.mubr.f32.mxu0 %v3211_v3 }
 0x121   :  { %3063 = vmatprep.subr.msk.mxu1 %vm133_vm0, %v3300_v43  ;;  %3056 = vmatmul.mubr.msk.f32.vlgmr.msra.gmra.mrb[0].mxu0 %vm129_vm1, %v3053_v2 }
 0x122   :  { %1208 = vmatprep.mubr.f32.mxu1 %v3211_v3  ;;  %3061 = vmatpush1.msk.msra.mxu0 %vm133_vm0, %v121_v61  ;;  %v1980_v12 = vpop.permute.xlu0 %1979 }
 0x123   :  { %3059 = vmatmul.mubr.msk.f32.vlgmr.msra.gmra.mrb[0].mxu1 %vm129_vm1, %v3053_v2  ;;  %3067 = vmatprep.subr.msk.mxu0 %vm133_vm0, %v3314_v47  ;;  %v3463_v8 = vpop.permute.xlu1 %1668 }
 0x124   :  { %3064 = vmatpush1.msk.msra.mxu1 %vm133_vm0, %v1057_v5  ;;  %1279 = vmatprep.mubr.f32.mxu0 %v3211_v3 }
 0x125   :  { %3070 = vmatprep.subr.msk.mxu1 %vm133_vm0, %v3310_v46  ;;  %3062 = vmatmul.mubr.msk.f32.vlgmr.msra.gmra.mrb[2].mxu0 %vm129_vm1, %v3053_v2 }
 0x126   :  { %1350 = vmatprep.mubr.f32.mxu1 %v3211_v3  ;;  %3068 = vmatpush1.msk.msra.mxu0 %vm133_vm0, %v3296_v41  ;;  %v2291_v15 = vpop.permute.xlu0 %2290 }
 0x127   :  { %3065 = vmatmul.mubr.msk.f32.vlgmr.msra.gmra.mrb[2].mxu1 %vm129_vm1, %v3053_v2  ;;  %3073 = vmatprep.subr.msk.mxu0 %vm133_vm0, %v3325_v49  ;;  %v1974_v11 = vpop.permute.xlu1 %1973 }
 0x128   :  { %3071 = vmatpush1.msk.msra.mxu1 %vm133_vm0, %v3298_v42  ;;  %1438 = vmatprep.mubr.f32.mxu0 %v3211_v3 }
 0x129   :  { %3076 = vmatprep.subr.msk.mxu1 %vm133_vm0, %v3306_v45  ;;  %3069 = vmatmul.mubr.msk.f32.vlgmr.msra.gmra.mrb[0].mxu0 %vm129_vm1, %v3066_v6 }
 0x12a   :  { %1509 = vmatprep.mubr.f32.mxu1 %v3211_v3  ;;  %3074 = vmatpush1.msk.msra.mxu0 %vm133_vm0, %v3302_v44  ;;  %v2598_v18 = vpop.permute.xlu0 %2597 }
 0x12b   :  { %3072 = vmatmul.mubr.msk.f32.vlgmr.msra.gmra.mrb[0].mxu1 %vm129_vm1, %v3066_v6  ;;  %3080 = vmatprep.subr.msk.mxu0 %vm133_vm0, %v740_v0  ;;  %v1978_v14 = vpop.permute.xlu1 %1977 }
 0x12c   :  { %3077 = vmatpush1.msk.msra.mxu1 %vm133_vm0, %v3300_v43  ;;  %1580 = vmatprep.mubr.f32.mxu0 %v3211_v3 }
 0x12d   :  { %3083 = vmatprep.subr.msk.mxu1 %vm133_vm0, %v1667_v7  ;;  %3075 = vmatmul.mubr.msk.f32.vlgmr.msra.gmra.mrb[2].mxu0 %vm129_vm1, %v3066_v6 }
 0x12e   :  { %1651 = vmatprep.mubr.f32.mxu1 %v3211_v3  ;;  %3081 = vmatpush1.msk.msra.mxu0 %vm133_vm0, %v3314_v47 }
 0x12f   :  { %3078 = vmatmul.mubr.msk.f32.vlgmr.msra.gmra.mrb[2].mxu1 %vm129_vm1, %v3066_v6  ;;  %3086 = vmatprep.subr.msk.mxu0 %vm133_vm0, %v744_v1  ;;  %v2293_v17 = vpop.permute.xlu1 %2292 }
 0x130   :  { %3084 = vmatpush1.msk.msra.mxu1 %vm133_vm0, %v3310_v46  ;;  %1745 = vmatprep.mubr.f32.mxu0 %v3211_v3 }
 0x131   :  { %3089 = vmatprep.subr.msk.mxu1 %vm133_vm0, %v3463_v8  ;;  %3082 = vmatmul.mubr.msk.f32.vlgmr.msra.gmra.mrb[0].mxu0 %vm129_vm1, %v3079_v9 }
 0x132   :  { %1816 = vmatprep.mubr.f32.mxu1 %v3211_v3  ;;  %3087 = vmatpush1.msk.msra.mxu0 %vm133_vm0, %v3325_v49 }
 0x133   :  { %3085 = vmatmul.mubr.msk.f32.vlgmr.msra.gmra.mrb[0].mxu1 %vm129_vm1, %v3079_v9  ;;  %3093 = vmatprep.subr.msk.mxu0 %vm133_vm0, %v3298_v42  ;;  %v2600_v20 = vpop.permute.xlu1 %2599 }
 0x134   :  { %3090 = vmatpush1.msk.msra.mxu1 %vm133_vm0, %v3306_v45  ;;  %1887 = vmatprep.mubr.f32.mxu0 %v3211_v3 }
 0x135   :  { %3096 = vmatprep.subr.msk.mxu1 %vm133_vm0, %v1976_v10  ;;  %3088 = vmatmul.mubr.msk.f32.vlgmr.msra.gmra.mrb[2].mxu0 %vm129_vm1, %v3079_v9 }
 0x136   :  { %1958 = vmatprep.mubr.f32.mxu1 %v3211_v3  ;;  %3094 = vmatpush1.msk.msra.mxu0 %vm133_vm0, %v1055_v4 }
 0x137   :  { %3091 = vmatmul.mubr.msk.f32.vlgmr.msra.gmra.mrb[2].mxu1 %vm129_vm1, %v3079_v9  ;;  %3099 = vmatprep.subr.msk.mxu0 %vm133_vm0, %v3300_v43 }
 0x138   :  { %3097 = vmatpush1.msk.msra.mxu1 %vm133_vm0, %v1974_v11  ;;  %2062 = vmatprep.mubr.f32.mxu0 %v3211_v3 }
 0x139   :  { %3102 = vmatprep.subr.msk.mxu1 %vm133_vm0, %v1980_v12  ;;  %3095 = vmatmul.mubr.msk.f32.vlgmr.msra.gmra.mrb[0].mxu0 %vm129_vm1, %v3092_v13 }
 0x13a   :  { %2133 = vmatprep.mubr.f32.mxu1 %v3211_v3  ;;  %3100 = vmatpush1.msk.msra.mxu0 %vm133_vm0, %v1057_v5 }
 0x13b   :  { %3098 = vmatmul.mubr.msk.f32.vlgmr.msra.gmra.mrb[0].mxu1 %vm129_vm1, %v3092_v13  ;;  %3106 = vmatprep.subr.msk.mxu0 %vm133_vm0, %v3310_v46  ;;  %v2908_v25 = vpop.permute.xlu0 %2907 }
 0x13c   :  { %3103 = vmatpush1.msk.msra.mxu1 %vm133_vm0, %v1978_v14  ;;  %2204 = vmatprep.mubr.f32.mxu0 %v3211_v3 }
 0x13d   :  { %3109 = vmatprep.subr.msk.mxu1 %vm133_vm0, %v2291_v15  ;;  %3101 = vmatmul.mubr.msk.f32.vlgmr.msra.gmra.mrb[2].mxu0 %vm129_vm1, %v3092_v13 }
 0x13e   :  { %2275 = vmatprep.mubr.f32.mxu1 %v3211_v3  ;;  %3107 = vmatpush1.msk.msra.mxu0 %vm133_vm0, %v3298_v42 }
 0x13f   :  { %3104 = vmatmul.mubr.msk.f32.vlgmr.msra.gmra.mrb[2].mxu1 %vm129_vm1, %v3092_v13  ;;  %3112 = vmatprep.subr.msk.mxu0 %vm133_vm0, %v3306_v45 }
 0x140   :  { %3110 = vmatpush1.msk.msra.mxu1 %vm133_vm0, %v1976_v10  ;;  %2369 = vmatprep.mubr.f32.mxu0 %v3211_v3 }
 0x141   :  { %3115 = vmatprep.subr.msk.mxu1 %vm133_vm0, %v2293_v17  ;;  %3108 = vmatmul.mubr.msk.f32.vlgmr.msra.gmra.mrb[0].mxu0 %vm129_vm1, %v3105_v16 }
 0x142   :  { %2440 = vmatprep.mubr.f32.mxu1 %v3211_v3  ;;  %3113 = vmatpush1.msk.msra.mxu0 %vm133_vm0, %v3300_v43 }
 0x143   :  { %3111 = vmatmul.mubr.msk.f32.vlgmr.msra.gmra.mrb[0].mxu1 %vm129_vm1, %v3105_v16  ;;  %3119 = vmatprep.subr.msk.mxu0 %vm133_vm0, %v1667_v7 }
 0x144   :  { %3116 = vmatpush1.msk.msra.mxu1 %vm133_vm0, %v1980_v12  ;;  %2511 = vmatprep.mubr.f32.mxu0 %v3211_v3  ;;  %v2956_v31 = vpop.permute.xlu1 %2955 }
 0x145   :  { %3122 = vmatprep.subr.msk.mxu1 %vm133_vm0, %v2598_v18  ;;  %3114 = vmatmul.mubr.msk.f32.vlgmr.msra.gmra.mrb[2].mxu0 %vm129_vm1, %v3105_v16 }
 0x146   :  { %2582 = vmatprep.mubr.f32.mxu1 %v3211_v3  ;;  %3120 = vmatpush1.msk.msra.mxu0 %vm133_vm0, %v3310_v46 }
 0x147   :  { %3117 = vmatmul.mubr.msk.f32.vlgmr.msra.gmra.mrb[2].mxu1 %vm129_vm1, %v3105_v16  ;;  %3125 = vmatprep.subr.msk.mxu0 %vm133_vm0, %v3463_v8 }
 0x148   :  { %3123 = vmatpush1.msk.msra.mxu1 %vm133_vm0, %v2291_v15  ;;  %2676 = vmatprep.mubr.f32.mxu0 %v3211_v3 }
 0x149   :  { %3128 = vmatprep.subr.msk.mxu1 %vm133_vm0, %v2600_v20  ;;  %3121 = vmatmul.mubr.msk.f32.vlgmr.msra.gmra.mrb[0].mxu0 %vm129_vm1, %v3118_v19 }
 0x14a   :  { %2747 = vmatprep.mubr.f32.mxu1 %v3211_v3  ;;  %3126 = vmatpush1.msk.msra.mxu0 %vm133_vm0, %v3306_v45 }
 0x14b   :  { %3124 = vmatmul.mubr.msk.f32.vlgmr.msra.gmra.mrb[0].mxu1 %vm129_vm1, %v3118_v19  ;;  %2818 = vmatprep.mubr.f32.mxu0 %v3211_v3 }
 0x14c   :  { %3129 = vmatpush1.msk.msra.mxu1 %vm133_vm0, %v2293_v17  ;;  %2889 = vmatprep.mubr.f32.mxu1 %v3211_v3 }
 0x14d   :  { %3127 = vmatmul.mubr.msk.f32.vlgmr.msra.gmra.mrb[2].mxu0 %vm129_vm1, %v3118_v19 }
 0x14f   :  { %3130 = vmatmul.mubr.msk.f32.vlgmr.msra.gmra.mrb[2].mxu1 %vm129_vm1, %v3118_v19 }
 0x21c   :  { %v2678_v26 = vpop.f32.mrb[0].mxu0 }
 0x21d   :  { %v2910_v27 = vadd.f32 %v2908_v25, %v2678_v26  ;;  %v2680_v28 = vpop.f32.mrb[1].mxu0 }
 0x21e   :  { %v2911_v29 = vadd.f32 %v2908_v25, %v2680_v28  ;;  %v2749_v30 = vpop.f32.mrb[0].mxu1 }
 0x21f   :  { %v2914_v32 = vmul.f32 %v2910_v27, %v3284_v21  ;;  %v2912_v33 = vadd.f32 %v2908_v25, %v2749_v30  ;;  %v2751_v34 = vpop.f32.mrb[1].mxu1 }
 0x220   :  { %v2915_v35 = vmul.f32 %v2911_v29, %v3286_v22  ;;  %v2913_v36 = vadd.f32 %v2908_v25, %v2751_v34  ;;  %v2820_v37 = vpop.f32.mrb[2].mxu0 }
 0x221   :  { %v2916_v3 = vmul.f32 %v2912_v33, %v3288_v23  ;;  %v2958_v38 = vadd.f32 %v2956_v31, %v2820_v37  ;;  %v2822_v39 = vpop.f32.mrb[3].mxu0  ;;  %v2928_v40 = vsel %vm133_vm0, %v2914_v32, 0.0  ;;  %v2938_v41 = vmul.f32 %v2914_v32, %v2914_v32 }
 0x222   :  { %v2922_v42 = vcombine.low %v2914_v32, %v2915_v35  ;;  %v2917_v43 = vmul.f32 %v2913_v36, %v3290_v24  ;;  %v2959_v44 = vadd.f32 %v2956_v31, %v2822_v39  ;;  %v2891_v45 = vpop.f32.mrb[2].mxu1  ;;  %v2939_v46 = vmul.f32 %v2915_v35, %v2915_v35 }
 0x223   :  { %v2962_v47 = vmul.f32 %v2958_v38, %v3284_v21  ;;  %v2960_v48 = vadd.f32 %v2956_v31, %v2891_v45  ;;  %v2893_v49 = vpop.f32.mrb[3].mxu1  ;;  %v2929_v50 = vsel %vm133_vm0, %v2915_v35, 0.0  ;;  %v2931_v56 = vsel %vm133_vm0, %v2916_v3, 0.0 }
 0x224   :  { %2926 = vst [vmem:[%s3600_s6] sm:$0xff] %v2922_v42  ;;  %v2923_v51 = vcombine.low %v2916_v3, %v2917_v43  ;;  %v2963_v52 = vmul.f32 %v2959_v44, %v3286_v22  ;;  %v2961_v53 = vadd.f32 %v2956_v31, %v2893_v49  ;;  %v2930_v54 = vadd.f32 %v2929_v50, %v2928_v40 }
 0x225   :  { %v2964_v55 = vmul.f32 %v2960_v48, %v3288_v23  ;;  %v2940_v57 = vmul.f32 %v2916_v3, %v2916_v3  ;;  %v2941_v60 = vmul.f32 %v2917_v43, %v2917_v43  ;;  %v2933_v62 = vsel %vm133_vm0, %v2917_v43, 0.0 }
 0x226   :  { %2927 = vst [vmem:[%s3600_s6 + $0x8] sm:$0xff] %v2923_v51  ;;  %v2970_v21 = vcombine.low %v2962_v47, %v2963_v52  ;;  %v2965_v58 = vmul.f32 %v2961_v53, %v3290_v24  ;;  %v2932_v59 = vadd.f32 %v2931_v56, %v2930_v54  ;;  %v2988_v61 = vmul.f32 %v2963_v52, %v2963_v52 }
 0x227   :  { %v2942_v22 = vsel %vm133_vm0, %v2938_v41, 0.0  ;;  %v2943_v63 = vsel %vm133_vm0, %v2939_v46, 0.0  ;;  %v2977_v2 = vsel %vm133_vm0, %v2962_v47, 0.0  ;;  %v2945_v24 = vsel %vm133_vm0, %v2940_v57, 0.0 }
 0x228   :  { %3131 = vst [vmem:[%s3600_s6 + $0x10] sm:$0xff] %v2970_v21  ;;  %v2971_v23 = vcombine.low %v2964_v55, %v2965_v58  ;;  %v2934_v0 = vadd.f32 %v2933_v62, %v2932_v59  ;;  %v2944_v1 = vadd.f32 %v2943_v63, %v2942_v22  ;;  %v2978_v4 = vsel %vm133_vm0, %v2963_v52, 0.0 }
 0x229   :  { %v2987_v5 = vmul.f32 %v2962_v47, %v2962_v47  ;;  %v2947_v7 = vsel %vm133_vm0, %v2941_v60, 0.0  ;;  %v2979_v8 = vadd.f32 %v2978_v4, %v2977_v2  ;;  %v2989_v9 = vmul.f32 %v2964_v55, %v2964_v55 }
 0x22a   :  { %3132 = vst [vmem:[%s3600_s6 + $0x18] sm:$0xff] %v2971_v23  ;;  %2935 = vadd.xlane.f32.xlu0 %v2934_v0  ;;  %v2946_v6 = vadd.f32 %v2945_v24, %v2944_v1  ;;  %v2980_v10 = vsel %vm133_vm0, %v2964_v55, 0.0  ;;  %v2990_v11 = vmul.f32 %v2965_v58, %v2965_v58  ;;  %v2992_v13 = vsel %vm133_vm0, %v2988_v61, 0.0 }
 0x22b   :  { %v2991_v12 = vsel %vm133_vm0, %v2987_v5, 0.0  ;;  %v2981_v15 = vadd.f32 %v2980_v10, %v2979_v8  ;;  %v2982_v17 = vsel %vm133_vm0, %v2965_v58, 0.0  ;;  %v2994_v18 = vsel %vm133_vm0, %v2989_v9, 0.0 }
 0x22c   :  { %v2948_v14 = vadd.f32 %v2947_v7, %v2946_v6  ;;  %v2993_v16 = vadd.f32 %v2992_v13, %v2991_v12  ;;  %v2996_v25 = vsel %vm133_vm0, %v2990_v11, 0.0 }
 0x22d   :  { %v2983_v19 = vadd.f32 %v2982_v17, %v2981_v15 }
 0x22e   :  { %2949 = vadd.xlane.f32.xlu1 %v2948_v14  ;;  %v2995_v20 = vadd.f32 %v2994_v18, %v2993_v16 }
 0x22f   :  { %2984 = vadd.xlane.f32.xlu0 %v2983_v19 }
 0x230   :  { %v2997_v26 = vadd.f32 %v2996_v25, %v2995_v20 }
 0x233   :  { %2998 = vadd.xlane.f32.xlu0 %v2997_v26 }
 0x2b7   :  { %v2936_v27 = vpop.xlane.xlu0 %2935 }
 0x2bb   :  { %v2950_v29 = vpop.xlane.xlu1 %2949 }
 0x2bc   :  { %v2985_v28 = vpop.xlane.xlu0 %2984 }
 0x2bd   :  { %v2986_v31 = vadd.f32 %v2985_v28, %v2936_v27 }
 0x2c0   :  { %v2999_v30 = vpop.xlane.xlu0 %2998 }
 0x2c1   :  { %v3000_v32 = vadd.f32 %v2999_v30, %v2950_v29 }
 0x2c3   :  { %v3002_v33 = vsel %vm3001_vm2, %v2986_v31, %v3000_v32 }
 0x2c4   :  { %3004 = vst.msk [vmem:[%s3601_s7] sm:$0xf] %vm3003_vm3, %v3002_v33 }

// kernel: upsample_block.3
= control target key start
LH: loop header
LB: loop body
LE: loop exit
PB: predicated region body
PF: predicated region fallthrough
CT: control target
= control target key end

     0   :  { %v7137_v1 = vmov 0.0   ;;  %s7138_s11 = smov 10   ;;  %s7139_s12 = smov 11   ;;  %v7146_v3 = vmov 0   ;;  %vm48_vm0 = vcmask 64512   ;;  %v884_v44 = vlaneseq  ;;  %s8078_s0 = inlined_call_operand.vmem [shape: f32[2,8,128], index: 0, kind: input, shape index: {}]   ;;  %s8079_s4 = inlined_call_operand.vmem [shape: f32[16,1], index: 4, kind: input, shape index: {}]   ;;  %s8080_s1 = inlined_call_operand.vmem [shape: f32[2,4,512], index: 1, kind: input, shape index: {}]   ;;  %s8081_s3 = inlined_call_operand.vmem [shape: f32[9,16,8], index: 3, kind: input, shape index: {}]   ;;  %s8082_s2 = inlined_call_operand.vmem [shape: f32[1,512], index: 2, kind: input, shape index: {}]   ;;  %s8083_s7 = inlined_call_operand.vmem [shape: f32[4,1], index: 7, kind: input, shape index: {}]   ;;  %s8084_s5 = inlined_call_operand.vmem [shape: f32[9,4,4], index: 5, kind: input, shape index: {}]   ;;  %s8085_s6 = inlined_call_operand.vmem [shape: f32[9,4,4], index: 6, kind: input, shape index: {}]   ;;  %s8086_s8 = inlined_call_operand.vmem [shape: f32[2,4,512], index: 8, kind: output, shape index: {0}]   ;;  %s8087_s9 = inlined_call_operand.vmem [shape: f32[1,4,2], index: 9, kind: output, shape index: {1}]  }
   0x1   :  { %v7200_v0 = vld [vmem:[%s8078_s0 + $0x8] sm:$0xff]  ;;  %119 = vmatprep.mubr.f32.mxu0 %v7137_v1  ;;  %3126 = vmatprep.mubr.f32.mxu1 %v7137_v1  ;;  %v7211_v2 = vld [vmem:[%s8078_s0] sm:$0xff]  ;;  %s7140_s15 = smov 9   ;;  %s7141_s16 = smov 1   ;;  %v6675_v10 = vld [vmem:[%s8081_s3 + $0x10] sm:$0xff]  ;;  %vm954_vm1 = vcmask 1043456  }
   0x2   :  { %43 = vrot.lane.b32.xlu0 %v7200_v0, %s7138_s11  ;;  %37 = vrot.lane.b32.xlu1 %v7200_v0, %s7139_s12  ;;  %s7142_s0 = smov 127   ;;  %s7143_s17 = smov 119   ;;  %v869_v4 = vld [vmem:[%s8079_s4] sm:$0xff]  ;;  %v870_v5 = vld [vmem:[%s8079_s4 + $0x8] sm:$0xff]  ;;  %v7361_v45 = vshrl.u32 %v884_v44, 7  ;;  %vm950_vm2 = vcmask 31744  }
   0x3   :  { %s7144_s18 = smov 118   ;;  %s7145_s19 = smov 117   ;;  %7132 = vset.pattern.permute.xlu1 %v7146_v3  ;;  %7131 = vset.pattern.permute.xlu0 %v7146_v3  ;;  %v7250_v6 = vld [vmem:[%s8080_s1] sm:$0xff]  ;;  %v6676_v13 = vld [vmem:[%s8081_s3 + $0x18] sm:$0xff]  ;;  %v40_v18 = vld [vmem:[%s8081_s3 + $0x8] sm:$0xff]  ;;  %vm6662_vm3 = vcmask 7168  }
   0x4   :  { %v7254_v7 = vcombine.high %v7250_v6, %v7250_v6  ;;  %v39_v15 = vld [vmem:[%s8081_s3] sm:$0xff]  ;;  %v6682_v21 = vld [vmem:[%s8081_s3 + $0x28] sm:$0xff]  ;;  %v6685_v22 = vld [vmem:[%s8081_s3 + $0x30] sm:$0xff]  ;;  %v886_v46 = vsub.s32 0, %v7361_v45  ;;  %vm6664_vm4 = vcmask 11264  }
   0x5   :  { %v6681_v19 = vld [vmem:[%s8081_s3 + $0x20] sm:$0xff]  ;;  %v6686_v24 = vld [vmem:[%s8081_s3 + $0x38] sm:$0xff]  ;;  %v6690_v28 = vld [vmem:[%s8081_s3 + $0x48] sm:$0xff] }
   0x6   :  { %41 = vrot.lane.b32.xlu0 %v7211_v2, %s7138_s11  ;;  %35 = vrot.lane.b32.xlu1 %v7211_v2, %s7139_s12  ;;  %v6689_v25 = vld [vmem:[%s8081_s3 + $0x40] sm:$0xff]  ;;  %v6693_v29 = vld [vmem:[%s8081_s3 + $0x50] sm:$0xff] }
   0x7   :  { %v6694_v32 = vld [vmem:[%s8081_s3 + $0x58] sm:$0xff]  ;;  %v6697_v33 = vld [vmem:[%s8081_s3 + $0x60] sm:$0xff]  ;;  %v6698_v36 = vld [vmem:[%s8081_s3 + $0x68] sm:$0xff] }
   0x8   :  { %v6701_v37 = vld [vmem:[%s8081_s3 + $0x70] sm:$0xff]  ;;  %v6702_v39 = vld [vmem:[%s8081_s3 + $0x78] sm:$0xff]  ;;  %v6705_v40 = vld [vmem:[%s8081_s3 + $0x80] sm:$0xff] }
   0x9   :  { %v6706_v41 = vld [vmem:[%s8081_s3 + $0x88] sm:$0xff]  ;;  %v7353_v42 = vld [vmem:[%s8080_s1 + $0x10] sm:$0xff]  ;;  %v7367_v47 = vld [vmem:[%s8082_s2] sm:$0xf] }
   0xa   :  { %217 = vrot.lane.b32.xlu0 %v7200_v0, %s7140_s15  ;;  %215 = vrot.lane.b32.xlu1 %v7211_v2, %s7140_s15  ;;  %v7357_v43 = vcombine.high %v7353_v42, %v7353_v42  ;;  %v7370_v49 = vrot.slane %v7367_v47, %v886_v46  ;;  %v7388_v61 = vld [vmem:[%s8080_s1 + $0x8] sm:$0xff] }
   0xb   :  { %v7399_v63 = vcombine.high %v7388_v61, %v7388_v61 }
   0xe   :  { %311 = vrot.lane.b32.xlu0 %v7200_v0, %s7141_s16  ;;  %309 = vrot.lane.b32.xlu1 %v7211_v2, %s7141_s16 }
  0x12   :  { %495 = vrot.lane.b32.xlu0 %v7200_v0, %s7142_s0  ;;  %493 = vrot.lane.b32.xlu1 %v7211_v2, %s7142_s0 }
  0x16   :  { %589 = vrot.lane.b32.xlu0 %v7200_v0, %s7143_s17  ;;  %587 = vrot.lane.b32.xlu1 %v7211_v2, %s7143_s17 }
  0x1a   :  { %683 = vrot.lane.b32.xlu0 %v7200_v0, %s7144_s18  ;;  %681 = vrot.lane.b32.xlu1 %v7211_v2, %s7144_s18 }
  0x1e   :  { %777 = vrot.lane.b32.xlu0 %v7200_v0, %s7145_s19  ;;  %775 = vrot.lane.b32.xlu1 %v7211_v2, %s7145_s19 }
  0x22   :  { %873 = vperm.xlu1 %7132, %v869_v4   ;;  %878 = vperm.xlu0 %7131, %v870_v5  }
  0x26   :  { %922 = vrot.lane.b32.xlu0 %v7254_v7, %s7141_s16 }
  0x2a   :  { %946 = vrot.lane.b32.xlu0 %v7357_v43, %s7141_s16 }
  0x74   :  { %v44_v8 = vpop.permute.xlu0 %43  ;;  %v38_v9 = vpop.permute.xlu1 %37 }
  0x75   :  { %55 = vmatprep.subr.mxu0 %v44_v8 }
  0x78   :  { %v42_v11 = vpop.permute.xlu0 %41  ;;  %v36_v12 = vpop.permute.xlu1 %35 }
  0x79   :  { %56 = vmatpush1.msra.mxu0 %v42_v11  ;;  %v6550_v11 = vld [vmem:[%s8083_s7] sm:$0xf] }
  0x7a   :  { %6677 = vmatmul.mubr.msk.f32.vlgmr.msra.gmra.mrb[0].mxu0 %vm48_vm0, %v6675_v10  ;;  %138 = vmatprep.subr.mxu0 %v38_v9  ;;  %v6613_v10 = vld [vmem:[%s8083_s7] sm:$0xf] }
  0x7b   :  { %139 = vmatpush1.msra.mxu0 %v36_v12  ;;  %125 = vmatprep.mubr.f32.mxu0 %v7137_v1 }
  0x7c   :  { %v218_v14 = vpop.permute.xlu0 %217  ;;  %v216_v16 = vpop.permute.xlu1 %215 }
  0x7d   :  { %228 = vmatprep.subr.mxu0 %v218_v14 }
  0x7e   :  { %6678 = vmatmul.mubr.msk.f32.gmra.mrb[2].mxu0 %vm48_vm0, %v6676_v13 }
  0x7f   :  { %202 = vmatprep.mubr.f32.mxu0 %v7137_v1 }
  0x80   :  { %v312_v17 = vpop.permute.xlu0 %311  ;;  %v310_v20 = vpop.permute.xlu1 %309 }
  0x82   :  { %6679 = vmatmul.mubr.msk.f32.vlgmr.msra.gmra.mrb[0].mxu0 %vm48_vm0, %v39_v15 }
  0x83   :  { %229 = vmatpush1.msra.mxu0 %v216_v16  ;;  %208 = vmatprep.mubr.f32.mxu0 %v7137_v1  ;;  %v7523_v16 = vld [vmem:[%s8084_s5 + $0xc] sm:$0xf] }
  0x84   :  { %322 = vmatprep.subr.mxu0 %v312_v17  ;;  %v496_v23 = vpop.permute.xlu0 %495  ;;  %v494_v26 = vpop.permute.xlu1 %493 }
  0x86   :  { %6680 = vmatmul.mubr.msk.f32.gmra.mrb[2].mxu0 %vm48_vm0, %v40_v18 }
  0x87   :  { %292 = vmatprep.mubr.f32.mxu0 %v7137_v1 }
  0x88   :  { %v590_v27 = vpop.permute.xlu0 %589  ;;  %v588_v30 = vpop.permute.xlu1 %587 }
  0x8a   :  { %6683 = vmatmul.mubr.msk.f32.vlgmr.msra.gmra.mrb[0].mxu0 %vm48_vm0, %v6681_v19  ;;  %v6800_v19 = vld [vmem:[%s8085_s6 + $0xc] sm:$0xf] }
  0x8b   :  { %323 = vmatpush1.msra.mxu0 %v310_v20  ;;  %298 = vmatprep.mubr.f32.mxu0 %v7137_v1 }
  0x8c   :  { %412 = vmatprep.subr.mxu0 %v7200_v0  ;;  %v684_v31 = vpop.permute.xlu0 %683  ;;  %v682_v34 = vpop.permute.xlu1 %681  ;;  %v7406_v0 = vld [vmem:[%s8080_s1 + $0x18] sm:$0xff] }
  0x8e   :  { %6684 = vmatmul.mubr.msk.f32.gmra.mrb[2].mxu0 %vm48_vm0, %v6682_v21 }
  0x8f   :  { %386 = vmatprep.mubr.f32.mxu0 %v7137_v1 }
  0x90   :  { %v778_v35 = vpop.permute.xlu0 %777  ;;  %v776_v38 = vpop.permute.xlu1 %775 }
  0x92   :  { %6687 = vmatmul.mubr.msk.f32.vlgmr.msra.gmra.mrb[0].mxu0 %vm48_vm0, %v6685_v22 }
  0x93   :  { %413 = vmatpush1.msra.mxu0 %v7211_v2  ;;  %392 = vmatprep.mubr.f32.mxu0 %v7137_v1  ;;  %v7412_v2 = vcombine.high %v7406_v0, %v7406_v0 }
  0x94   :  { %506 = vmatprep.subr.mxu0 %v496_v23 }
  0x96   :  { %6688 = vmatmul.mubr.msk.f32.gmra.mrb[2].mxu0 %vm48_vm0, %v6686_v24 }
  0x97   :  { %476 = vmatprep.mubr.f32.mxu0 %v7137_v1 }
  0x9a   :  { %6691 = vmatmul.mubr.msk.f32.vlgmr.msra.gmra.mrb[0].mxu0 %vm48_vm0, %v6689_v25 }
  0x9b   :  { %507 = vmatpush1.msra.mxu0 %v494_v26  ;;  %482 = vmatprep.mubr.f32.mxu0 %v7137_v1 }
  0x9c   :  { %600 = vmatprep.subr.mxu0 %v590_v27 }
  0x9e   :  { %6692 = vmatmul.mubr.msk.f32.gmra.mrb[2].mxu0 %vm48_vm0, %v6690_v28  ;;  %v6813_v28 = vld [vmem:[%s8084_s5 + $0x10] sm:$0xf] }
  0x9f   :  { %570 = vmatprep.mubr.f32.mxu0 %v7137_v1 }
  0xa1   :  { %v874_v48 = vpop.permute.xlu1 %873  ;;  %v879_v55 = vpop.permute.xlu0 %878 }
  0xa2   :  { %6695 = vmatmul.mubr.msk.f32.vlgmr.msra.gmra.mrb[0].mxu0 %vm48_vm0, %v6693_v29 }
  0xa3   :  { %601 = vmatpush1.msra.mxu0 %v588_v30  ;;  %576 = vmatprep.mubr.f32.mxu0 %v7137_v1  ;;  %v949_v30 = vld [vmem:[%s8085_s6] sm:$0xf] }
  0xa4   :  { %694 = vmatprep.subr.mxu0 %v684_v31 }
  0xa5   :  { %v923_v12 = vpop.permute.xlu0 %922 }
  0xa6   :  { %6696 = vmatmul.mubr.msk.f32.gmra.mrb[2].mxu0 %vm48_vm0, %v6694_v32 }
  0xa7   :  { %664 = vmatprep.mubr.f32.mxu0 %v7137_v1 }
  0xa9   :  { %v7514_v13 = vpop.permute.xlu0 %946 }
  0xaa   :  { %6699 = vmatmul.mubr.msk.f32.vlgmr.msra.gmra.mrb[0].mxu0 %vm48_vm0, %v6697_v33 }
  0xab   :  { %695 = vmatpush1.msra.mxu0 %v682_v34  ;;  %670 = vmatprep.mubr.f32.mxu0 %v7137_v1 }
  0xac   :  { %788 = vmatprep.subr.mxu0 %v778_v35 }
  0xae   :  { %6700 = vmatmul.mubr.msk.f32.gmra.mrb[2].mxu0 %vm48_vm0, %v6698_v36  ;;  %v6826_v36 = vld [vmem:[%s8085_s6 + $0x10] sm:$0xf] }
  0xaf   :  { %758 = vmatprep.mubr.f32.mxu0 %v7137_v1 }
  0xb2   :  { %6703 = vmatmul.mubr.msk.f32.vlgmr.msra.gmra.mrb[0].mxu0 %vm48_vm0, %v6701_v37 }
  0xb3   :  { %789 = vmatpush1.msra.mxu0 %v776_v38  ;;  %764 = vmatprep.mubr.f32.mxu0 %v7137_v1 }
  0xb6   :  { %6704 = vmatmul.mubr.msk.f32.gmra.mrb[2].mxu0 %vm48_vm0, %v6702_v39  ;;  %v948_v39 = vld [vmem:[%s8084_s5] sm:$0xf] }
  0xb7   :  { %852 = vmatprep.mubr.f32.mxu0 %v7137_v1 }
  0xba   :  { %6707 = vmatmul.mubr.msk.f32.vlgmr.msra.gmra.mrb[0].mxu0 %vm48_vm0, %v6705_v40 }
  0xbb   :  { %858 = vmatprep.mubr.f32.mxu0 %v7137_v1 }
  0xbe   :  { %6708 = vmatmul.mubr.msk.f32.gmra.mrb[2].mxu0 %vm48_vm0, %v6706_v41 }
  0xbf   :  { %1041 = vmatprep.mubr.f32.mxu0 %v7137_v1 }
 0x18d   :  { %v854_v50 = vpop.f32.mrb[0].mxu0 }
 0x18e   :  { %v881_v51 = vadd.f32 %v874_v48, %v854_v50  ;;  %v856_v52 = vpop.f32.mrb[1].mxu0  ;;  %v6839_v50 = vld [vmem:[%s8084_s5 + $0x14] sm:$0xf] }
 0x18f   :  { %v893_v54 = vadd.f32 %v874_v48, %v856_v52 }
 0x190   :  { %v7373_v53 = vmul.f32 %v7370_v49, %v881_v51 }
 0x191   :  { %v860_v56 = vpop.f32.mrb[2].mxu0  ;;  %v7378_v59 = vmul.f32 %v893_v54, %v7370_v49 }
 0x192   :  { %2196 = vrot.lane.b32.xlu0 %v7373_v53, %s7142_s0  ;;  %v862_v57 = vpop.f32.mrb[3].mxu0  ;;  %v882_v3 = vadd.f32 %v879_v55, %v860_v56  ;;  %v7439_v8 = vrot.slane %v7373_v53, 4 }
 0x193   :  { %v894_v58 = vadd.f32 %v879_v55, %v862_v57  ;;  %v7454_v9 = vrot.slane %v7378_v59, 4  ;;  %v6735_v55 = vld [vmem:[%s8084_s5 + $0x4] sm:$0xf] }
 0x194   :  { %v7421_v4 = vmul.f32 %v7370_v49, %v882_v3 }
 0x195   :  { %v7381_v60 = vmul.f32 %v894_v58, %v7370_v49 }
 0x196   :  { %2204 = vrot.lane.b32.xlu0 %v7378_v59, %s7142_s0  ;;  %v7432_v5 = vrot.slane %v7421_v4, 4 }
 0x197   :  { %6797 = vmatprep.subr.msk.mxu1 %vm954_vm1, %v7381_v60  ;;  %v7393_v62 = vrot.slane %v7381_v60, 4 }
 0x199   :  { %2830 = vrot.lane.b32.xlu1 %v7393_v62, %s7141_s16 }
 0x19a   :  { %2198 = vrot.lane.b32.xlu0 %v7250_v6, %s7142_s0 }
 0x19d   :  { %2828 = vrot.lane.b32.xlu1 %v7399_v63, %s7141_s16 }
 0x19e   :  { %908 = vrot.lane.b32.xlu0 %v7399_v63, %s7139_s12 }
 0x1a1   :  { %2832 = vrot.lane.b32.xlu1 %v7412_v2, %s7141_s16 }
 0x1a2   :  { %2206 = vrot.lane.b32.xlu0 %v7353_v42, %s7142_s0 }
 0x1a5   :  { %4050 = vrot.lane.b32.xlu1 %v7421_v4, %s7142_s0 }
 0x1a6   :  { %932 = vrot.lane.b32.xlu0 %v7412_v2, %s7139_s12 }
 0x1a9   :  { %4054 = vrot.lane.b32.xlu1 %v7381_v60, %s7142_s0 }
 0x1aa   :  { %910 = vrot.lane.b32.xlu0 %v7421_v4, %s7138_s11 }
 0x1ad   :  { %912 = vrot.lane.b32.xlu1 %v7388_v61, %s7138_s11 }
 0x1ae   :  { %903 = vrot.lane.b32.xlu0 %v7432_v5, %s7139_s12 }
 0x1b1   :  { %4052 = vrot.lane.b32.xlu1 %v7388_v61, %s7142_s0 }
 0x1b2   :  { %4676 = vrot.lane.b32.xlu0 %v7439_v8, %s7143_s17 }
 0x1b5   :  { %936 = vrot.lane.b32.xlu1 %v7406_v0, %s7138_s11 }
 0x1b6   :  { %934 = vrot.lane.b32.xlu0 %v7381_v60, %s7138_s11 }
 0x1b9   :  { %4056 = vrot.lane.b32.xlu1 %v7406_v0, %s7142_s0 }
 0x1ba   :  { %4688 = vrot.lane.b32.xlu0 %v7378_v59, %s7144_s18 }
 0x1bd   :  { %2826 = vrot.lane.b32.xlu1 %v7432_v5, %s7141_s16 }
 0x1be   :  { %941 = vrot.lane.b32.xlu0 %v7454_v9, %s7141_s16 }
 0x1c1   :  { %4680 = vrot.lane.b32.xlu1 %v7373_v53, %s7144_s18 }
 0x1c2   :  { %4682 = vrot.lane.b32.xlu0 %v7250_v6, %s7144_s18 }
 0x1c5   :  { %917 = vrot.lane.b32.xlu1 %v7439_v8, %s7141_s16 }
 0x1c6   :  { %1574 = vrot.lane.b32.xlu0 %v7393_v62, %s7138_s11 }
 0x1c9   :  { %927 = vrot.lane.b32.xlu1 %v7393_v62, %s7139_s12 }
 0x1ca   :  { %4686 = vrot.lane.b32.xlu0 %v7357_v43, %s7143_s17 }
 0x1cd   :  { %4684 = vrot.lane.b32.xlu1 %v7454_v9, %s7143_s17 }
 0x1ce   :  { %5310 = vrot.lane.b32.xlu0 %v7439_v8, %s7144_s18 }
 0x1d1   :  { %1570 = vrot.lane.b32.xlu1 %v7432_v5, %s7138_s11 }
 0x1d2   :  { %5314 = vrot.lane.b32.xlu0 %v7454_v9, %s7144_s18 }
 0x1d5   :  { %4678 = vrot.lane.b32.xlu1 %v7254_v7, %s7143_s17 }
 0x1d6   :  { %5312 = vrot.lane.b32.xlu0 %v7254_v7, %s7144_s18 }
 0x1d9   :  { %4690 = vrot.lane.b32.xlu1 %v7353_v42, %s7144_s18 }
 0x1da   :  { %5316 = vrot.lane.b32.xlu0 %v7357_v43, %s7144_s18 }
 0x1dd   :  { %1572 = vrot.lane.b32.xlu1 %v7399_v63, %s7138_s11 }
 0x1de   :  { %5924 = vrot.lane.b32.xlu0 %v7373_v53, %s7145_s19 }
 0x1e1   :  { %1576 = vrot.lane.b32.xlu1 %v7412_v2, %s7138_s11 }
 0x1e2   :  { %5928 = vrot.lane.b32.xlu0 %v7378_v59, %s7145_s19 }
 0x1e5   :  { %2192 = vrot.lane.b32.xlu1 %v7421_v4, %s7140_s15 }
 0x1e6   :  { %5930 = vrot.lane.b32.xlu0 %v7353_v42, %s7145_s19 }
 0x1e9   :  { %2200 = vrot.lane.b32.xlu1 %v7381_v60, %s7140_s15 }
 0x1ea   :  { %6616 = vperm.xlu0 %7131, %v6613_v10   ;;  %v6856_v10 = vld [vmem:[%s8085_s6 + $0x14] sm:$0xf] }
 0x1ed   :  { %2194 = vrot.lane.b32.xlu1 %v7388_v61, %s7140_s15 }
 0x1f1   :  { %2202 = vrot.lane.b32.xlu1 %v7406_v0, %s7140_s15 }
 0x1f5   :  { %5926 = vrot.lane.b32.xlu1 %v7250_v6, %s7145_s19 }
 0x1f9   :  { %6553 = vperm.xlu1 %7132, %v6550_v11   ;;  %v6748_v11 = vld [vmem:[%s8085_s6 + $0x4] sm:$0xf] }
 0x204   :  { %v7516_v14 = vpop.permute.xlu0 %2196 }
 0x208   :  { %v7518_v15 = vpop.permute.xlu0 %2204 }
 0x20b   :  { %v7525_v17 = vpop.permute.xlu1 %2830 }
 0x20c   :  { %6798 = vmatpush1.msk.msra.mxu1 %vm954_vm1, %v7525_v17  ;;  %v7529_v18 = vpop.permute.xlu0 %2198 }
 0x20d   :  { %6799 = vmatmul.mubr.msk.f32.vlgmr.msra.gmra.mrb[0].mxu1 %vm950_vm2, %v7523_v16  ;;  %6801 = vmatprep.subr.msk.mxu1 %vm954_vm1, %v7250_v6 }
 0x20e   :  { %6802 = vmatpush1.msk.msra.mxu1 %vm954_vm1, %v923_v12  ;;  %3220 = vmatprep.mubr.f32.mxu1 %v7137_v1 }
 0x20f   :  { %v7540_v20 = vpop.permute.xlu1 %2828  ;;  %6804 = vmatprep.subr.msk.mxu1 %vm954_vm1, %v7388_v61 }
 0x210   :  { %v909_v21 = vpop.permute.xlu0 %908 }
 0x211   :  { %6803 = vmatmul.mubr.msk.f32.vlgmr.msra.gmra.mrb[2].mxu1 %vm950_vm2, %v6800_v19 }
 0x212   :  { %6805 = vmatpush1.msk.msra.mxu1 %vm954_vm1, %v7540_v20  ;;  %3291 = vmatprep.mubr.f32.mxu1 %v7137_v1 }
 0x213   :  { %v7548_v22 = vpop.permute.xlu1 %2832  ;;  %6807 = vmatprep.subr.msk.mxu1 %vm954_vm1, %v7353_v42 }
 0x214   :  { %v7552_v23 = vpop.permute.xlu0 %2206 }
 0x215   :  { %6806 = vmatmul.mubr.msk.f32.vlgmr.msra.gmra.mrb[4].mxu1 %vm950_vm2, %v6800_v19 }
 0x216   :  { %6808 = vmatpush1.msk.msra.mxu1 %vm954_vm1, %v7514_v13  ;;  %3362 = vmatprep.mubr.f32.mxu1 %v7137_v1 }
 0x217   :  { %v7558_v24 = vpop.permute.xlu1 %4050  ;;  %6810 = vmatprep.subr.msk.mxu1 %vm954_vm1, %v7406_v0 }
 0x218   :  { %v933_v25 = vpop.permute.xlu0 %932 }
 0x219   :  { %6809 = vmatmul.mubr.msk.f32.vlgmr.msra.gmra.mrb[6].mxu1 %vm950_vm2, %v6800_v19 }
 0x21a   :  { %6811 = vmatpush1.msk.msra.mxu1 %vm954_vm1, %v7548_v22  ;;  %3433 = vmatprep.mubr.f32.mxu1 %v7137_v1 }
 0x21b   :  { %6814 = vmatprep.subr.msk.mxu1 %vm954_vm1, %v7439_v8  ;;  %v7568_v26 = vpop.permute.xlu1 %4054 }
 0x21c   :  { %v7571_v27 = vpop.permute.xlu0 %910 }
 0x21d   :  { %6812 = vmatmul.mubr.msk.f32.vlgmr.msra.gmra.mrb[0].mxu1 %vm950_vm2, %v6800_v19 }
 0x21e   :  { %6815 = vmatpush1.msk.msra.mxu1 %vm954_vm1, %v7373_v53  ;;  %3521 = vmatprep.mubr.f32.mxu1 %v7137_v1 }
 0x21f   :  { %6817 = vmatprep.subr.msk.mxu1 %vm954_vm1, %v7432_v5  ;;  %v7581_v29 = vpop.permute.xlu1 %912 }
 0x220   :  { %6711 = vmatprep.subr.msk.mxu0 %vm954_vm1, %v7581_v29  ;;  %v904_v32 = vpop.permute.xlu0 %903 }
 0x221   :  { %6712 = vmatpush1.msk.msra.mxu0 %vm954_vm1, %v909_v21  ;;  %6816 = vmatmul.mubr.msk.f32.vlgmr.msra.gmra.mrb[2].mxu1 %vm950_vm2, %v6813_v28 }
 0x222   :  { %6818 = vmatpush1.msk.msra.mxu1 %vm954_vm1, %v7421_v4  ;;  %6713 = vmatmul.mubr.msk.f32.vlgmr.msra.gmra.mrb[4].mxu0 %vm950_vm2, %v949_v30 }
 0x223   :  { %6714 = vmatprep.subr.msk.mxu0 %vm954_vm1, %v7250_v6  ;;  %6820 = vmatprep.subr.msk.mxu1 %vm954_vm1, %v7454_v9  ;;  %v7597_v31 = vpop.permute.xlu1 %4052 }
 0x224   :  { %6715 = vmatpush1.msk.msra.mxu0 %vm954_vm1, %v923_v12  ;;  %3592 = vmatprep.mubr.f32.mxu1 %v7137_v1  ;;  %v7616_v34 = vpop.permute.xlu0 %4676 }
 0x225   :  { %1112 = vmatprep.mubr.f32.mxu0 %v7137_v1  ;;  %6819 = vmatmul.mubr.msk.f32.vlgmr.msra.gmra.mrb[4].mxu1 %vm950_vm2, %v6813_v28 }
 0x226   :  { %6821 = vmatpush1.msk.msra.mxu1 %vm954_vm1, %v7378_v59  ;;  %6716 = vmatmul.mubr.msk.f32.vlgmr.msra.gmra.mrb[6].mxu0 %vm950_vm2, %v949_v30 }
 0x227   :  { %6823 = vmatprep.subr.msk.mxu1 %vm954_vm1, %v7393_v62  ;;  %v7608_v33 = vpop.permute.xlu1 %936  ;;  %3663 = vmatprep.mubr.f32.mxu1 %v7137_v1 }
 0x228   :  { %6717 = vmatprep.subr.msk.mxu0 %vm954_vm1, %v7608_v33  ;;  %1183 = vmatprep.mubr.f32.mxu0 %v7137_v1  ;;  %v7643_v38 = vpop.permute.xlu0 %934 }
 0x229   :  { %6718 = vmatpush1.msk.msra.mxu0 %vm954_vm1, %v933_v25  ;;  %6822 = vmatmul.mubr.msk.f32.vlgmr.msra.gmra.mrb[6].mxu1 %vm950_vm2, %v6813_v28 }
 0x22a   :  { %6824 = vmatpush1.msk.msra.mxu1 %vm954_vm1, %v7381_v60  ;;  %6719 = vmatmul.mubr.msk.f32.vlgmr.msra.gmra.mrb[8].mxu0 %vm950_vm2, %v949_v30 }
 0x22b   :  { %6720 = vmatprep.subr.msk.mxu0 %vm954_vm1, %v7353_v42  ;;  %v7623_v35 = vpop.permute.xlu1 %4056  ;;  %3734 = vmatprep.mubr.f32.mxu1 %v7137_v1 }
 0x22c   :  { %6721 = vmatpush1.msk.msra.mxu0 %vm954_vm1, %v7514_v13  ;;  %1254 = vmatprep.mubr.f32.mxu0 %v7137_v1  ;;  %v7665_v41 = vpop.permute.xlu0 %4688  ;;  %v6869_v13 = vld [vmem:[%s8084_s5 + $0x18] sm:$0xf] }
 0x22d   :  { %6723 = vmatprep.subr.msk.mxu0 %vm954_vm1, %v7571_v27  ;;  %6825 = vmatmul.mubr.msk.f32.vlgmr.msra.gmra.mrb[0].mxu1 %vm950_vm2, %v6813_v28 }
 0x22e   :  { %6827 = vmatprep.subr.msk.mxu1 %vm954_vm1, %v7254_v7  ;;  %6722 = vmatmul.mubr.msk.f32.vlgmr.msra.gmra.mrb[10].mxu0 %vm950_vm2, %v949_v30  ;;  %v6566_v30 = vsub.s32 2, %v7361_v45 }
 0x22f   :  { %6724 = vmatpush1.msk.msra.mxu0 %vm954_vm1, %v904_v32  ;;  %6828 = vmatpush1.msk.msra.mxu1 %vm954_vm1, %v7250_v6  ;;  %v7641_v37 = vpop.permute.xlu1 %2826 }
 0x230   :  { %6726 = vmatprep.subr.msk.mxu0 %vm954_vm1, %v7373_v53  ;;  %3822 = vmatprep.mubr.f32.mxu1 %v7137_v1  ;;  %v7685_v48 = vpop.permute.xlu0 %941 }
 0x231   :  { %6829 = vmatmul.mubr.msk.f32.vlgmr.msra.gmra.mrb[2].mxu1 %vm950_vm2, %v6826_v36  ;;  %6830 = vmatprep.subr.msk.mxu1 %vm954_vm1, %v7399_v63 }
 0x232   :  { %6831 = vmatpush1.msk.msra.mxu1 %vm954_vm1, %v7388_v61  ;;  %3893 = vmatprep.mubr.f32.mxu1 %v7137_v1 }
 0x233   :  { %v7657_v40 = vpop.permute.xlu1 %4680  ;;  %1350 = vmatprep.mubr.f32.mxu0 %v7137_v1  ;;  %6833 = vmatprep.subr.msk.mxu1 %vm954_vm1, %v7357_v43 }
 0x234   :  { %6725 = vmatmul.mubr.msk.f32.vlgmr.msra.gmra.mrb[4].mxu0 %vm950_vm2, %v948_v39  ;;  %v7707_v52 = vpop.permute.xlu0 %4682 }
 0x235   :  { %6832 = vmatmul.mubr.msk.f32.vlgmr.msra.gmra.mrb[4].mxu1 %vm950_vm2, %v6826_v36  ;;  %1421 = vmatprep.mubr.f32.mxu0 %v7137_v1 }
 0x236   :  { %6834 = vmatpush1.msk.msra.mxu1 %vm954_vm1, %v7353_v42  ;;  %3964 = vmatprep.mubr.f32.mxu1 %v7137_v1 }
 0x237   :  { %v7670_v44 = vpop.permute.xlu1 %917  ;;  %6836 = vmatprep.subr.msk.mxu1 %vm954_vm1, %v7412_v2 }
 0x238   :  { %6727 = vmatpush1.msk.msra.mxu0 %vm954_vm1, %v7670_v44  ;;  %v7735_v57 = vpop.permute.xlu0 %1574 }
 0x239   :  { %6729 = vmatprep.subr.msk.mxu0 %vm954_vm1, %v7643_v38  ;;  %6835 = vmatmul.mubr.msk.f32.vlgmr.msra.gmra.mrb[6].mxu1 %vm950_vm2, %v6826_v36 }
 0x23a   :  { %6837 = vmatpush1.msk.msra.mxu1 %vm954_vm1, %v7406_v0  ;;  %6728 = vmatmul.mubr.msk.f32.vlgmr.msra.gmra.mrb[6].mxu0 %vm950_vm2, %v948_v39 }
 0x23b   :  { %6844 = vmatprep.subr.msk.mxu1 %vm954_vm1, %v7516_v14  ;;  %v928_v46 = vpop.permute.xlu1 %927  ;;  %4035 = vmatprep.mubr.f32.mxu1 %v7137_v1 }
 0x23c   :  { %6730 = vmatpush1.msk.msra.mxu0 %vm954_vm1, %v928_v46  ;;  %1492 = vmatprep.mubr.f32.mxu0 %v7137_v1 }
 0x23d   :  { %6732 = vmatprep.subr.msk.mxu0 %vm954_vm1, %v7378_v59  ;;  %6838 = vmatmul.mubr.msk.f32.vlgmr.msra.gmra.mrb[0].mxu1 %vm950_vm2, %v6826_v36 }
 0x23e   :  { %6845 = vmatpush1.msk.msra.mxu1 %vm954_vm1, %v7439_v8  ;;  %6731 = vmatmul.mubr.msk.f32.vlgmr.msra.gmra.mrb[8].mxu0 %vm950_vm2, %v948_v39 }
 0x23f   :  { %6733 = vmatpush1.msk.msra.mxu0 %vm954_vm1, %v7685_v48  ;;  %6847 = vmatprep.subr.msk.mxu1 %vm954_vm1, %v7558_v24  ;;  %v7702_v51 = vpop.permute.xlu1 %4684 }
 0x240   :  { %4145 = vmatprep.mubr.f32.mxu1 %v7137_v1  ;;  %1563 = vmatprep.mubr.f32.mxu0 %v7137_v1 }
 0x241   :  { %6846 = vmatmul.mubr.msk.f32.vlgmr.msra.gmra.mrb[2].mxu1 %vm950_vm2, %v6839_v50 }
 0x242   :  { %6848 = vmatpush1.msk.msra.mxu1 %vm954_vm1, %v7432_v5  ;;  %6734 = vmatmul.mubr.msk.f32.vlgmr.msra.gmra.mrb[10].mxu0 %vm950_vm2, %v948_v39  ;;  %v6567_v39 = vrot.slane %v7367_v47, %v6566_v30 }
 0x243   :  { %6850 = vmatprep.subr.msk.mxu1 %vm954_vm1, %v7518_v15  ;;  %v7714_v54 = vpop.permute.xlu1 %1570  ;;  %4216 = vmatprep.mubr.f32.mxu1 %v7137_v1 }
 0x244   :  { %6736 = vmatprep.subr.msk.mxu0 %vm954_vm1, %v7714_v54  ;;  %1657 = vmatprep.mubr.f32.mxu0 %v7137_v1 }
 0x245   :  { %6737 = vmatpush1.msk.msra.mxu0 %vm954_vm1, %v7571_v27  ;;  %6849 = vmatmul.mubr.msk.f32.vlgmr.msra.gmra.mrb[4].mxu1 %vm950_vm2, %v6839_v50 }
 0x246   :  { %6851 = vmatpush1.msk.msra.mxu1 %vm954_vm1, %v7454_v9  ;;  %6738 = vmatmul.mubr.msk.f32.vlgmr.msra.gmra.mrb[4].mxu0 %vm950_vm2, %v6735_v55 }
 0x247   :  { %6739 = vmatprep.subr.msk.mxu0 %vm954_vm1, %v7439_v8  ;;  %6853 = vmatprep.subr.msk.mxu1 %vm954_vm1, %v7568_v26  ;;  %v7733_v56 = vpop.permute.xlu1 %4678 }
 0x248   :  { %6740 = vmatpush1.msk.msra.mxu0 %vm954_vm1, %v7373_v53  ;;  %4287 = vmatprep.mubr.f32.mxu1 %v7137_v1 }
 0x249   :  { %6742 = vmatprep.subr.msk.mxu0 %vm954_vm1, %v7735_v57  ;;  %1728 = vmatprep.mubr.f32.mxu0 %v7137_v1 }
 0x24a   :  { %6852 = vmatmul.mubr.msk.f32.vlgmr.msra.gmra.mrb[6].mxu1 %vm950_vm2, %v6839_v50  ;;  %6741 = vmatmul.mubr.msk.f32.vlgmr.msra.gmra.mrb[6].mxu0 %vm950_vm2, %v6735_v55 }
 0x24b   :  { %6854 = vmatpush1.msk.msra.mxu1 %vm954_vm1, %v7393_v62  ;;  %6743 = vmatpush1.msk.msra.mxu0 %vm954_vm1, %v7643_v38  ;;  %v7749_v58 = vpop.permute.xlu1 %4690 }
 0x24c   :  { %6857 = vmatprep.subr.msk.mxu1 %vm954_vm1, %v7529_v18  ;;  %6745 = vmatprep.subr.msk.mxu0 %vm954_vm1, %v7454_v9 }
 0x24d   :  { %4358 = vmatprep.mubr.f32.mxu1 %v7137_v1  ;;  %1799 = vmatprep.mubr.f32.mxu0 %v7137_v1 }
 0x24e   :  { %6855 = vmatmul.mubr.msk.f32.vlgmr.msra.gmra.mrb[0].mxu1 %vm950_vm2, %v6839_v50  ;;  %6744 = vmatmul.mubr.msk.f32.vlgmr.msra.gmra.mrb[8].mxu0 %vm950_vm2, %v6735_v55 }
 0x24f   :  { %6858 = vmatpush1.msk.msra.mxu1 %vm954_vm1, %v7254_v7  ;;  %6746 = vmatpush1.msk.msra.mxu0 %vm954_vm1, %v7378_v59  ;;  %v7763_v3 = vpop.permute.xlu1 %1572 }
 0x250   :  { %6860 = vmatprep.subr.msk.mxu1 %vm954_vm1, %v7597_v31  ;;  %4448 = vmatprep.mubr.f32.mxu1 %v7137_v1 }
 0x251   :  { %1870 = vmatprep.mubr.f32.mxu0 %v7137_v1  ;;  %6749 = vmatprep.subr.msk.mxu0 %vm954_vm1, %v7763_v3 }
 0x252   :  { %6859 = vmatmul.mubr.msk.f32.vlgmr.msra.gmra.mrb[2].mxu1 %vm950_vm2, %v6856_v10  ;;  %6747 = vmatmul.mubr.msk.f32.vlgmr.msra.gmra.mrb[10].mxu0 %vm950_vm2, %v6735_v55 }
 0x253   :  { %6861 = vmatpush1.msk.msra.mxu1 %vm954_vm1, %v7399_v63  ;;  %6750 = vmatpush1.msk.msra.mxu0 %vm954_vm1, %v7581_v29  ;;  %v7795_v12 = vpop.permute.xlu1 %1576 }
 0x254   :  { %6863 = vmatprep.subr.msk.mxu1 %vm954_vm1, %v7552_v23  ;;  %4519 = vmatprep.mubr.f32.mxu1 %v7137_v1 }
 0x255   :  { %1964 = vmatprep.mubr.f32.mxu0 %v7137_v1  ;;  %6752 = vmatprep.subr.msk.mxu0 %vm954_vm1, %v7254_v7 }
 0x256   :  { %6862 = vmatmul.mubr.msk.f32.vlgmr.msra.gmra.mrb[4].mxu1 %vm950_vm2, %v6856_v10  ;;  %6751 = vmatmul.mubr.msk.f32.vlgmr.msra.gmra.mrb[4].mxu0 %vm950_vm2, %v6748_v11 }
 0x257   :  { %6864 = vmatpush1.msk.msra.mxu1 %vm954_vm1, %v7357_v43  ;;  %6753 = vmatpush1.msk.msra.mxu0 %vm954_vm1, %v7250_v6  ;;  %v2193_v6 = vpop.permute.xlu1 %2192 }
 0x258   :  { %6866 = vmatprep.subr.msk.mxu1 %vm954_vm1, %v7623_v35  ;;  %4590 = vmatprep.mubr.f32.mxu1 %v7137_v1 }
 0x259   :  { %2035 = vmatprep.mubr.f32.mxu0 %v7137_v1  ;;  %6755 = vmatprep.subr.msk.mxu0 %vm954_vm1, %v7795_v12 }
 0x25a   :  { %6865 = vmatmul.mubr.msk.f32.vlgmr.msra.gmra.mrb[6].mxu1 %vm950_vm2, %v6856_v10  ;;  %6754 = vmatmul.mubr.msk.f32.vlgmr.msra.gmra.mrb[6].mxu0 %vm950_vm2, %v6748_v11 }
 0x25b   :  { %6867 = vmatpush1.msk.msra.mxu1 %vm954_vm1, %v7412_v2  ;;  %6756 = vmatpush1.msk.msra.mxu0 %vm954_vm1, %v7608_v33  ;;  %v2201_v19 = vpop.permute.xlu1 %2200  ;;  %v6570_v33 = vsub.s32 3, %v7361_v45 }
 0x25c   :  { %6870 = vmatprep.subr.msk.mxu1 %vm954_vm1, %v7421_v4  ;;  %4661 = vmatprep.mubr.f32.mxu1 %v7137_v1 }
 0x25d   :  { %2106 = vmatprep.mubr.f32.mxu0 %v7137_v1  ;;  %6758 = vmatprep.subr.msk.mxu0 %vm954_vm1, %v7357_v43  ;;  %v6571_v46 = vrot.slane %v7367_v47, %v6570_v33 }
 0x25e   :  { %6868 = vmatmul.mubr.msk.f32.vlgmr.msra.gmra.mrb[0].mxu1 %vm950_vm2, %v6856_v10  ;;  %6757 = vmatmul.mubr.msk.f32.vlgmr.msra.gmra.mrb[8].mxu0 %vm950_vm2, %v6748_v11 }
 0x25f   :  { %6871 = vmatpush1.msk.msra.mxu1 %vm954_vm1, %v7641_v37  ;;  %6759 = vmatpush1.msk.msra.mxu0 %vm954_vm1, %v7353_v42  ;;  %v6761_v42 = vld [vmem:[%s8084_s5 + $0x8] sm:$0xf] }
 0x260   :  { %6873 = vmatprep.subr.msk.mxu1 %vm954_vm1, %v7657_v40  ;;  %6762 = vmatprep.subr.msk.mxu0 %vm954_vm1, %v2193_v6 }
 0x261   :  { %4773 = vmatprep.mubr.f32.mxu1 %v7137_v1  ;;  %2177 = vmatprep.mubr.f32.mxu0 %v7137_v1 }
 0x262   :  { %6872 = vmatmul.mubr.msk.f32.vlgmr.msra.gmra.mrb[2].mxu1 %vm950_vm2, %v6869_v13  ;;  %6760 = vmatmul.mubr.msk.f32.vlgmr.msra.gmra.mrb[10].mxu0 %vm950_vm2, %v6748_v11 }
 0x263   :  { %6874 = vmatpush1.msk.msra.mxu1 %vm954_vm1, %v7616_v34  ;;  %6763 = vmatpush1.msk.msra.mxu0 %vm954_vm1, %v7714_v54 }
 0x264   :  { %6876 = vmatprep.subr.msk.mxu1 %vm954_vm1, %v7381_v60  ;;  %6765 = vmatprep.subr.msk.mxu0 %vm954_vm1, %v7516_v14  ;;  %v2195_v14 = vpop.permute.xlu1 %2194 }
 0x265   :  { %4844 = vmatprep.mubr.f32.mxu1 %v7137_v1  ;;  %2289 = vmatprep.mubr.f32.mxu0 %v7137_v1 }
 0x266   :  { %6875 = vmatmul.mubr.msk.f32.vlgmr.msra.gmra.mrb[4].mxu1 %vm950_vm2, %v6869_v13  ;;  %6764 = vmatmul.mubr.msk.f32.vlgmr.msra.gmra.mrb[4].mxu0 %vm950_vm2, %v6761_v42 }
 0x267   :  { %6877 = vmatpush1.msk.msra.mxu1 %vm954_vm1, %v7525_v17  ;;  %6766 = vmatpush1.msk.msra.mxu0 %vm954_vm1, %v7439_v8  ;;  %v6882_v8 = vld [vmem:[%s8085_s6 + $0x18] sm:$0xf]  ;;  %v4687_v17 = vpop.permute.xlu0 %4686 }
 0x268   :  { %6879 = vmatprep.subr.msk.mxu1 %vm954_vm1, %v7665_v41  ;;  %6768 = vmatprep.subr.msk.mxu0 %vm954_vm1, %v2201_v19 }
 0x269   :  { %4915 = vmatprep.mubr.f32.mxu1 %v7137_v1  ;;  %2360 = vmatprep.mubr.f32.mxu0 %v7137_v1 }
 0x26a   :  { %6878 = vmatmul.mubr.msk.f32.vlgmr.msra.gmra.mrb[6].mxu1 %vm950_vm2, %v6869_v13  ;;  %6767 = vmatmul.mubr.msk.f32.vlgmr.msra.gmra.mrb[6].mxu0 %vm950_vm2, %v6761_v42 }
 0x26b   :  { %6880 = vmatpush1.msk.msra.mxu1 %vm954_vm1, %v7702_v51  ;;  %6769 = vmatpush1.msk.msra.mxu0 %vm954_vm1, %v7735_v57 }
 0x26c   :  { %6771 = vmatprep.subr.msk.mxu0 %vm954_vm1, %v7518_v15  ;;  %4986 = vmatprep.mubr.f32.mxu1 %v7137_v1  ;;  %v2203_v15 = vpop.permute.xlu1 %2202 }
 0x26d   :  { %6883 = vmatprep.subr.msk.mxu1 %vm954_vm1, %v7388_v61  ;;  %2431 = vmatprep.mubr.f32.mxu0 %v7137_v1 }
 0x26e   :  { %6881 = vmatmul.mubr.msk.f32.vlgmr.msra.gmra.mrb[0].mxu1 %vm950_vm2, %v6869_v13  ;;  %6770 = vmatmul.mubr.msk.f32.vlgmr.msra.gmra.mrb[8].mxu0 %vm950_vm2, %v6761_v42 }
 0x26f   :  { %6884 = vmatpush1.msk.msra.mxu1 %vm954_vm1, %v7540_v20  ;;  %6772 = vmatpush1.msk.msra.mxu0 %vm954_vm1, %v7454_v9  ;;  %v6774_v9 = vld [vmem:[%s8085_s6 + $0x8] sm:$0xf] }
 0x270   :  { %5082 = vmatprep.mubr.f32.mxu1 %v7137_v1  ;;  %2502 = vmatprep.mubr.f32.mxu0 %v7137_v1 }
 0x271   :  { %6775 = vmatprep.subr.msk.mxu0 %vm954_vm1, %v2195_v14  ;;  %6886 = vmatprep.subr.msk.mxu1 %vm954_vm1, %v7707_v52 }
 0x272   :  { %6885 = vmatmul.mubr.msk.f32.vlgmr.msra.gmra.mrb[2].mxu1 %vm950_vm2, %v6882_v8  ;;  %6773 = vmatmul.mubr.msk.f32.vlgmr.msra.gmra.mrb[10].mxu0 %vm950_vm2, %v6761_v42 }
 0x273   :  { %6776 = vmatpush1.msk.msra.mxu0 %vm954_vm1, %v7763_v3  ;;  %6887 = vmatpush1.msk.msra.mxu1 %vm954_vm1, %v7733_v56 }
 0x274   :  { %6778 = vmatprep.subr.msk.mxu0 %vm954_vm1, %v7529_v18  ;;  %5153 = vmatprep.mubr.f32.mxu1 %v7137_v1  ;;  %v6895_v18 = vld [vmem:[%s8084_s5 + $0x1c] sm:$0xf] }
 0x275   :  { %6889 = vmatprep.subr.msk.mxu1 %vm954_vm1, %v7406_v0  ;;  %2598 = vmatprep.mubr.f32.mxu0 %v7137_v1 }
 0x276   :  { %6888 = vmatmul.mubr.msk.f32.vlgmr.msra.gmra.mrb[4].mxu1 %vm950_vm2, %v6882_v8  ;;  %6777 = vmatmul.mubr.msk.f32.vlgmr.msra.gmra.mrb[4].mxu0 %vm950_vm2, %v6774_v9 }
 0x277   :  { %6890 = vmatpush1.msk.msra.mxu1 %vm954_vm1, %v7548_v22  ;;  %6779 = vmatpush1.msk.msra.mxu0 %vm954_vm1, %v7254_v7  ;;  %v5311_v7 = vpop.permute.xlu0 %5310 }
 0x278   :  { %5224 = vmatprep.mubr.f32.mxu1 %v7137_v1  ;;  %6892 = vmatprep.subr.msk.mxu1 %vm954_vm1, %v7749_v58 }
 0x279   :  { %2669 = vmatprep.mubr.f32.mxu0 %v7137_v1  ;;  %6781 = vmatprep.subr.msk.mxu0 %vm954_vm1, %v2203_v15 }
 0x27a   :  { %6891 = vmatmul.mubr.msk.f32.vlgmr.msra.gmra.mrb[6].mxu1 %vm950_vm2, %v6882_v8  ;;  %6780 = vmatmul.mubr.msk.f32.vlgmr.msra.gmra.mrb[6].mxu0 %vm950_vm2, %v6774_v9 }
 0x27b   :  { %6893 = vmatpush1.msk.msra.mxu1 %vm954_vm1, %v4687_v17  ;;  %6782 = vmatpush1.msk.msra.mxu0 %vm954_vm1, %v7795_v12 }
 0x27c   :  { %6896 = vmatprep.subr.msk.mxu1 %vm954_vm1, %v7432_v5  ;;  %6784 = vmatprep.subr.msk.mxu0 %vm954_vm1, %v7552_v23 }
 0x27d   :  { %5295 = vmatprep.mubr.f32.mxu1 %v7137_v1  ;;  %2740 = vmatprep.mubr.f32.mxu0 %v7137_v1 }
 0x27e   :  { %6894 = vmatmul.mubr.msk.f32.vlgmr.msra.gmra.mrb[0].mxu1 %vm950_vm2, %v6882_v8  ;;  %6783 = vmatmul.mubr.msk.f32.vlgmr.msra.gmra.mrb[8].mxu0 %vm950_vm2, %v6774_v9 }
 0x27f   :  { %6897 = vmatpush1.msk.msra.mxu1 %vm954_vm1, %v7421_v4  ;;  %6785 = vmatpush1.msk.msra.mxu0 %vm954_vm1, %v7357_v43  ;;  %v5315_v43 = vpop.permute.xlu0 %5314 }
 0x280   :  { %6899 = vmatprep.subr.msk.mxu1 %vm954_vm1, %v5311_v7  ;;  %6788 = vmatprep.subr.msk.mxu0 %vm954_vm1, %v7373_v53 }
 0x281   :  { %5393 = vmatprep.mubr.f32.mxu1 %v7137_v1  ;;  %2811 = vmatprep.mubr.f32.mxu0 %v7137_v1 }
 0x282   :  { %6898 = vmatmul.mubr.msk.f32.vlgmr.msra.gmra.mrb[2].mxu1 %vm950_vm2, %v6895_v18  ;;  %6786 = vmatmul.mubr.msk.f32.vlgmr.msra.gmra.mrb[10].mxu0 %vm950_vm2, %v6774_v9 }
 0x283   :  { %6900 = vmatpush1.msk.msra.mxu1 %vm954_vm1, %v7657_v40  ;;  %6789 = vmatpush1.msk.msra.mxu0 %vm954_vm1, %v7670_v44  ;;  %v5313_v53 = vpop.permute.xlu0 %5312 }
 0x284   :  { %6902 = vmatprep.subr.msk.mxu1 %vm954_vm1, %v7393_v62  ;;  %6791 = vmatprep.subr.msk.mxu0 %vm954_vm1, %v7421_v4 }
 0x285   :  { %5464 = vmatprep.mubr.f32.mxu1 %v7137_v1  ;;  %2913 = vmatprep.mubr.f32.mxu0 %v7137_v1 }
 0x286   :  { %6901 = vmatmul.mubr.msk.f32.vlgmr.msra.gmra.mrb[4].mxu1 %vm950_vm2, %v6895_v18  ;;  %6790 = vmatmul.mubr.msk.f32.vlgmr.msra.gmra.mrb[4].mxu0 %vm950_vm2, %v7523_v16 }
 0x287   :  { %6903 = vmatpush1.msk.msra.mxu1 %vm954_vm1, %v7381_v60  ;;  %6792 = vmatpush1.msk.msra.mxu0 %vm954_vm1, %v7641_v37  ;;  %v5317_v60 = vpop.permute.xlu0 %5316 }
 0x288   :  { %6905 = vmatprep.subr.msk.mxu1 %vm954_vm1, %v5315_v43  ;;  %6794 = vmatprep.subr.msk.mxu0 %vm954_vm1, %v7378_v59  ;;  %v6908_v59 = vld [vmem:[%s8085_s6 + $0x1c] sm:$0xf] }
 0x289   :  { %5535 = vmatprep.mubr.f32.mxu1 %v7137_v1  ;;  %2984 = vmatprep.mubr.f32.mxu0 %v7137_v1 }
 0x28a   :  { %6904 = vmatmul.mubr.msk.f32.vlgmr.msra.gmra.mrb[6].mxu1 %vm950_vm2, %v6895_v18  ;;  %6793 = vmatmul.mubr.msk.f32.vlgmr.msra.gmra.mrb[6].mxu0 %vm950_vm2, %v7523_v16 }
 0x28b   :  { %6906 = vmatpush1.msk.msra.mxu1 %vm954_vm1, %v7665_v41  ;;  %6795 = vmatpush1.msk.msra.mxu0 %vm954_vm1, %v7685_v48 }
 0x28c   :  { %5606 = vmatprep.mubr.f32.mxu1 %v7137_v1  ;;  %3055 = vmatprep.mubr.f32.mxu0 %v7137_v1 }
 0x28d   :  { %6909 = vmatprep.subr.msk.mxu1 %vm954_vm1, %v7399_v63 }
 0x28e   :  { %6907 = vmatmul.mubr.msk.f32.vlgmr.msra.gmra.mrb[0].mxu1 %vm950_vm2, %v6895_v18  ;;  %6796 = vmatmul.mubr.msk.f32.vlgmr.msra.gmra.mrb[8].mxu0 %vm950_vm2, %v7523_v16 }
 0x28f   :  { %6910 = vmatpush1.msk.msra.mxu1 %vm954_vm1, %v7388_v61  ;;  %5696 = vmatprep.mubr.f32.mxu1 %v7137_v1  ;;  %v5925_v61 = vpop.permute.xlu0 %5924 }
 0x290   :  { %6912 = vmatprep.subr.msk.mxu1 %vm954_vm1, %v5313_v53 }
 0x292   :  { %6911 = vmatmul.mubr.msk.f32.vlgmr.msra.gmra.mrb[2].mxu1 %vm950_vm2, %v6908_v59 }
 0x293   :  { %6913 = vmatpush1.msk.msra.mxu1 %vm954_vm1, %v7707_v52  ;;  %5767 = vmatprep.mubr.f32.mxu1 %v7137_v1  ;;  %v5929_v4 = vpop.permute.xlu0 %5928 }
 0x294   :  { %6915 = vmatprep.subr.msk.mxu1 %vm954_vm1, %v7412_v2 }
 0x296   :  { %6914 = vmatmul.mubr.msk.f32.vlgmr.msra.gmra.mrb[4].mxu1 %vm950_vm2, %v6908_v59 }
 0x297   :  { %6916 = vmatpush1.msk.msra.mxu1 %vm954_vm1, %v7406_v0  ;;  %5838 = vmatprep.mubr.f32.mxu1 %v7137_v1  ;;  %v6921_v0 = vld [vmem:[%s8084_s5 + $0x20] sm:$0xf] }
 0x298   :  { %6918 = vmatprep.subr.msk.mxu1 %vm954_vm1, %v5317_v60 }
 0x29a   :  { %6917 = vmatmul.mubr.msk.f32.vlgmr.msra.gmra.mrb[6].mxu1 %vm950_vm2, %v6908_v59 }
 0x29b   :  { %6919 = vmatpush1.msk.msra.mxu1 %vm954_vm1, %v7749_v58  ;;  %5909 = vmatprep.mubr.f32.mxu1 %v7137_v1 }
 0x29c   :  { %6926 = vmatprep.subr.msk.mxu1 %vm954_vm1, %v7558_v24 }
 0x29e   :  { %6920 = vmatmul.mubr.msk.f32.vlgmr.msra.gmra.mrb[0].mxu1 %vm950_vm2, %v6908_v59 }
 0x29f   :  { %6927 = vmatpush1.msk.msra.mxu1 %vm954_vm1, %v7432_v5  ;;  %6019 = vmatprep.mubr.f32.mxu1 %v7137_v1  ;;  %v5927_v5 = vpop.permute.xlu1 %5926 }
 0x2a0   :  { %6929 = vmatprep.subr.msk.mxu1 %vm954_vm1, %v5925_v61 }
 0x2a2   :  { %6928 = vmatmul.mubr.msk.f32.vlgmr.msra.gmra.mrb[2].mxu1 %vm950_vm2, %v6921_v0 }
 0x2a3   :  { %6930 = vmatpush1.msk.msra.mxu1 %vm954_vm1, %v5311_v7  ;;  %6090 = vmatprep.mubr.f32.mxu1 %v7137_v1 }
 0x2a4   :  { %6932 = vmatprep.subr.msk.mxu1 %vm954_vm1, %v7568_v26  ;;  %v6562_v26 = vsub.s32 1, %v7361_v45 }
 0x2a6   :  { %6931 = vmatmul.mubr.msk.f32.vlgmr.msra.gmra.mrb[4].mxu1 %vm950_vm2, %v6921_v0 }
 0x2a7   :  { %6933 = vmatpush1.msk.msra.mxu1 %vm954_vm1, %v7393_v62  ;;  %6161 = vmatprep.mubr.f32.mxu1 %v7137_v1  ;;  %v6938_v62 = vld [vmem:[%s8085_s6 + $0x20] sm:$0xf] }
 0x2a8   :  { %6935 = vmatprep.subr.msk.mxu1 %vm954_vm1, %v5929_v4 }
 0x2aa   :  { %6934 = vmatmul.mubr.msk.f32.vlgmr.msra.gmra.mrb[6].mxu1 %vm950_vm2, %v6921_v0 }
 0x2ab   :  { %6936 = vmatpush1.msk.msra.mxu1 %vm954_vm1, %v5315_v43  ;;  %6232 = vmatprep.mubr.f32.mxu1 %v7137_v1 }
 0x2ac   :  { %6939 = vmatprep.subr.msk.mxu1 %vm954_vm1, %v7597_v31  ;;  %v6554_v31 = vpop.permute.xlu1 %6553 }
 0x2ae   :  { %6937 = vmatmul.mubr.msk.f32.vlgmr.msra.gmra.mrb[0].mxu1 %vm950_vm2, %v6921_v0 }
 0x2af   :  { %6940 = vmatpush1.msk.msra.mxu1 %vm954_vm1, %v7399_v63  ;;  %6322 = vmatprep.mubr.f32.mxu1 %v7137_v1  ;;  %v5931_v63 = vpop.permute.xlu0 %5930 }
 0x2b0   :  { %6942 = vmatprep.subr.msk.mxu1 %vm954_vm1, %v5927_v5 }
 0x2b2   :  { %6941 = vmatmul.mubr.msk.f32.vlgmr.msra.gmra.mrb[2].mxu1 %vm950_vm2, %v6938_v62 }
 0x2b3   :  { %6943 = vmatpush1.msk.msra.mxu1 %vm954_vm1, %v5313_v53  ;;  %6393 = vmatprep.mubr.f32.mxu1 %v7137_v1  ;;  %v6617_v12 = vpop.permute.xlu0 %6616 }
 0x2b4   :  { %6945 = vmatprep.subr.msk.mxu1 %vm954_vm1, %v7623_v35 }
 0x2b6   :  { %6944 = vmatmul.mubr.msk.f32.vlgmr.msra.gmra.mrb[4].mxu1 %vm950_vm2, %v6938_v62 }
 0x2b7   :  { %6946 = vmatpush1.msk.msra.mxu1 %vm954_vm1, %v7412_v2  ;;  %6464 = vmatprep.mubr.f32.mxu1 %v7137_v1 }
 0x2b8   :  { %6948 = vmatprep.subr.msk.mxu1 %vm954_vm1, %v5931_v63 }
 0x2ba   :  { %6947 = vmatmul.mubr.msk.f32.vlgmr.msra.gmra.mrb[6].mxu1 %vm950_vm2, %v6938_v62 }
 0x2bb   :  { %6949 = vmatpush1.msk.msra.mxu1 %vm954_vm1, %v5317_v60  ;;  %6535 = vmatprep.mubr.f32.mxu1 %v7137_v1  ;;  %v6563_v1 = vrot.slane %v7367_v47, %v6562_v26 }
 0x2be   :  { %6950 = vmatmul.mubr.msk.f32.vlgmr.msra.gmra.mrb[0].mxu1 %vm950_vm2, %v6938_v62 }
 0x355   :  { %v2813_v16 = vpop.f32.mrb[10].mxu0 }
 0x356   :  { %v2815_v20 = vpop.f32.mrb[11].mxu0 }
 0x359   :  { %v2915_v21 = vpop.f32.mrb[4].mxu0 }
 0x35a   :  { %v2917_v22 = vpop.f32.mrb[5].mxu0 }
 0x35d   :  { %v2986_v23 = vpop.f32.mrb[6].mxu0 }
 0x35e   :  { %v2988_v24 = vpop.f32.mrb[7].mxu0 }
 0x361   :  { %v3057_v25 = vpop.f32.mrb[8].mxu0 }
 0x362   :  { %v3059_v2 = vpop.f32.mrb[9].mxu0 }
 0x385   :  { %v6324_v27 = vpop.f32.mrb[2].mxu1 }
 0x386   :  { %v6953_v28 = vadd.f32 %v6324_v27, %v2915_v21  ;;  %v6326_v29 = vpop.f32.mrb[3].mxu1 }
 0x387   :  { %v6954_v32 = vadd.f32 %v6326_v29, %v2917_v22 }
 0x388   :  { %v6556_v34 = vadd.f32 %v6953_v28, %v6554_v31 }
 0x389   :  { %v6557_v35 = vadd.f32 %v6954_v32, %v6554_v31  ;;  %v6395_v36 = vpop.f32.mrb[4].mxu1 }
 0x38a   :  { %v6575_v37 = vmul.f32 %v6556_v34, %v7370_v49  ;;  %v6955_v38 = vadd.f32 %v6395_v36, %v2986_v23  ;;  %v6397_v40 = vpop.f32.mrb[5].mxu1 }
 0x38b   :  { %v6576_v41 = vmul.f32 %v6563_v1, %v6557_v35  ;;  %v6956_v44 = vadd.f32 %v6397_v40, %v2988_v24 }
 0x38c   :  { %v6558_v48 = vadd.f32 %v6955_v38, %v6554_v31  ;;  %v6589_v50 = vsel %vm954_vm1, %v6575_v37, 0.0  ;;  %v6599_v51 = vmul.f32 %v6575_v37, %v6575_v37 }
 0x38d   :  { %v6583_v52 = vcombine.low %v6575_v37, %v6576_v41  ;;  %v6559_v54 = vadd.f32 %v6956_v44, %v6554_v31  ;;  %v6466_v45 = vpop.f32.mrb[6].mxu1  ;;  %v6590_v55 = vsel %vm954_vm1, %v6576_v41, 0.0  ;;  %v6600_v56 = vmul.f32 %v6576_v41, %v6576_v41 }
 0x38e   :  { %v6577_v57 = vmul.f32 %v6567_v39, %v6558_v48  ;;  %v6957_v58 = vadd.f32 %v6466_v45, %v3057_v25  ;;  %v6468_v3 = vpop.f32.mrb[7].mxu1  ;;  %v6591_v10 = vadd.f32 %v6590_v55, %v6589_v50  ;;  %v6603_v11 = vsel %vm954_vm1, %v6599_v51, 0.0 }
 0x38f   :  { %6587 = vst [vmem:[%s8086_s8] sm:$0xff] %v6583_v52  ;;  %v6578_v47 = vmul.f32 %v6571_v46, %v6559_v54  ;;  %v6958_v6 = vadd.f32 %v6468_v3, %v3059_v2  ;;  %v6604_v13 = vsel %vm954_vm1, %v6600_v56, 0.0 }
 0x390   :  { %v6619_v42 = vadd.f32 %v6957_v58, %v6617_v12  ;;  %v6592_v19 = vsel %vm954_vm1, %v6577_v57, 0.0  ;;  %v6601_v8 = vmul.f32 %v6577_v57, %v6577_v57  ;;  %v6605_v14 = vadd.f32 %v6604_v13, %v6603_v11 }
 0x391   :  { %v6584_v9 = vcombine.low %v6577_v57, %v6578_v47  ;;  %v6620_v15 = vadd.f32 %v6958_v6, %v6617_v12  ;;  %v6537_v17 = vpop.f32.mrb[0].mxu1  ;;  %v6593_v7 = vadd.f32 %v6592_v19, %v6591_v10  ;;  %v6594_v18 = vsel %vm954_vm1, %v6578_v47, 0.0 }
 0x392   :  { %v6623_v43 = vmul.f32 %v6619_v42, %v7370_v49  ;;  %v6959_v53 = vadd.f32 %v6537_v17, %v2813_v16  ;;  %v6539_v59 = vpop.f32.mrb[1].mxu1  ;;  %v6602_v60 = vmul.f32 %v6578_v47, %v6578_v47  ;;  %v6606_v61 = vsel %vm954_vm1, %v6601_v8, 0.0 }
 0x393   :  { %6588 = vst [vmem:[%s8086_s8 + $0x8] sm:$0xff] %v6584_v9  ;;  %v6624_v0 = vmul.f32 %v6620_v15, %v6563_v1  ;;  %v6960_v4 = vadd.f32 %v6539_v59, %v2815_v20  ;;  %v6595_v5 = vadd.f32 %v6594_v18, %v6593_v7  ;;  %v6607_v62 = vadd.f32 %v6606_v61, %v6605_v14 }
 0x394   :  { %v6621_v63 = vadd.f32 %v6959_v53, %v6617_v12  ;;  %v6608_v21 = vsel %vm954_vm1, %v6602_v60, 0.0  ;;  %v6638_v22 = vsel %vm954_vm1, %v6623_v43, 0.0  ;;  %v6648_v23 = vmul.f32 %v6623_v43, %v6623_v43 }
 0x395   :  { %v6631_v49 = vcombine.low %v6623_v43, %v6624_v0  ;;  %v6622_v16 = vadd.f32 %v6960_v4, %v6617_v12  ;;  %6596 = vadd.xlane.f32.xlu1 %v6595_v5  ;;  %v6609_v24 = vadd.f32 %v6608_v21, %v6607_v62  ;;  %v6639_v25 = vsel %vm954_vm1, %v6624_v0, 0.0 }
 0x396   :  { %v6625_v2 = vmul.f32 %v6621_v63, %v6567_v39  ;;  %v6640_v26 = vadd.f32 %v6639_v25, %v6638_v22  ;;  %v6649_v27 = vmul.f32 %v6624_v0, %v6624_v0  ;;  %v6652_v28 = vsel %vm954_vm1, %v6648_v23, 0.0 }
 0x397   :  { %6951 = vst [vmem:[%s8086_s8 + $0x10] sm:$0xff] %v6631_v49  ;;  %v6626_v20 = vmul.f32 %v6622_v16, %v6571_v46  ;;  %6610 = vadd.xlane.f32.xlu0 %v6609_v24 }
 0x398   :  { %v6641_v29 = vsel %vm954_vm1, %v6625_v2, 0.0  ;;  %v6650_v30 = vmul.f32 %v6625_v2, %v6625_v2  ;;  %v6653_v31 = vsel %vm954_vm1, %v6649_v27, 0.0 }
 0x399   :  { %v6632_v32 = vcombine.low %v6625_v2, %v6626_v20  ;;  %v6642_v1 = vadd.f32 %v6641_v29, %v6640_v26  ;;  %v6643_v33 = vsel %vm954_vm1, %v6626_v20, 0.0  ;;  %v6651_v34 = vmul.f32 %v6626_v20, %v6626_v20 }
 0x39a   :  { %v6654_v35 = vadd.f32 %v6653_v31, %v6652_v28  ;;  %v6655_v36 = vsel %vm954_vm1, %v6650_v30, 0.0 }
 0x39b   :  { %6952 = vst [vmem:[%s8086_s8 + $0x18] sm:$0xff] %v6632_v32  ;;  %v6644_v37 = vadd.f32 %v6643_v33, %v6642_v1  ;;  %v6657_v38 = vsel %vm954_vm1, %v6651_v34, 0.0 }
 0x39c   :  { %v6656_v39 = vadd.f32 %v6655_v36, %v6654_v35 }
 0x39d   :  { %6645 = vadd.xlane.f32.xlu0 %v6644_v37 }
 0x39e   :  { %v6658_v40 = vadd.f32 %v6657_v38, %v6656_v39 }
 0x3a0   :  { %6659 = vadd.xlane.f32.xlu1 %v6658_v40 }
 0x422   :  { %v6597_v44 = vpop.xlane.xlu1 %6596 }
 0x424   :  { %v6611_v41 = vpop.xlane.xlu0 %6610 }
 0x42a   :  { %v6646_v46 = vpop.xlane.xlu0 %6645 }
 0x42b   :  { %v6647_v50 = vadd.f32 %v6646_v46, %v6597_v44 }
 0x42d   :  { %v6660_v48 = vpop.xlane.xlu1 %6659 }
 0x42e   :  { %v6661_v51 = vadd.f32 %v6660_v48, %v6611_v41 }
 0x430   :  { %v6663_v52 = vsel %vm6662_vm3, %v6647_v50, %v6661_v51 }
 0x431   :  { %6665 = vst.msk [vmem:[%s8087_s9] sm:$0xf] %vm6664_vm4, %v6663_v52 }

</bundles_post_ra>
